<compile_context>
chip_gen: v6e
topology: v6e:2x2x1
jax: 0.10.0
libtpu: 0.0.40
codegen_flags: <defaults>
</compile_context>

<pallas_src>
import functools

import jax
import jax.numpy as jnp
from jax.experimental import pallas as pl
from jax.experimental.pallas import tpu as pltpu


def _round_up(x: int, m: int) -> int:
    return ((x + m - 1) // m) * m


def autopad(k: int, p: int = 0, d: int = 1) -> int:
    # Mirrors nets/common.py exactly (including p > 0 being replaced by k // 2).
    if d > 1:
        k = d * (k - 1) + 1
    if p > 0:
        p = k // 2
    return p


# ----------------------------- Pallas kernel ------------------------------ #
def _conv_bn_act_kernel(x_ref, w_ref, b_ref, o_ref, acc_ref, *, k, s, d, Wq, L,
                        apply_act):
    """Fused conv + BN (+ SiLU) for one image x one C_out tile.

    x_ref:   (1, s, s, R_flat, C_in) bf16  phase-decomposed, row-flattened,
                                           spatially padded image
    w_ref:   (k*k, C_in, TN)         bf16  conv weight with BN scale folded in
    b_ref:   (1, TN)                 f32   folded BN bias
    o_ref:   (1, L, TN)              bf16  flattened (Ho, Wq) output rows
    acc_ref: (L, TN)                 f32   VMEM accumulator scratch
    """
    acc_ref[...] = jnp.zeros_like(acc_ref)
    # k*k statically-unrolled taps; each tap is a unit-stride row window of the
    # flattened image -> one MXU matmul contracting over C_in.
    for kh in range(k):
        ph_a, qh = (kh * d) % s, (kh * d) // s
        for kw in range(k):
            ph_b, qw = (kw * d) % s, (kw * d) // s
            t = qh * Wq + qw                          # static row shift of tap
            win = x_ref[0, ph_a, ph_b, pl.ds(t, L), :]          # (L, C_in)
            acc_ref[...] += jnp.dot(win, w_ref[kh * k + kw],
                                    preferred_element_type=jnp.float32)
    y = acc_ref[...] + b_ref[...]
    if apply_act:
        # SiLU: y * sigmoid(y) = y / (1 + exp(-y)); exp + approx recip -> EUP.
        y = y * pl.reciprocal(1.0 + jnp.exp(-y), approx=True)
    o_ref[0] = y.astype(o_ref.dtype)


def _fused_conv_call(xph, wk, bias, *, k, s, d, Wq, L, tile_n, apply_act,
                     out_dtype):
    N = xph.shape[0]
    R_flat, C_in = xph.shape[3], xph.shape[4]
    C_pad = wk.shape[-1]
    assert C_pad % tile_n == 0

    kernel = functools.partial(_conv_bn_act_kernel, k=k, s=s, d=d, Wq=Wq, L=L,
                               apply_act=apply_act)

    # VMEM budget from the actual buffer sizes (inputs/outputs double-buffered
    # by the Pallas pipeline) instead of a fixed limit.
    bytes_x = s * s * R_flat * C_in * 2
    bytes_w = k * k * C_in * tile_n * 2
    bytes_o = L * tile_n * 2
    bytes_acc = L * tile_n * 4
    bytes_win = L * C_in * 2
    vmem_needed = (2 * (bytes_x + bytes_w + tile_n * 4 + bytes_o)
                   + bytes_acc + 4 * bytes_win)
    if vmem_needed > (48 << 20):
        # TODO(synk): tile the flattened output rows (halo DMA) for huge images.
        raise NotImplementedError(
            "image / C_out tile too large for VMEM; reduce tile_n or add row tiling")
    vmem_limit = int(min(max(vmem_needed * 1.25 + (4 << 20), 16 << 20), 64 << 20))

    return pl.pallas_call(
        kernel,
        out_shape=jax.ShapeDtypeStruct((N, L, C_pad), out_dtype),
        grid_spec=pltpu.PrefetchScalarGridSpec(
            num_scalar_prefetch=0,
            grid=(N, C_pad // tile_n),
            in_specs=[
                # Whole image per grid row; re-DMA'd only when n changes
                # (block index is constant across the inner j steps).
                pl.BlockSpec((1, s, s, R_flat, C_in),
                             lambda n, j: (n, 0, 0, 0, 0)),
                # Weight: index depends only on j (constant when C_pad==tile_n)
                # -> fetched once / per C_out tile and kept VMEM-resident,
                # not re-streamed per M-tile.
                pl.BlockSpec((k * k, C_in, tile_n), lambda n, j: (0, 0, j)),
                pl.BlockSpec((1, tile_n), lambda n, j: (0, j)),
            ],
            out_specs=pl.BlockSpec((1, L, tile_n), lambda n, j: (n, 0, j)),
            scratch_shapes=[pltpu.VMEM((L, tile_n), jnp.float32)],
        ),
        compiler_params=pltpu.CompilerParams(
            dimension_semantics=("parallel", "parallel"),
            vmem_limit_bytes=vmem_limit,
        ),
    )(xph, wk, bias)


# ------------------------------ JAX wrapper -------------------------------- #
def _phase_decompose(xp, *, k, s, d, Ho, Wo):
    """(N, Hp, Wp, C) padded NHWC -> (N, s, s, R_flat, C): phase (a, b) holds
    xp[:, a::s, b::s, :], row-flattened, so every conv tap becomes a unit-stride
    statically-offset row window inside the kernel.  Total bytes ~= 1x input."""
    N, Hp, Wp, C = xp.shape
    qmax = ((k - 1) * d) // s
    Hq, Wq = Ho + qmax, Wo + qmax
    pad_h = max(0, Hq * s - Hp)
    pad_w = max(0, Wq * s - Wp)
    if pad_h or pad_w:
        xp = jnp.pad(xp, ((0, 0), (0, pad_h), (0, pad_w), (0, 0)))
    if s == 1:
        xph = xp[:, :Hq, :Wq, :].reshape(N, 1, 1, Hq * Wq, C)
    else:
        xr = xp[:, :Hq * s, :Wq * s, :].reshape(N, Hq, s, Wq, s, C)
        xph = jnp.transpose(xr, (0, 2, 4, 1, 3, 5)).reshape(N, s, s, Hq * Wq, C)
    R_flat = _round_up(Hq * Wq + qmax, 8)       # room for the largest tap shift
    xph = jnp.pad(xph, ((0, 0), (0, 0), (0, 0), (0, R_flat - Hq * Wq), (0, 0)))
    return xph, Wq, qmax


def conv_bn_silu_forward(x_nchw, weight, gamma, beta, running_mean, running_var,
                         *, k, s=1, p=0, d=1, g=1, eps=1e-5, act=True,
                         tile_n=None, out_dtype=jnp.bfloat16):
    """Conv(ch_in, ch_out, k, s, p, d, g=1, act).forward with BatchNorm in eval
    mode.  x_nchw: (N, C_in, H, W) -> (N, C_out, Ho, Wo) (bf16 by default)."""
    assert g == 1, "grouped convolution not supported"  # TODO(synk)
    N, C_in, H, W = x_nchw.shape
    C_out = weight.shape[0]
    pad = autopad(k=k, p=p, d=d)
    k_eff = d * (k - 1) + 1
    Ho = (H + 2 * pad - k_eff) // s + 1
    Wo = (W + 2 * pad - k_eff) // s + 1

    # NHWC bf16 + spatial zero-pad + phase decompose: a couple of cheap XLA
    # passes over ~1x the input, replacing the old k^2-expanded im2col matrix.
    x = jnp.transpose(x_nchw, (0, 2, 3, 1)).astype(jnp.bfloat16)
    xp = jnp.pad(x, ((0, 0), (pad, pad), (pad, pad), (0, 0)))
    xph, Wq, qmax = _phase_decompose(xp, k=k, s=s, d=d, Ho=Ho, Wo=Wo)

    # Fold BatchNorm (eval mode) into the weight (scale) and a per-C_out bias.
    scale = (gamma / jnp.sqrt(running_var + eps)).astype(jnp.float32)
    bias = beta.astype(jnp.float32) - running_mean.astype(jnp.float32) * scale

    # (C_out, C_in, kh, kw) -> (k*k, C_in, C_out), fold BN scale, cast bf16.
    wk = jnp.transpose(weight.astype(jnp.float32), (2, 3, 1, 0))
    wk = wk.reshape(k * k, C_in, C_out) * scale[None, None, :]
    wk = wk.astype(jnp.bfloat16)

    # Pad C_out to a multiple of 128 -> lane-dense (unmasked) output stores.
    C_pad = _round_up(C_out, 128)
    if C_pad != C_out:
        wk = jnp.pad(wk, ((0, 0), (0, 0), (0, C_pad - C_out)))
        bias = jnp.pad(bias, (0, C_pad - C_out))
    bias = bias.reshape(1, C_pad)

    # C_out tile: keep the whole weight slab VMEM-resident when small (single
    # DMA for the whole kernel), else 256-wide tiles (v6e/v7x MXU width; use
    # tile_n=128 on v5e).
    if tile_n is None:
        tile_n = C_pad if k * k * C_in * C_pad * 2 <= (6 << 20) else \
            (256 if C_pad % 256 == 0 else 128)

    L = Ho * Wq          # flattened output rows incl. a qmax-wide halo per row
    out = _fused_conv_call(xph, wk, bias, k=k, s=s, d=d, Wq=Wq, L=L,
                           tile_n=tile_n, apply_act=(act is True),
                           out_dtype=out_dtype)
    out = out.reshape(N, Ho, Wq, C_pad)[:, :, :Wo, :C_out]   # drop halo / pad
    return jnp.transpose(out, (0, 3, 1, 2))                  # back to NCHW


# --------------------------------- main ------------------------------------ #
if __name__ == "__main__":
    ch_in, ch_out = 4, 8
    N, H, W = 2, 16, 16

    key = jax.random.PRNGKey(0)
    kx, kw_, kg, kb, km, kv = jax.random.split(key, 6)
    x = jax.random.normal(kx, (N, ch_in, H, W), dtype=jnp.float32)
    weight = jax.random.normal(kw_, (ch_out, ch_in, 3, 3), dtype=jnp.float32) * 0.1
    gamma = jax.random.uniform(kg, (ch_out,), minval=0.5, maxval=1.5)
    beta = jax.random.normal(kb, (ch_out,)) * 0.1
    running_mean = jax.random.normal(km, (ch_out,)) * 0.1
    running_var = jax.random.uniform(kv, (ch_out,), minval=0.5, maxval=1.5)

    def reference(k, s, p, d):
        pad = autopad(k=k, p=p, d=d)
        ref = jax.lax.conv_general_dilated(
            x, weight, window_strides=(s, s), padding=[(pad, pad), (pad, pad)],
            rhs_dilation=(d, d), dimension_numbers=("NCHW", "OIHW", "NCHW"))
        scale = gamma / jnp.sqrt(running_var + 1e-5)
        bias = beta - running_mean * scale
        ref = ref * scale[None, :, None, None] + bias[None, :, None, None]
        return ref * jax.nn.sigmoid(ref)

    # Conv(4, 8, k=3, s=1, p=1) and a strided variant Conv(4, 8, k=3, s=2, p=1).
    for (k, s, p, d) in [(3, 1, 1, 1), (3, 2, 1, 1)]:
        fwd = jax.jit(functools.partial(conv_bn_silu_forward, k=k, s=s, p=p, d=d))
        out = jax.block_until_ready(
            fwd(x, weight, gamma, beta, running_mean, running_var))
        ref = reference(k, s, p, d)
        assert out.shape == ref.shape, (out.shape, ref.shape)
        out_f32 = out.astype(jnp.float32)
        # bf16 inputs/weights/output + approx reciprocal -> loosened tolerance.
        err = float(jnp.max(jnp.abs(out_f32 - ref)))
        assert jnp.allclose(out_f32, ref, atol=5e-2, rtol=5e-2), err

    print("KERNEL_OK")
</pallas_src>

<mosaic_0001>
module attributes {stable_mosaic.version = 11 : i64} {
  func.func @_conv_bn_act_kernel(%arg0: i32, %arg1: i32, %arg2: memref<1x1x1x328x4xbf16, #tpu.memory_space<vmem>>, %arg3: memref<9x4x128xbf16, #tpu.memory_space<vmem>>, %arg4: memref<1x128xf32, #tpu.memory_space<vmem>>, %arg5: memref<1x288x128xbf16, #tpu.memory_space<vmem>>, %arg6: memref<288x128xf32, #tpu.memory_space<vmem>>) attributes {dimension_semantics = [#tpu.dimension_semantics<parallel>, #tpu.dimension_semantics<parallel>], iteration_bounds = array<i64: 2, 1>, scalar_prefetch = 0 : i64, scratch_operands = 1 : i64, tpu.core_type = #tpu.core_type<tc>, window_params = [{transform_indices = @transform_0, window_bounds = array<i64: 1, 1, 1, 328, 4>}, {transform_indices = @transform_1, window_bounds = array<i64: 9, 4, 128>}, {transform_indices = @transform_2, window_bounds = array<i64: 1, 128>}, {transform_indices = @transform_3, window_bounds = array<i64: 1, 288, 128>}]} {
    %cst = arith.constant 0.000000e+00 : f32
    %0 = vector.broadcast %cst : f32 to vector<288x128xf32>
    %c0 = arith.constant 0 : index
    %c0_0 = arith.constant 0 : index
    %1 = vector.load %arg6[%c0, %c0_0] : memref<288x128xf32, #tpu.memory_space<vmem>>, vector<288x128xf32>
    tpu.vector_store %arg6[%c0, %c0_0], %0 {strides = array<i32>} : memref<288x128xf32, #tpu.memory_space<vmem>>, vector<288x128xf32>,
    %c0_1 = arith.constant 0 : index
    %c0_2 = arith.constant 0 : index
    %c0_3 = arith.constant 0 : index
    %c0_4 = arith.constant 0 : index
    %c0_5 = arith.constant 0 : index
    %2 = vector.load %arg2[%c0_1, %c0_2, %c0_3, %c0_4, %c0_5] : memref<1x1x1x328x4xbf16, #tpu.memory_space<vmem>>, vector<1x1x1x288x4xbf16>
    %3 = vector.shape_cast %2 : vector<1x1x1x288x4xbf16> to vector<288x4xbf16>
    %c0_6 = arith.constant 0 : index
    %c0_7 = arith.constant 0 : index
    %4 = vector.load %arg6[%c0_6, %c0_7] : memref<288x128xf32, #tpu.memory_space<vmem>>, vector<288x128xf32>
    %c0_8 = arith.constant 0 : index
    %c0_9 = arith.constant 0 : index
    %c0_10 = arith.constant 0 : index
    %5 = vector.load %arg3[%c0_8, %c0_9, %c0_10] : memref<9x4x128xbf16, #tpu.memory_space<vmem>>, vector<1x4x128xbf16>
    %6 = vector.shape_cast %5 : vector<1x4x128xbf16> to vector<4x128xbf16>
    %cst_11 = arith.constant dense<0.000000e+00> : vector<288x128xf32>
    %7 = tpu.matmul %3, %6, %cst_11 {dimension_numbers = #tpu.dot_dimension_numbers<[1], [0], [0], [1], [0, 0, 1, 1], [], []>} : vector<288x4xbf16>, vector<4x128xbf16>, vector<288x128xf32> -> vector<288x128xf32>
    %8 = arith.addf %4, %7 : vector<288x128xf32>
    %c0_12 = arith.constant 0 : index
    %c0_13 = arith.constant 0 : index
    %9 = vector.load %arg6[%c0_12, %c0_13] : memref<288x128xf32, #tpu.memory_space<vmem>>, vector<288x128xf32>
    tpu.vector_store %arg6[%c0_12, %c0_13], %8 {strides = array<i32>} : memref<288x128xf32, #tpu.memory_space<vmem>>, vector<288x128xf32>,
    %c0_14 = arith.constant 0 : index
    %c0_15 = arith.constant 0 : index
    %c0_16 = arith.constant 0 : index
    %c1 = arith.constant 1 : index
    %c0_17 = arith.constant 0 : index
    %10 = vector.load %arg2[%c0_14, %c0_15, %c0_16, %c1, %c0_17] : memref<1x1x1x328x4xbf16, #tpu.memory_space<vmem>>, vector<1x1x1x288x4xbf16>
    %11 = vector.shape_cast %10 : vector<1x1x1x288x4xbf16> to vector<288x4xbf16>
    %c0_18 = arith.constant 0 : index
    %c0_19 = arith.constant 0 : index
    %12 = vector.load %arg6[%c0_18, %c0_19] : memref<288x128xf32, #tpu.memory_space<vmem>>, vector<288x128xf32>
    %c1_20 = arith.constant 1 : index
    %c0_21 = arith.constant 0 : index
    %c0_22 = arith.constant 0 : index
    %13 = vector.load %arg3[%c1_20, %c0_21, %c0_22] : memref<9x4x128xbf16, #tpu.memory_space<vmem>>, vector<1x4x128xbf16>
    %14 = vector.shape_cast %13 : vector<1x4x128xbf16> to vector<4x128xbf16>
    %cst_23 = arith.constant dense<0.000000e+00> : vector<288x128xf32>
    %15 = tpu.matmul %11, %14, %cst_23 {dimension_numbers = #tpu.dot_dimension_numbers<[1], [0], [0], [1], [0, 0, 1, 1], [], []>} : vector<288x4xbf16>, vector<4x128xbf16>, vector<288x128xf32> -> vector<288x128xf32>
    %16 = arith.addf %12, %15 : vector<288x128xf32>
    %c0_24 = arith.constant 0 : index
    %c0_25 = arith.constant 0 : index
    %17 = vector.load %arg6[%c0_24, %c0_25] : memref<288x128xf32, #tpu.memory_space<vmem>>, vector<288x128xf32>
    tpu.vector_store %arg6[%c0_24, %c0_25], %16 {strides = array<i32>} : memref<288x128xf32, #tpu.memory_space<vmem>>, vector<288x128xf32>,
    %c0_26 = arith.constant 0 : index
    %c0_27 = arith.constant 0 : index
    %c0_28 = arith.constant 0 : index
    %c2 = arith.constant 2 : index
    %c0_29 = arith.constant 0 : index
    %18 = vector.load %arg2[%c0_26, %c0_27, %c0_28, %c2, %c0_29] : memref<1x1x1x328x4xbf16, #tpu.memory_space<vmem>>, vector<1x1x1x288x4xbf16>
    %19 = vector.shape_cast %18 : vector<1x1x1x288x4xbf16> to vector<288x4xbf16>
    %c0_30 = arith.constant 0 : index
    %c0_31 = arith.constant 0 : index
    %20 = vector.load %arg6[%c0_30, %c0_31] : memref<288x128xf32, #tpu.memory_space<vmem>>, vector<288x128xf32>
    %c2_32 = arith.constant 2 : index
    %c0_33 = arith.constant 0 : index
    %c0_34 = arith.constant 0 : index
    %21 = vector.load %arg3[%c2_32, %c0_33, %c0_34] : memref<9x4x128xbf16, #tpu.memory_space<vmem>>, vector<1x4x128xbf16>
    %22 = vector.shape_cast %21 : vector<1x4x128xbf16> to vector<4x128xbf16>
    %cst_35 = arith.constant dense<0.000000e+00> : vector<288x128xf32>
    %23 = tpu.matmul %19, %22, %cst_35 {dimension_numbers = #tpu.dot_dimension_numbers<[1], [0], [0], [1], [0, 0, 1, 1], [], []>} : vector<288x4xbf16>, vector<4x128xbf16>, vector<288x128xf32> -> vector<288x128xf32>
    %24 = arith.addf %20, %23 : vector<288x128xf32>
    %c0_36 = arith.constant 0 : index
    %c0_37 = arith.constant 0 : index
    %25 = vector.load %arg6[%c0_36, %c0_37] : memref<288x128xf32, #tpu.memory_space<vmem>>, vector<288x128xf32>
    tpu.vector_store %arg6[%c0_36, %c0_37], %24 {strides = array<i32>} : memref<288x128xf32, #tpu.memory_space<vmem>>, vector<288x128xf32>,
    %c0_38 = arith.constant 0 : index
    %c0_39 = arith.constant 0 : index
    %c0_40 = arith.constant 0 : index
    %c18 = arith.constant 18 : index
    %c0_41 = arith.constant 0 : index
    %26 = vector.load %arg2[%c0_38, %c0_39, %c0_40, %c18, %c0_41] : memref<1x1x1x328x4xbf16, #tpu.memory_space<vmem>>, vector<1x1x1x288x4xbf16>
    %27 = vector.shape_cast %26 : vector<1x1x1x288x4xbf16> to vector<288x4xbf16>
    %c0_42 = arith.constant 0 : index
    %c0_43 = arith.constant 0 : index
    %28 = vector.load %arg6[%c0_42, %c0_43] : memref<288x128xf32, #tpu.memory_space<vmem>>, vector<288x128xf32>
    %c3 = arith.constant 3 : index
    %c0_44 = arith.constant 0 : index
    %c0_45 = arith.constant 0 : index
    %29 = vector.load %arg3[%c3, %c0_44, %c0_45] : memref<9x4x128xbf16, #tpu.memory_space<vmem>>, vector<1x4x128xbf16>
    %30 = vector.shape_cast %29 : vector<1x4x128xbf16> to vector<4x128xbf16>
    %cst_46 = arith.constant dense<0.000000e+00> : vector<288x128xf32>
    %31 = tpu.matmul %27, %30, %cst_46 {dimension_numbers = #tpu.dot_dimension_numbers<[1], [0], [0], [1], [0, 0, 1, 1], [], []>} : vector<288x4xbf16>, vector<4x128xbf16>, vector<288x128xf32> -> vector<288x128xf32>
    %32 = arith.addf %28, %31 : vector<288x128xf32>
    %c0_47 = arith.constant 0 : index
    %c0_48 = arith.constant 0 : index
    %33 = vector.load %arg6[%c0_47, %c0_48] : memref<288x128xf32, #tpu.memory_space<vmem>>, vector<288x128xf32>
    tpu.vector_store %arg6[%c0_47, %c0_48], %32 {strides = array<i32>} : memref<288x128xf32, #tpu.memory_space<vmem>>, vector<288x128xf32>,
    %c0_49 = arith.constant 0 : index
    %c0_50 = arith.constant 0 : index
    %c0_51 = arith.constant 0 : index
    %c19 = arith.constant 19 : index
    %c0_52 = arith.constant 0 : index
    %34 = vector.load %arg2[%c0_49, %c0_50, %c0_51, %c19, %c0_52] : memref<1x1x1x328x4xbf16, #tpu.memory_space<vmem>>, vector<1x1x1x288x4xbf16>
    %35 = vector.shape_cast %34 : vector<1x1x1x288x4xbf16> to vector<288x4xbf16>
    %c0_53 = arith.constant 0 : index
    %c0_54 = arith.constant 0 : index
    %36 = vector.load %arg6[%c0_53, %c0_54] : memref<288x128xf32, #tpu.memory_space<vmem>>, vector<288x128xf32>
    %c4 = arith.constant 4 : index
    %c0_55 = arith.constant 0 : index
    %c0_56 = arith.constant 0 : index
    %37 = vector.load %arg3[%c4, %c0_55, %c0_56] : memref<9x4x128xbf16, #tpu.memory_space<vmem>>, vector<1x4x128xbf16>
    %38 = vector.shape_cast %37 : vector<1x4x128xbf16> to vector<4x128xbf16>
    %cst_57 = arith.constant dense<0.000000e+00> : vector<288x128xf32>
    %39 = tpu.matmul %35, %38, %cst_57 {dimension_numbers = #tpu.dot_dimension_numbers<[1], [0], [0], [1], [0, 0, 1, 1], [], []>} : vector<288x4xbf16>, vector<4x128xbf16>, vector<288x128xf32> -> vector<288x128xf32>
    %40 = arith.addf %36, %39 : vector<288x128xf32>
    %c0_58 = arith.constant 0 : index
    %c0_59 = arith.constant 0 : index
    %41 = vector.load %arg6[%c0_58, %c0_59] : memref<288x128xf32, #tpu.memory_space<vmem>>, vector<288x128xf32>
    tpu.vector_store %arg6[%c0_58, %c0_59], %40 {strides = array<i32>} : memref<288x128xf32, #tpu.memory_space<vmem>>, vector<288x128xf32>,
    %c0_60 = arith.constant 0 : index
    %c0_61 = arith.constant 0 : index
    %c0_62 = arith.constant 0 : index
    %c20 = arith.constant 20 : index
    %c0_63 = arith.constant 0 : index
    %42 = vector.load %arg2[%c0_60, %c0_61, %c0_62, %c20, %c0_63] : memref<1x1x1x328x4xbf16, #tpu.memory_space<vmem>>, vector<1x1x1x288x4xbf16>
    %43 = vector.shape_cast %42 : vector<1x1x1x288x4xbf16> to vector<288x4xbf16>
    %c0_64 = arith.constant 0 : index
    %c0_65 = arith.constant 0 : index
    %44 = vector.load %arg6[%c0_64, %c0_65] : memref<288x128xf32, #tpu.memory_space<vmem>>, vector<288x128xf32>
    %c5 = arith.constant 5 : index
    %c0_66 = arith.constant 0 : index
    %c0_67 = arith.constant 0 : index
    %45 = vector.load %arg3[%c5, %c0_66, %c0_67] : memref<9x4x128xbf16, #tpu.memory_space<vmem>>, vector<1x4x128xbf16>
    %46 = vector.shape_cast %45 : vector<1x4x128xbf16> to vector<4x128xbf16>
    %cst_68 = arith.constant dense<0.000000e+00> : vector<288x128xf32>
    %47 = tpu.matmul %43, %46, %cst_68 {dimension_numbers = #tpu.dot_dimension_numbers<[1], [0], [0], [1], [0, 0, 1, 1], [], []>} : vector<288x4xbf16>, vector<4x128xbf16>, vector<288x128xf32> -> vector<288x128xf32>
    %48 = arith.addf %44, %47 : vector<288x128xf32>
    %c0_69 = arith.constant 0 : index
    %c0_70 = arith.constant 0 : index
    %49 = vector.load %arg6[%c0_69, %c0_70] : memref<288x128xf32, #tpu.memory_space<vmem>>, vector<288x128xf32>
    tpu.vector_store %arg6[%c0_69, %c0_70], %48 {strides = array<i32>} : memref<288x128xf32, #tpu.memory_space<vmem>>, vector<288x128xf32>,
    %c0_71 = arith.constant 0 : index
    %c0_72 = arith.constant 0 : index
    %c0_73 = arith.constant 0 : index
    %c36 = arith.constant 36 : index
    %c0_74 = arith.constant 0 : index
    %50 = vector.load %arg2[%c0_71, %c0_72, %c0_73, %c36, %c0_74] : memref<1x1x1x328x4xbf16, #tpu.memory_space<vmem>>, vector<1x1x1x288x4xbf16>
    %51 = vector.shape_cast %50 : vector<1x1x1x288x4xbf16> to vector<288x4xbf16>
    %c0_75 = arith.constant 0 : index
    %c0_76 = arith.constant 0 : index
    %52 = vector.load %arg6[%c0_75, %c0_76] : memref<288x128xf32, #tpu.memory_space<vmem>>, vector<288x128xf32>
    %c6 = arith.constant 6 : index
    %c0_77 = arith.constant 0 : index
    %c0_78 = arith.constant 0 : index
    %53 = vector.load %arg3[%c6, %c0_77, %c0_78] : memref<9x4x128xbf16, #tpu.memory_space<vmem>>, vector<1x4x128xbf16>
    %54 = vector.shape_cast %53 : vector<1x4x128xbf16> to vector<4x128xbf16>
    %cst_79 = arith.constant dense<0.000000e+00> : vector<288x128xf32>
    %55 = tpu.matmul %51, %54, %cst_79 {dimension_numbers = #tpu.dot_dimension_numbers<[1], [0], [0], [1], [0, 0, 1, 1], [], []>} : vector<288x4xbf16>, vector<4x128xbf16>, vector<288x128xf32> -> vector<288x128xf32>
    %56 = arith.addf %52, %55 : vector<288x128xf32>
    %c0_80 = arith.constant 0 : index
    %c0_81 = arith.constant 0 : index
    %57 = vector.load %arg6[%c0_80, %c0_81] : memref<288x128xf32, #tpu.memory_space<vmem>>, vector<288x128xf32>
    tpu.vector_store %arg6[%c0_80, %c0_81], %56 {strides = array<i32>} : memref<288x128xf32, #tpu.memory_space<vmem>>, vector<288x128xf32>,
    %c0_82 = arith.constant 0 : index
    %c0_83 = arith.constant 0 : index
    %c0_84 = arith.constant 0 : index
    %c37 = arith.constant 37 : index
    %c0_85 = arith.constant 0 : index
    %58 = vector.load %arg2[%c0_82, %c0_83, %c0_84, %c37, %c0_85] : memref<1x1x1x328x4xbf16, #tpu.memory_space<vmem>>, vector<1x1x1x288x4xbf16>
    %59 = vector.shape_cast %58 : vector<1x1x1x288x4xbf16> to vector<288x4xbf16>
    %c0_86 = arith.constant 0 : index
    %c0_87 = arith.constant 0 : index
    %60 = vector.load %arg6[%c0_86, %c0_87] : memref<288x128xf32, #tpu.memory_space<vmem>>, vector<288x128xf32>
    %c7 = arith.constant 7 : index
    %c0_88 = arith.constant 0 : index
    %c0_89 = arith.constant 0 : index
    %61 = vector.load %arg3[%c7, %c0_88, %c0_89] : memref<9x4x128xbf16, #tpu.memory_space<vmem>>, vector<1x4x128xbf16>
    %62 = vector.shape_cast %61 : vector<1x4x128xbf16> to vector<4x128xbf16>
    %cst_90 = arith.constant dense<0.000000e+00> : vector<288x128xf32>
    %63 = tpu.matmul %59, %62, %cst_90 {dimension_numbers = #tpu.dot_dimension_numbers<[1], [0], [0], [1], [0, 0, 1, 1], [], []>} : vector<288x4xbf16>, vector<4x128xbf16>, vector<288x128xf32> -> vector<288x128xf32>
    %64 = arith.addf %60, %63 : vector<288x128xf32>
    %c0_91 = arith.constant 0 : index
    %c0_92 = arith.constant 0 : index
    %65 = vector.load %arg6[%c0_91, %c0_92] : memref<288x128xf32, #tpu.memory_space<vmem>>, vector<288x128xf32>
    tpu.vector_store %arg6[%c0_91, %c0_92], %64 {strides = array<i32>} : memref<288x128xf32, #tpu.memory_space<vmem>>, vector<288x128xf32>,
    %c0_93 = arith.constant 0 : index
    %c0_94 = arith.constant 0 : index
    %c0_95 = arith.constant 0 : index
    %c38 = arith.constant 38 : index
    %c0_96 = arith.constant 0 : index
    %66 = vector.load %arg2[%c0_93, %c0_94, %c0_95, %c38, %c0_96] : memref<1x1x1x328x4xbf16, #tpu.memory_space<vmem>>, vector<1x1x1x288x4xbf16>
    %67 = vector.shape_cast %66 : vector<1x1x1x288x4xbf16> to vector<288x4xbf16>
    %c0_97 = arith.constant 0 : index
    %c0_98 = arith.constant 0 : index
    %68 = vector.load %arg6[%c0_97, %c0_98] : memref<288x128xf32, #tpu.memory_space<vmem>>, vector<288x128xf32>
    %c8 = arith.constant 8 : index
    %c0_99 = arith.constant 0 : index
    %c0_100 = arith.constant 0 : index
    %69 = vector.load %arg3[%c8, %c0_99, %c0_100] : memref<9x4x128xbf16, #tpu.memory_space<vmem>>, vector<1x4x128xbf16>
    %70 = vector.shape_cast %69 : vector<1x4x128xbf16> to vector<4x128xbf16>
    %cst_101 = arith.constant dense<0.000000e+00> : vector<288x128xf32>
    %71 = tpu.matmul %67, %70, %cst_101 {dimension_numbers = #tpu.dot_dimension_numbers<[1], [0], [0], [1], [0, 0, 1, 1], [], []>} : vector<288x4xbf16>, vector<4x128xbf16>, vector<288x128xf32> -> vector<288x128xf32>
    %72 = arith.addf %68, %71 : vector<288x128xf32>
    %c0_102 = arith.constant 0 : index
    %c0_103 = arith.constant 0 : index
    %73 = vector.load %arg6[%c0_102, %c0_103] : memref<288x128xf32, #tpu.memory_space<vmem>>, vector<288x128xf32>
    tpu.vector_store %arg6[%c0_102, %c0_103], %72 {strides = array<i32>} : memref<288x128xf32, #tpu.memory_space<vmem>>, vector<288x128xf32>,
    %c0_104 = arith.constant 0 : index
    %c0_105 = arith.constant 0 : index
    %74 = vector.load %arg6[%c0_104, %c0_105] : memref<288x128xf32, #tpu.memory_space<vmem>>, vector<288x128xf32>
    %c0_106 = arith.constant 0 : index
    %c0_107 = arith.constant 0 : index
    %75 = vector.load %arg4[%c0_106, %c0_107] : memref<1x128xf32, #tpu.memory_space<vmem>>, vector<1x128xf32>
    %76 = vector.broadcast %75 : vector<1x128xf32> to vector<288x128xf32>
    %77 = arith.addf %74, %76 : vector<288x128xf32>
    %cst_108 = arith.constant 0.000000e+00 : f32
    %78 = vector.broadcast %cst_108 : f32 to vector<288x128xf32>
    %79 = arith.subf %78, %77 : vector<288x128xf32>
    %80 = math.exp %79 : vector<288x128xf32>
    %cst_109 = arith.constant 1.000000e+00 : f32
    %81 = vector.broadcast %cst_109 : f32 to vector<288x128xf32>
    %82 = arith.addf %81, %80 : vector<288x128xf32>
    %83 = tpu.reciprocal %82 {approx = true} : vector<288x128xf32> -> vector<288x128xf32>
    %84 = arith.mulf %77, %83 : vector<288x128xf32>
    %85 = arith.truncf %84 : vector<288x128xf32> to vector<288x128xbf16>
    %c0_110 = arith.constant 0 : index
    %c0_111 = arith.constant 0 : index
    %c0_112 = arith.constant 0 : index
    %86 = vector.load %arg5[%c0_110, %c0_111, %c0_112] : memref<1x288x128xbf16, #tpu.memory_space<vmem>>, vector<1x288x128xbf16>
    %87 = vector.shape_cast %86 : vector<1x288x128xbf16> to vector<288x128xbf16>
    %88 = vector.shape_cast %85 : vector<288x128xbf16> to vector<1x288x128xbf16>
    tpu.vector_store %arg5[%c0_110, %c0_111, %c0_112], %88 {strides = array<i32>} : memref<1x288x128xbf16, #tpu.memory_space<vmem>>, vector<1x288x128xbf16>,
    return
  }
  func.func @transform_0(%arg0: i32, %arg1: i32) -> (i32, i32, i32, i32, i32) {
    %c0_i32 = arith.constant 0 : i32
    %c0_i32_0 = arith.constant 0 : i32
    %c0_i32_1 = arith.constant 0 : i32
    %c0_i32_2 = arith.constant 0 : i32
    %c0_i32_3 = arith.constant 0 : i32
    return %arg0, %c0_i32, %c0_i32_0, %c0_i32_1, %c0_i32_2 : i32, i32, i32, i32, i32
  }
  func.func @transform_1(%arg0: i32, %arg1: i32) -> (i32, i32, i32) {
    %c0_i32 = arith.constant 0 : i32
    %c0_i32_0 = arith.constant 0 : i32
    %c0_i32_1 = arith.constant 0 : i32
    return %c0_i32, %c0_i32_0, %arg1 : i32, i32, i32
  }
  func.func @transform_2(%arg0: i32, %arg1: i32) -> (i32, i32) {
    %c0_i32 = arith.constant 0 : i32
    %c0_i32_0 = arith.constant 0 : i32
    return %c0_i32, %arg1 : i32, i32
  }
  func.func @transform_3(%arg0: i32, %arg1: i32) -> (i32, i32, i32) {
    %c0_i32 = arith.constant 0 : i32
    %c0_i32_0 = arith.constant 0 : i32
    return %arg0, %c0_i32, %arg1 : i32, i32, i32
  }
}

</mosaic_0001>

<bundles_post_ra>
// kernel: conv_bn_silu_forward.1
= control target key start
LH: loop header
LB: loop body
LE: loop exit
PB: predicated region body
PF: predicated region fallthrough
CT: control target
= control target key end

     0   :  { %s7221_s12 = smov 0   ;;  %s7223_s13 = smov 0   ;;  %s8479_s0 = inlined_call_operand.vmem [shape: bf16[2,1,1,328,4], index: 0, kind: input, shape index: {}]   ;;  %s8480_s1 = inlined_call_operand.vmem [shape: bf16[9,4,128], index: 1, kind: input, shape index: {}]   ;;  %s8481_s2 = inlined_call_operand.vmem [shape: f32[1,128], index: 2, kind: input, shape index: {}]   ;;  %s8482_s3 = inlined_call_operand.vmem [shape: bf16[2,288,128], index: 3, kind: output, shape index: {}]  }
   0x1   :  { %s7225_s14 = smov 0  }
   0x2 LB: > { %s25_s15 = sadd.s32 1, %s7195_s13  ;;  %p5787_p0 = scmp.ge.s32.totalorder %s7199_s14, 1  ;;  %s7199_s14 = sphi %s7225_s14, %s13_s14   ;;  %s7195_s13 = sphi %s7223_s13, %s8490_s13   ;;  %s7191_s12 = sphi %s7221_s12, %s8489_s12  }
   0x3   : > { %p27_p1 = scmp.ge.s32.totalorder %s25_s15, 2  ;;  %p168_p2 = scmp.lt.s32.totalorder %s7199_s14, 3 }
   0x5   : > { %s8492_s15 = smov (%p27_p1, %s25_s15), 0  ;;  %p169_p3 = pnand %p5787_p0, %p168_p2 }
   0x7   : > { %172 = sbr.rel (%p169_p3) target bundleno = 590 (0x24e), region = 32 }
   0xc   : > { %v331_v0 = vld [vmem:[%s8480_s1] sm:$0x3]  ;;  %vm477_vm0 = vcmask 1041408   ;;  %p202_p4 = scmp.lt.s32.totalorder %s7191_s12, 1  ;;  %v5864_v2 = vld [vmem:[%s8480_s1 + $0x4] sm:$0x3] }
   0xd   : > { %6827 = vmatprep.subr.msk.bf16.mxu0 %vm477_vm0, %v331_v0  ;;  %6828 = vmatprep.subr.msk.bf16.mxu1 %vm477_vm0, %v331_v0  ;;  %v479_v1 = vsel %vm477_vm0, %v331_v0, 0  ;;  %v5826_v3 = vld [vmem:[%s8480_s1 + $0x2] sm:$0x3]  ;;  %vm422_vm1 = vcmask 31744   ;;  %v1614_v7 = vsel %vm477_vm0, %v5864_v2, 0  ;;  %vm1521_vm3 = vcmask 1046528  }
   0xe   : > { %6484 = vmatpush3.bf16.msra.mxu0 %v479_v1  ;;  %6826 = vmatpush3.bf16.msra.mxu1 %v479_v1  ;;  %s8494_s12 = smov (!%p202_p4, %s7191_s12), 1  ;;  %v7269_v8 = vld [vmem:[%s8480_s1 + $0x6] sm:$0x3]  ;;  %v1102_v10 = vsel %vm477_vm0, %v5826_v3, 0  ;;  %v7277_v11 = vld [vmem:[%s8480_s1 + $0x8] sm:$0x3] }
   0xf   : > { %6830 = vmatprep.subr.msk.bf16.mxu0 %vm477_vm0, %v5864_v2  ;;  %6829 = vmatprep.subr.msk.bf16.mxu1 %vm477_vm0, %v5826_v3  ;;  %s6837_s22 = smul.u32 164, %s8494_s12  ;;  %vm898_vm2 = vsmask.f32 7424  ;;  %v7329_v57 = vld [vmem:[%s8480_s1 + $0xa] sm:$0x3]  ;;  %v2125_v58 = vsel %vm477_vm0, %v7269_v8, 0 }
  0x10   : > { %vm2544_vm4 = vsmask.f32 6400  ;;  %vm3189_vm5 = vcmask 1045504   ;;  %vm4212_vm6 = vsmask.f32 5376  ;;  %vm4857_vm7 = vcmask 1044480  }
  0x11   : > { %s7259_s25 = scalar_lea.vmem %s8479_s0, %s6837_s22  ;;  %s6838_s17 = smul.u32 144, %s8494_s12 }
  0x12   : > { %v6863_v4 = vld [vmem:[%s7259_s25] sm:$0xff]   ;;  %v6864_v5 = vld [vmem:[%s7259_s25 + $0x50] sm:$0xff]   ;;  %v6865_v6 = vld [vmem:[%s7259_s25 + $0x8] sm:$0xff]  }
  0x13   : > { %6485 = vmatprep.mubr.msk.bf16.mxu0 %vm422_vm1, %v6863_v4  ;;  %6505 = vmatprep.mubr.msk.bf16.mxu1 %vm422_vm1, %v6864_v5  ;;  %v6866_v9 = vld [vmem:[%s7259_s25 + $0x58] sm:$0xff]   ;;  %v6867_v12 = vld [vmem:[%s7259_s25 + $0x10] sm:$0xff]   ;;  %v6868_v13 = vld [vmem:[%s7259_s25 + $0x60] sm:$0xff]   ;;  %s8340_s19 = scalar_lea.vmem %s8482_s3, %s6838_s17 }
  0x14   : > { %6486 = vmatmul.mubr.msk.bf16.vlgmr.msra.gmra.mxu0 %vm422_vm1, %v6865_v6  ;;  %6506 = vmatmul.mubr.msk.bf16.vlgmr.msra.gmra.mxu1 %vm422_vm1, %v6866_v9  ;;  %v6869_v14 = vld [vmem:[%s7259_s25 + $0x18] sm:$0xff]   ;;  %v6870_v15 = vld [vmem:[%s7259_s25 + $0x68] sm:$0xff]   ;;  %v6871_v16 = vld [vmem:[%s7259_s25 + $0x20] sm:$0xff]  }
  0x15   : > { %6560 = vmatpush3.bf16.msra.mxu0 %v1614_v7  ;;  %6522 = vmatpush3.bf16.msra.mxu1 %v1102_v10  ;;  %v6872_v17 = vld [vmem:[%s7259_s25 + $0x70] sm:$0xff]   ;;  %v6873_v18 = vld [vmem:[%s7259_s25 + $0x28] sm:$0xff]   ;;  %v6874_v19 = vld [vmem:[%s7259_s25 + $0x78] sm:$0xff]  }
  0x16   : > { %6489 = vmatprep.mubr.msk.bf16.mxu0 %vm422_vm1, %v6867_v12  ;;  %6509 = vmatprep.mubr.msk.bf16.mxu1 %vm422_vm1, %v6868_v13  ;;  %v6875_v20 = vld [vmem:[%s7259_s25 + $0x30] sm:$0xff]   ;;  %v6876_v21 = vld [vmem:[%s7259_s25 + $0x80] sm:$0xff]   ;;  %v6881_v23 = vld [vmem:[%s7259_s25 + $0x8] sm:$0xff]  }
  0x17   : > { %6831 = vmatprep.subr.msk.bf16.mxu1 %vm477_vm0, %v7269_v8  ;;  %6832 = vmatprep.subr.msk.bf16.mxu0 %vm477_vm0, %v7277_v11  ;;  %v6880_v22 = vld [vmem:[%s7259_s25] sm:$0xff]   ;;  %v907_v26 = vshll.u32 %v6881_v23, 16  ;;  %v6883_v27 = vld [vmem:[%s7259_s25 + $0x10] sm:$0xff]   ;;  %v6877_v28 = vld [vmem:[%s7259_s25 + $0x38] sm:$0xff]   ;;  %v911_v35 = vshrl.u32 %v6881_v23, 16  ;;  %v2770_v8 = vsel %vm477_vm0, %v7277_v11, 0 }
  0x18   : > { %v900_v24 = vshrl.u32 %v6880_v22, 16  ;;  %v902_v25 = vshll.u32 %v6880_v22, 16  ;;  %v6884_v31 = vld [vmem:[%s7259_s25 + $0x18] sm:$0xff]   ;;  %v6878_v32 = vld [vmem:[%s7259_s25 + $0x88] sm:$0xff]   ;;  %v6879_v34 = vld [vmem:[%s7259_s25 + $0x40] sm:$0xff]   ;;  %v915_v36 = vshll.u32 %v6883_v27, 16 }
  0x19   : > { %v909_v30 = vrot.slane %v907_v26, 1  ;;  %v6886_v37 = vld [vmem:[%s7259_s25 + $0x8] sm:$0xff]   ;;  %v6885_v38 = vld [vmem:[%s7259_s25] sm:$0xfe]   ;;  %v919_v40 = vshrl.u32 %v6883_v27, 16  ;;  %v923_v41 = vshll.u32 %v6884_v31, 16 }
  0x1a   : > { %v904_v29 = vrot.slane %v902_v25, 1  ;;  %v6887_v42 = vld [vmem:[%s7259_s25 + $0x20] sm:$0xff]   ;;  %v917_v43 = vrot.slane %v915_v36, 1  ;;  %v1522_v45 = vrot.slane %v6885_v38, 1  ;;  %v1523_v46 = vrot.slane %v6886_v37, 1  ;;  %v6889_v49 = vld [vmem:[%s7259_s25 + $0x28] sm:$0xff]  }
  0x1b   : > { %v913_v44 = vor.u32 %v911_v35, %v909_v30  ;;  %v925_v48 = vrot.slane %v923_v41, 1  ;;  %v6882_v50 = vld [vmem:[%s7259_s25 + $0x48] sm:$0xff]   ;;  %v931_v51 = vshll.u32 %v6887_v42, 16  ;;  %v6888_v52 = vld [vmem:[%s7259_s25 + $0x10] sm:$0xff]   ;;  %v927_v55 = vshrl.u32 %v6884_v31, 16  ;;  %v6890_v56 = vld [vmem:[%s7259_s25 + $0x18] sm:$0xff]  }
  0x1c   : > { %6490 = vmatmul.mubr.msk.bf16.gmra.mxu0 %vm422_vm1, %v6869_v14  ;;  %6510 = vmatmul.mubr.msk.bf16.gmra.mxu1 %vm422_vm1, %v6870_v15  ;;  %v905_v33 = vor.u32 %v904_v29, %v900_v24  ;;  %v921_v47 = vor.u32 %v919_v40, %v917_v43  ;;  %v1524_v54 = vsel %vm1521_vm3, %v1522_v45, %v1523_v46  ;;  %v935_v60 = vshrl.u32 %v6887_v42, 16  ;;  %v6891_v0 = vld [vmem:[%s7259_s25 + $0x30] sm:$0xff]   ;;  %v6893_v5 = vld [vmem:[%s7259_s25 + $0x38] sm:$0xff]   ;;  %v6892_v6 = vld [vmem:[%s7259_s25 + $0x20] sm:$0xff]  }
  0x1d   : > { %6493 = vmatprep.mubr.msk.bf16.mxu0 %vm422_vm1, %v6871_v16  ;;  %6513 = vmatprep.mubr.msk.bf16.mxu1 %vm422_vm1, %v6872_v17  ;;  %v918_v53 = vsel %vm898_vm2, %v913_v44, %v917_v43  ;;  %v939_v61 = vshll.u32 %v6889_v49, 16  ;;  %v933_v62 = vrot.slane %v931_v51, 1  ;;  %v1525_v63 = vrot.slane %v6888_v52, 1  ;;  %v6894_v13 = vld [vmem:[%s7259_s25 + $0x28] sm:$0xff]   ;;  %v6896_v29 = vld [vmem:[%s7259_s25 + $0x30] sm:$0xff]   ;;  %v6901_v44 = vld [vmem:[%s7259_s25 + $0x58] sm:$0xff]  }
  0x1e   : > { %v910_v39 = vsel %vm898_vm2, %v905_v33, %v909_v30  ;;  %v926_v59 = vsel %vm898_vm2, %v921_v47, %v925_v48  ;;  %v929_v1 = vor.u32 %v927_v55, %v925_v48  ;;  %v1527_v2 = vrot.slane %v6890_v56, 1  ;;  %v7351_v14 = vld [vmem:[%s8480_s1 + $0xc] sm:$0x3]  ;;  %v6898_v33 = vld [vmem:[%s7259_s25 + $0x38] sm:$0xff]   ;;  %v6899_v36 = vld [vmem:[%s7259_s25 + $0x50] sm:$0xff]  }
  0x1f   : > { %v937_v3 = vor.u32 %v935_v60, %v933_v62  ;;  %v941_v4 = vrot.slane %v939_v61, 1  ;;  %v1526_v7 = vsel %vm1521_vm3, %v1523_v46, %v1525_v63  ;;  %v947_v9 = vshll.u32 %v6891_v0, 16  ;;  %v6897_v25 = vld [vmem:[%s7259_s25 + $0x48] sm:$0xff]   ;;  %v6900_v45 = vld [vmem:[%s7259_s25 + $0x40] sm:$0xff]  }
  0x20   : > { %v934_v10 = vsel %vm898_vm2, %v929_v1, %v933_v62  ;;  %v943_v12 = vshrl.u32 %v6889_v49, 16  ;;  %v1528_v16 = vsel %vm1521_vm3, %v1525_v63, %v1527_v2  ;;  %v951_v17 = vshrl.u32 %v6891_v0, 16  ;;  %v6902_v48 = vld [vmem:[%s7259_s25 + $0x48] sm:$0xff]   ;;  %v6903_v56 = vld [vmem:[%s7259_s25 + $0x60] sm:$0xff]   ;;  %v6904_v63 = vld [vmem:[%s7259_s25 + $0x50] sm:$0xff]  }
  0x21   : > { %v942_v15 = vsel %vm898_vm2, %v937_v3, %v941_v4  ;;  %v1529_v11 = vrot.slane %v6892_v6, 1  ;;  %v1531_v22 = vrot.slane %v6894_v13, 1  ;;  %v959_v27 = vshrl.u32 %v6893_v5, 16  ;;  %v6905_v60 = vld [vmem:[%s7259_s25 + $0x68] sm:$0xff]  }
  0x22   : > { %v971_v35 = vshll.u32 %v6897_v25, 16  ;;  %v1533_v38 = vrot.slane %v6896_v29, 1  ;;  %v1535_v40 = vrot.slane %v6898_v33, 1  ;;  %v979_v43 = vshll.u32 %v6899_v36, 16 }
  0x23   : > { %v1530_v26 = vsel %vm1521_vm3, %v1527_v2, %v1529_v11  ;;  %v1532_v31 = vsel %vm1521_vm3, %v1529_v11, %v1531_v22  ;;  %v975_v47 = vshrl.u32 %v6897_v25, 16  ;;  %v1537_v55 = vrot.slane %v6900_v45, 1 }
  0x24   : > { %6494 = vmatmul.mubr.msk.bf16.gmra.mxu0 %vm422_vm1, %v6873_v18  ;;  %6514 = vmatmul.mubr.msk.bf16.gmra.mxu1 %vm422_vm1, %v6874_v19  ;;  %v955_v18 = vshll.u32 %v6893_v5, 16  ;;  %v949_v19 = vrot.slane %v947_v9, 1  ;;  %v973_v42 = vrot.slane %v971_v35, 1  ;;  %v1534_v46 = vsel %vm1521_vm3, %v1531_v22, %v1533_v38  ;;  %v6913_v35 = vld [vmem:[%s7259_s25 + $0x88] sm:$0xff]  }
  0x25   : > { %6497 = vmatprep.mubr.msk.bf16.mxu0 %vm422_vm1, %v6875_v20  ;;  %6517 = vmatprep.mubr.msk.bf16.mxu1 %vm422_vm1, %v6876_v21  ;;  %v6895_v20 = vld [vmem:[%s7259_s25 + $0x40] sm:$0xff]   ;;  %v945_v21 = vor.u32 %v943_v12, %v941_v4  ;;  %v981_v52 = vrot.slane %v979_v43, 1  ;;  %v1538_v1 = vsel %vm1521_vm3, %v1535_v40, %v1537_v55  ;;  %v995_v2 = vshll.u32 %v6903_v56, 16  ;;  %v6907_v12 = vld [vmem:[%s7259_s25 + $0x70] sm:$0xff]  }
  0x26   : > { %v953_v23 = vor.u32 %v951_v17, %v949_v19  ;;  %v957_v24 = vrot.slane %v955_v18, 1  ;;  %v991_v4 = vshrl.u32 %v6901_v44, 16  ;;  %v999_v5 = vshrl.u32 %v6903_v56, 16  ;;  %v6909_v18 = vld [vmem:[%s7259_s25 + $0x78] sm:$0xff]  }
  0x27   : > { %v950_v30 = vsel %vm898_vm2, %v945_v21, %v949_v19  ;;  %v1003_v6 = vshll.u32 %v6905_v60, 16  ;;  %v1541_v9 = vrot.slane %v6904_v63, 1  ;;  %v1011_v19 = vshll.u32 %v6907_v12, 16  ;;  %v6918_v63 = vld [vmem:[%s7259_s25 + $0x8] sm:$0xfe]  }
  0x28   : > { %v1035_v45 = vshll.u32 %v6913_v35, 16 }
  0x29   : > { %v1005_v17 = vrot.slane %v1003_v6, 1 }
  0x2c   : > { %6498 = vmatmul.mubr.msk.bf16.gmra.mxu0 %vm422_vm1, %v6877_v28  ;;  %6518 = vmatmul.mubr.msk.bf16.gmra.mxu1 %vm422_vm1, %v6878_v32  ;;  %v963_v28 = vshll.u32 %v6895_v20, 16  ;;  %v967_v32 = vshrl.u32 %v6895_v20, 16  ;;  %v6908_v20 = vld [vmem:[%s7259_s25 + $0x60] sm:$0xff]  }
  0x2d   : > { %6501 = vmatprep.mubr.msk.bf16.mxu0 %vm422_vm1, %v6879_v34  ;;  %6523 = vmatprep.mubr.msk.bf16.mxu1 %vm422_vm1, %v910_v39  ;;  %v958_v34 = vsel %vm898_vm2, %v953_v23, %v957_v24  ;;  %v961_v39 = vor.u32 %v959_v27, %v957_v24  ;;  %v1007_v23 = vshrl.u32 %v6905_v60, 16  ;;  %v6910_v24 = vld [vmem:[%s7259_s25 + $0x68] sm:$0xff]   ;;  %v1019_v27 = vshll.u32 %v6909_v18, 16 }
  0x2e   : > { %v965_v37 = vrot.slane %v963_v28, 1  ;;  %v1013_v28 = vrot.slane %v1011_v19, 1  ;;  %v1545_v29 = vrot.slane %v6908_v20, 1  ;;  %v6923_v60 = vld [vmem:[%s7259_s25 + $0x8] sm:$0xfe]   ;;  %v6926_v19 = vld [vmem:[%s7259_s25 + $0x18] sm:$0xff]  }
  0x2f   : > { %v2546_v6 = vshrl.u32 %v6923_v60, 16 }
  0x30   : > { %v969_v41 = vor.u32 %v967_v32, %v965_v37  ;;  %v966_v49 = vsel %vm898_vm2, %v961_v39, %v965_v37  ;;  %v1547_v32 = vrot.slane %v6910_v24, 1 }
  0x31   : > { %v2548_v20 = vrot.slane %v2546_v6, 1 }
  0x32   : > { %v974_v51 = vsel %vm898_vm2, %v969_v41, %v973_v42  ;;  %v1023_v41 = vshrl.u32 %v6909_v18, 16 }
  0x34   : > { %6502 = vmatmul.mubr.msk.bf16.gmra.mxu0 %vm422_vm1, %v6882_v50  ;;  %6524 = vmatmul.mubr.msk.bf16.vlgmr.msra.gmra.mxu1 %vm422_vm1, %v918_v53  ;;  %v1536_v50 = vsel %vm1521_vm3, %v1533_v38, %v1535_v40  ;;  %v983_v53 = vshrl.u32 %v6899_v36, 16  ;;  %v6912_v38 = vld [vmem:[%s7259_s25 + $0x70] sm:$0xff]   ;;  %v1548_v40 = vsel %vm1521_vm3, %v1545_v29, %v1547_v32 }
  0x35   : > { %6561 = vmatprep.mubr.msk.bf16.mxu0 %vm422_vm1, %v1524_v54  ;;  %6598 = vmatpush3.bf16.msra.mxu1 %v2125_v58  ;;  %v987_v54 = vshll.u32 %v6901_v44, 16  ;;  %v977_v58 = vor.u32 %v975_v47, %v973_v42  ;;  %v6914_v42 = vld [vmem:[%s7259_s25 + $0x78] sm:$0xff]  }
  0x36   : > { %6527 = vmatprep.mubr.msk.bf16.mxu1 %vm422_vm1, %v926_v59  ;;  %6833 = vmatprep.subr.msk.bf16.mxu1 %vm477_vm0, %v7329_v57  ;;  %v1539_v59 = vrot.slane %v6902_v48, 1  ;;  %v985_v61 = vor.u32 %v983_v53, %v981_v52  ;;  %v1549_v48 = vrot.slane %v6912_v38, 1  ;;  %v1039_v53 = vshrl.u32 %v6913_v35, 16 }
  0x37   : > { %v989_v62 = vrot.slane %v987_v54, 1  ;;  %v982_v0 = vsel %vm898_vm2, %v977_v58, %v981_v52  ;;  %v1037_v52 = vrot.slane %v1035_v45, 1  ;;  %v6916_v54 = vld [vmem:[%s7259_s25 + $0x80] sm:$0xff]   ;;  %v6924_v58 = vld [vmem:[%s7259_s25 + $0x10] sm:$0xff]  }
  0x38   : > { %v1540_v3 = vsel %vm1521_vm3, %v1537_v55, %v1539_v59  ;;  %v1542_v11 = vsel %vm1521_vm3, %v1539_v59, %v1541_v9  ;;  %v6917_v55 = vld [vmem:[%s7259_s25 + $0x88] sm:$0xff]   ;;  %v1550_v59 = vsel %vm1521_vm3, %v1547_v32, %v1549_v48 }
  0x39   : > { %v993_v13 = vor.u32 %v991_v4, %v989_v62 }
  0x3c   : > { %6562 = vmatmul.mubr.msk.bf16.vlgmr.msra.gmra.mxu0 %vm422_vm1, %v1526_v7  ;;  %6528 = vmatmul.mubr.msk.bf16.gmra.mxu1 %vm422_vm1, %v934_v10  ;;  %v6906_v7 = vld [vmem:[%s7259_s25 + $0x58] sm:$0xff]   ;;  %v997_v10 = vrot.slane %v995_v2, 1  ;;  %v6919_v2 = vld [vmem:[%s7259_s25 + $0x10] sm:$0xff]  }
  0x3d   : > { %6636 = vmatpush3.bf16.msra.mxu0 %v2770_v8  ;;  %6531 = vmatprep.mubr.msk.bf16.mxu1 %vm422_vm1, %v942_v15  ;;  %v990_v8 = vsel %vm898_vm2, %v985_v61, %v989_v62  ;;  %v1543_v15 = vrot.slane %v6906_v7, 1  ;;  %v2549_v7 = vshll.u32 %v6923_v60, 16 }
  0x3e   : > { %6565 = vmatprep.mubr.msk.bf16.mxu0 %vm422_vm1, %v1528_v16  ;;  %6834 = vmatprep.subr.msk.bf16.mxu0 %vm477_vm0, %v7351_v14  ;;  %v1001_v16 = vor.u32 %v999_v5, %v997_v10  ;;  %v998_v21 = vsel %vm898_vm2, %v993_v13, %v997_v10  ;;  %v1555_v5 = vrot.slane %v6917_v55, 1  ;;  %v2033_v10 = vrot.slane %v6918_v63, 1  ;;  %v6920_v13 = vld [vmem:[%s7259_s25 + $0x90] ss:$0 sps:$4 sm:$0x11]  }
  0x3f   : > { %v1544_v22 = vsel %vm1521_vm3, %v1541_v9, %v1543_v15  ;;  %v1546_v36 = vsel %vm1521_vm3, %v1543_v15, %v1545_v29  ;;  %v2557_v9 = vshll.u32 %v6924_v58, 16  ;;  %v6921_v15 = vld [vmem:[%s7259_s25 + $0x18] sm:$0xff]   ;;  %v3793_v55 = vsel %vm477_vm0, %v7351_v14, 0 }
  0x40   : > { %v1006_v25 = vsel %vm898_vm2, %v1001_v16, %v1005_v17  ;;  %v2036_v29 = vrot.slane %v6921_v15, 1 }
  0x44   : > { %6566 = vmatmul.mubr.msk.bf16.gmra.mxu0 %vm422_vm1, %v1530_v26  ;;  %6532 = vmatmul.mubr.msk.bf16.gmra.mxu1 %vm422_vm1, %v950_v30  ;;  %v1015_v26 = vshrl.u32 %v6907_v12, 16  ;;  %v6911_v30 = vld [vmem:[%s7259_s25 + $0x80] sm:$0xff]   ;;  %v2034_v12 = vrot.slane %v6919_v2, 1 }
  0x45   : > { %6569 = vmatprep.mubr.msk.bf16.mxu0 %vm422_vm1, %v1532_v31  ;;  %6535 = vmatprep.mubr.msk.bf16.mxu1 %vm422_vm1, %v958_v34  ;;  %v1009_v31 = vor.u32 %v1007_v23, %v1005_v17  ;;  %v1021_v34 = vrot.slane %v1019_v27, 1  ;;  %v1027_v37 = vshll.u32 %v6911_v30, 16  ;;  %v1031_v44 = vshrl.u32 %v6911_v30, 16 }
  0x46   : > { %v1017_v33 = vor.u32 %v1015_v26, %v1013_v28  ;;  %v2559_v23 = vrot.slane %v2557_v9, 2  ;;  %v2035_v24 = vsel %vm1521_vm3, %v2033_v10, %v2034_v12  ;;  %v1557_v26 = vrot.slane %v6920_v13, 1  ;;  %v7485_v9 = vld [vmem:[%s8480_s1 + $0x10] sm:$0x3] }
  0x47   : > { %v1014_v39 = vsel %vm898_vm2, %v1009_v31, %v1013_v28  ;;  %v1029_v47 = vrot.slane %v1027_v37, 1  ;;  %v2563_v27 = vshrl.u32 %v6926_v19, 16  ;;  %v2566_v28 = vshll.u32 %v6926_v19, 16 }
  0x48   : > { %v1022_v43 = vsel %vm898_vm2, %v1017_v33, %v1021_v34  ;;  %v1558_v35 = vsel %vm1521_vm3, %v1555_v5, %v1557_v26  ;;  %v6935_v26 = vld [vmem:[%s7259_s25 + $0x50] sm:$0xff]  }
  0x49   : > { %v2565_v37 = vrot.slane %v2563_v27, 1  ;;  %v2568_v38 = vrot.slane %v2566_v28, 2 }
  0x4c   : > { %6570 = vmatmul.mubr.msk.bf16.gmra.mxu0 %vm422_vm1, %v1534_v46  ;;  %6536 = vmatmul.mubr.msk.bf16.gmra.mxu1 %vm422_vm1, %v966_v49  ;;  %v6915_v46 = vld [vmem:[%s7259_s25 + $0x90] ss:$0 sps:$4 sm:$0x11]   ;;  %v1025_v49 = vor.u32 %v1023_v41, %v1021_v34  ;;  %v2037_v41 = vsel %vm1521_vm3, %v2034_v12, %v2036_v29 }
  0x4d   : > { %6573 = vmatprep.mubr.msk.bf16.mxu0 %vm422_vm1, %v1536_v50  ;;  %6539 = vmatprep.mubr.msk.bf16.mxu1 %vm422_vm1, %v974_v51  ;;  %v1551_v50 = vrot.slane %v6914_v42, 1  ;;  %v1033_v51 = vor.u32 %v1031_v44, %v1029_v47  ;;  %v1043_v56 = vshll.u32 %v6915_v46, 16  ;;  %v3282_v42 = vsel %vm477_vm0, %v7329_v57, 0  ;;  %v6932_v44 = vld [vmem:[%s7259_s25 + $0x30] sm:$0xff]  }
  0x4e   : > { %v1030_v61 = vsel %vm898_vm2, %v1025_v49, %v1029_v47 }
  0x4f   : > { %v1552_v62 = vsel %vm1521_vm3, %v1549_v48, %v1551_v50  ;;  %v1045_v4 = vrot.slane %v1043_v56, 1  ;;  %v2569_v48 = vor.u32 %v2568_v38, %v2565_v37  ;;  %v6929_v56 = vld [vmem:[%s7259_s25 + $0x38] sm:$0xff]  }
  0x50   : > { %v2044_v6 = vrot.slane %v6929_v56, 1  ;;  %v6942_v37 = vld [vmem:[%s7259_s25 + $0x58] sm:$0xff]   ;;  %v6946_v56 = vld [vmem:[%s7259_s25 + $0x68] sm:$0xff]  }
  0x54   : > { %6574 = vmatmul.mubr.msk.bf16.gmra.mxu0 %vm422_vm1, %v1538_v1  ;;  %6540 = vmatmul.mubr.msk.bf16.gmra.mxu1 %vm422_vm1, %v982_v0  ;;  %v1038_v0 = vsel %vm898_vm2, %v1033_v51, %v1037_v52  ;;  %v1553_v1 = vrot.slane %v6916_v54, 1  ;;  %v2590_v51 = vshrl.u32 %v6932_v44, 16 }
  0x55   : > { %6577 = vmatprep.mubr.msk.bf16.mxu0 %vm422_vm1, %v1540_v3  ;;  %6543 = vmatprep.mubr.msk.bf16.mxu1 %vm422_vm1, %v990_v8  ;;  %v1041_v3 = vor.u32 %v1039_v53, %v1037_v52  ;;  %v2554_v8 = vshrl.u32 %v6924_v58, 16  ;;  %v2593_v52 = vshll.u32 %v6932_v44, 16  ;;  %v6934_v58 = vld [vmem:[%s7259_s25 + $0x38] sm:$0xff]   ;;  %v6944_v44 = vld [vmem:[%s7259_s25 + $0x60] sm:$0xff]  }
  0x56   : > { %v1554_v17 = vsel %vm1521_vm3, %v1551_v50, %v1553_v1  ;;  %v1556_v18 = vsel %vm1521_vm3, %v1553_v1, %v1555_v5  ;;  %v2592_v1 = vrot.slane %v2590_v51, 1  ;;  %v2599_v5 = vshrl.u32 %v6934_v58, 16 }
  0x57   : > { %v1046_v16 = vsel %vm898_vm2, %v1041_v3, %v1045_v4  ;;  %v2595_v2 = vrot.slane %v2593_v52, 2  ;;  %v6936_v3 = vld [vmem:[%s7259_s25 + $0x40] sm:$0xff]   ;;  %v2644_v51 = vshrl.u32 %v6944_v44, 16  ;;  %v2647_v52 = vshll.u32 %v6944_v44, 16  ;;  %v6951_v44 = vld [vmem:[%s7259_s25 + $0x90] sm:$0xff]  }
  0x58   : > { %v2608_v12 = vshrl.u32 %v6936_v3, 16  ;;  %v2611_v13 = vshll.u32 %v6936_v3, 16  ;;  %v6943_v3 = vld [vmem:[%s7259_s25 + $0x70] sm:$0xff]  }
  0x59   : > { %v2596_v10 = vor.u32 %v2595_v2, %v2592_v1  ;;  %v2649_v1 = vrot.slane %v2647_v52, 2  ;;  %v2066_v52 = vrot.slane %v6951_v44, 1 }
  0x5c   : > { %6578 = vmatmul.mubr.msk.bf16.gmra.mxu0 %vm422_vm1, %v1542_v11  ;;  %6544 = vmatmul.mubr.msk.bf16.gmra.mxu1 %vm422_vm1, %v998_v21  ;;  %v6922_v11 = vld [vmem:[%s7259_s25 + $0x20] sm:$0xff]   ;;  %v2551_v21 = vrot.slane %v2549_v7, 2 }
  0x5d   : > { %6581 = vmatprep.mubr.msk.bf16.mxu0 %vm422_vm1, %v1544_v22  ;;  %6547 = vmatprep.mubr.msk.bf16.mxu1 %vm422_vm1, %v1006_v25  ;;  %v2556_v22 = vrot.slane %v2554_v8, 1  ;;  %v6928_v25 = vld [vmem:[%s7259_s25 + $0x20] sm:$0xff]   ;;  %v2038_v32 = vrot.slane %v6922_v11, 1  ;;  %v2602_v8 = vshll.u32 %v6934_v58, 16 }
  0x5e   : > { %v2552_v30 = vor.u32 %v2551_v21, %v2548_v20  ;;  %v2572_v33 = vshrl.u32 %v6928_v25, 16  ;;  %v2575_v34 = vshll.u32 %v6928_v25, 16  ;;  %v6940_v20 = vld [vmem:[%s7259_s25 + $0x50] sm:$0xff]  }
  0x5f   : > { %v2560_v31 = vor.u32 %v2559_v23, %v2556_v22  ;;  %v2039_v45 = vsel %vm1521_vm3, %v2036_v29, %v2038_v32  ;;  %v2604_v19 = vrot.slane %v2602_v8, 2  ;;  %v2610_v23 = vrot.slane %v2608_v12, 1 }
  0x60   : > { %v2574_v46 = vrot.slane %v2572_v33, 1  ;;  %v2577_v47 = vrot.slane %v2575_v34, 2  ;;  %v2629_v33 = vshll.u32 %v6940_v20, 16  ;;  %v2050_v34 = vrot.slane %v6935_v26, 1 }
  0x61   : > { %v2058_v12 = vrot.slane %v6943_v3, 1 }
  0x62   : > { %v2578_v54 = vor.u32 %v2577_v47, %v2574_v46  ;;  %v6939_v46 = vld [vmem:[%s7259_s25 + $0x60] sm:$0xff]   ;;  %v2635_v47 = vshrl.u32 %v6942_v37, 16 }
  0x64   : > { %6582 = vmatmul.mubr.msk.bf16.gmra.mxu0 %vm422_vm1, %v1546_v36  ;;  %6548 = vmatmul.mubr.msk.bf16.gmra.mxu1 %vm422_vm1, %v1014_v39  ;;  %v6925_v36 = vld [vmem:[%s7259_s25 + $0x28] sm:$0xff]   ;;  %v6927_v39 = vld [vmem:[%s7259_s25 + $0x30] sm:$0xff]   ;;  %v2579_v4 = vsel %vm2544_vm4, %v2569_v48, %v2578_v54 }
  0x65   : > { %6585 = vmatprep.mubr.msk.bf16.mxu0 %vm422_vm1, %v1548_v40  ;;  %6551 = vmatprep.mubr.msk.bf16.mxu1 %vm422_vm1, %v1022_v43  ;;  %v6930_v40 = vld [vmem:[%s7259_s25 + $0x28] sm:$0xff]   ;;  %v2561_v43 = vsel %vm2544_vm4, %v2552_v30, %v2560_v31  ;;  %v2040_v57 = vrot.slane %v6925_v36, 1  ;;  %v2042_v53 = vrot.slane %v6927_v39, 1  ;;  %v2626_v30 = vshrl.u32 %v6940_v20, 16 }
  0x66   : > { %v2581_v49 = vshrl.u32 %v6930_v40, 16  ;;  %v2584_v50 = vshll.u32 %v6930_v40, 16 }
  0x67   : > { %v2041_v63 = vsel %vm1521_vm3, %v2038_v32, %v2040_v57  ;;  %v2043_v14 = vsel %vm1521_vm3, %v2040_v57, %v2042_v53  ;;  %v2045_v21 = vsel %vm1521_vm3, %v2042_v53, %v2044_v6  ;;  %v2628_v40 = vrot.slane %v2626_v30, 1 }
  0x68   : > { %v2583_v60 = vrot.slane %v2581_v49, 1  ;;  %v2054_v53 = vrot.slane %v6939_v46, 1 }
  0x6c   : > { %6586 = vmatmul.mubr.msk.bf16.gmra.mxu0 %vm422_vm1, %v1550_v59  ;;  %6552 = vmatmul.mubr.msk.bf16.gmra.mxu1 %vm422_vm1, %v1030_v61  ;;  %v2570_v59 = vsel %vm2544_vm4, %v2560_v31, %v2569_v48  ;;  %v2586_v61 = vrot.slane %v2584_v50, 2  ;;  %v2638_v50 = vshll.u32 %v6942_v37, 16 }
  0x6d   : > { %6589 = vmatprep.mubr.msk.bf16.mxu0 %vm422_vm1, %v1552_v62  ;;  %6555 = vmatprep.mubr.msk.bf16.mxu1 %vm422_vm1, %v1038_v0  ;;  %v7471_v62 = vld [vmem:[%s8480_s1 + $0xe] sm:$0x3]  ;;  %v6931_v0 = vld [vmem:[%s7259_s25 + $0x40] sm:$0xff]  }
  0x6e   : > { %v2587_v7 = vor.u32 %v2586_v61, %v2583_v60  ;;  %v2046_v15 = vrot.slane %v6931_v0, 1  ;;  %v6948_v60 = vld [vmem:[%s7259_s25 + $0x70] sm:$0xff]   ;;  %v2646_v0 = vrot.slane %v2644_v51, 1  ;;  %v6958_v51 = vld [vmem:[%s7259_s25 + $0x98] ss:$0 sps:$4 sm:$0x33]  }
  0x70   : > { %v2588_v11 = vsel %vm2544_vm4, %v2578_v54, %v2587_v7  ;;  %v2597_v22 = vsel %vm2544_vm4, %v2587_v7, %v2596_v10  ;;  %v2047_v25 = vsel %vm1521_vm3, %v2044_v6, %v2046_v15  ;;  %v6941_v54 = vld [vmem:[%s7259_s25 + $0x68] sm:$0xff]   ;;  %v2662_v6 = vshrl.u32 %v6948_v60, 16 }
  0x71   : > { %v2056_v7 = vrot.slane %v6941_v54, 1  ;;  %v2650_v8 = vor.u32 %v2649_v1, %v2646_v0  ;;  %v6957_v1 = vld [vmem:[%s7259_s25 + $0x10] sm:$0xff]  }
  0x74   : > { %6590 = vmatmul.mubr.msk.bf16.gmra.mxu0 %vm422_vm1, %v1554_v17  ;;  %6556 = vmatmul.mubr.msk.bf16.gmra.mxu1 %vm422_vm1, %v1046_v16  ;;  %v6933_v16 = vld [vmem:[%s7259_s25 + $0x48] sm:$0xff]   ;;  %v2601_v17 = vrot.slane %v2599_v5, 1 }
  0x75   : > { %6593 = vmatprep.mubr.msk.bf16.mxu0 %vm422_vm1, %v1556_v18  ;;  %6599 = vmatprep.mubr.msk.bf16.mxu1 %vm422_vm1, %v2035_v24  ;;  %v6938_v18 = vld [vmem:[%s7259_s25 + $0x48] sm:$0xff]   ;;  %v2613_v24 = vrot.slane %v2611_v13, 2  ;;  %v2048_v31 = vrot.slane %v6933_v16, 1  ;;  %v6945_v13 = vld [vmem:[%s7259_s25 + $0x78] sm:$0xff]  }
  0x76   : > { %v2617_v27 = vshrl.u32 %v6938_v18, 16  ;;  %v2605_v28 = vor.u32 %v2604_v19, %v2601_v17  ;;  %v2620_v29 = vshll.u32 %v6938_v18, 16  ;;  %v2664_v18 = vrot.slane %v2662_v6, 1 }
  0x77   : > { %v2614_v32 = vor.u32 %v2613_v24, %v2610_v23  ;;  %v2057_v19 = vsel %vm1521_vm3, %v2054_v53, %v2056_v7  ;;  %v2059_v23 = vsel %vm1521_vm3, %v2056_v7, %v2058_v12  ;;  %v6947_v24 = vld [vmem:[%s7259_s25 + $0x80] sm:$0xff]   ;;  %v3191_v7 = vrot.slane %v6957_v1, 2 }
  0x78   : > { %v2619_v36 = vrot.slane %v2617_v27, 1  ;;  %v2606_v38 = vsel %vm2544_vm4, %v2596_v10, %v2605_v28  ;;  %v2622_v39 = vrot.slane %v2620_v29, 2  ;;  %v2665_v10 = vshll.u32 %v6948_v60, 16 }
  0x7a   : > { %v2623_v49 = vor.u32 %v2622_v39, %v2619_v36 }
  0x7c   : > { %6594 = vmatmul.mubr.msk.bf16.gmra.mxu0 %vm422_vm1, %v1558_v35  ;;  %6600 = vmatmul.mubr.msk.bf16.vlgmr.msra.gmra.mxu1 %vm422_vm1, %v2037_v41  ;;  %v6937_v35 = vld [vmem:[%s7259_s25 + $0x58] sm:$0xff]   ;;  %v2049_v41 = vsel %vm1521_vm3, %v2046_v15, %v2048_v31  ;;  %v2624_v58 = vsel %vm2544_vm4, %v2614_v32, %v2623_v49 }
  0x7d   : > { %6637 = vmatprep.mubr.msk.bf16.mxu0 %vm422_vm1, %v2561_v43  ;;  %6674 = vmatpush3.bf16.msra.mxu1 %v3282_v42  ;;  %v2615_v42 = vsel %vm2544_vm4, %v2605_v28, %v2614_v32  ;;  %v2631_v43 = vrot.slane %v2629_v33, 2  ;;  %v2052_v48 = vrot.slane %v6937_v35, 1  ;;  %v2062_v32 = vrot.slane %v6947_v24, 1  ;;  %v6949_v33 = vld [vmem:[%s7259_s25 + $0x88] sm:$0xff]   ;;  %v6955_v35 = vld [vmem:[%s7259_s25 + $0x90] sm:$0xff]  }
  0x7e   : > { %6603 = vmatprep.mubr.msk.bf16.mxu1 %vm422_vm1, %v2039_v45  ;;  %6835 = vmatprep.subr.msk.bf16.mxu1 %vm477_vm0, %v7471_v62  ;;  %v2051_v45 = vsel %vm1521_vm3, %v2048_v31, %v2050_v34 }
  0x7f   : > { %v2632_v57 = vor.u32 %v2631_v43, %v2628_v40  ;;  %v2053_v61 = vsel %vm1521_vm3, %v2050_v34, %v2052_v48  ;;  %v2055_v2 = vsel %vm1521_vm3, %v2052_v48, %v2054_v53  ;;  %v6954_v34 = vld [vmem:[%s7259_s25 + $0x88] sm:$0xff]   ;;  %v2698_v48 = vshrl.u32 %v6955_v35, 16  ;;  %v6953_v53 = vld [vmem:[%s7259_s25 + $0x98] ss:$0 sps:$4 sm:$0x11]  }
  0x80   : > { %v2689_v46 = vshrl.u32 %v6954_v34, 16 }
  0x81   : > { %v2700_v60 = vrot.slane %v2698_v48, 1 }
  0x84   : > { %6638 = vmatmul.mubr.msk.bf16.vlgmr.msra.gmra.mxu0 %vm422_vm1, %v2570_v59  ;;  %6604 = vmatmul.mubr.msk.bf16.gmra.mxu1 %vm422_vm1, %v2041_v63  ;;  %v2640_v59 = vrot.slane %v2638_v50, 2  ;;  %v2633_v63 = vsel %vm2544_vm4, %v2623_v49, %v2632_v57 }
  0x85   : > { %6712 = vmatpush3.bf16.msra.mxu0 %v3793_v55  ;;  %6607 = vmatprep.mubr.msk.bf16.mxu1 %vm422_vm1, %v2043_v14  ;;  %v2637_v55 = vrot.slane %v2635_v47, 1  ;;  %v2653_v14 = vshrl.u32 %v6946_v56, 16  ;;  %v2692_v47 = vshll.u32 %v6954_v34, 16 }
  0x86   : > { %6641 = vmatprep.mubr.msk.bf16.mxu0 %vm422_vm1, %v2579_v4  ;;  %6836 = vmatprep.subr.msk.bf16.mxu0 %vm477_vm0, %v7485_v9  ;;  %v2656_v4 = vshll.u32 %v6946_v56, 16 }
  0x87   : > { %v2641_v5 = vor.u32 %v2640_v59, %v2637_v55  ;;  %v2655_v15 = vrot.slane %v2653_v14, 1  ;;  %v2691_v55 = vrot.slane %v2689_v46, 1  ;;  %v2694_v56 = vrot.slane %v2692_v47, 2 }
  0x88   : > { %v2658_v16 = vrot.slane %v2656_v4, 2  ;;  %v2710_v14 = vshll.u32 %v6958_v51, 16  ;;  %v2068_v4 = vrot.slane %v6953_v53, 1  ;;  %v6974_v53 = vld [vmem:[%s7259_s25 + $0x48] sm:$0xff]  }
  0x89   : > { %v2642_v17 = vsel %vm2544_vm4, %v2632_v57, %v2641_v5  ;;  %v2651_v20 = vsel %vm2544_vm4, %v2641_v5, %v2650_v8  ;;  %v2701_v57 = vshll.u32 %v6955_v35, 16  ;;  %v2695_v3 = vor.u32 %v2694_v56, %v2691_v55  ;;  %v6973_v55 = vld [vmem:[%s7259_s25 + $0x50] sm:$0xff]  }
  0x8a   : > { %v2659_v26 = vor.u32 %v2658_v16, %v2655_v15  ;;  %v6962_v15 = vld [vmem:[%s7259_s25 + $0x18] sm:$0xff]   ;;  %v2069_v16 = vsel %vm1521_vm3, %v2066_v52, %v2068_v4  ;;  %v3207_v1 = vrot.slane %v6973_v55, 2  ;;  %v6976_v4 = vld [vmem:[%s7259_s25 + $0x50] sm:$0xff]  }
  0x8c   : > { %6642 = vmatmul.mubr.msk.bf16.gmra.mxu0 %vm422_vm1, %v2588_v11  ;;  %6608 = vmatmul.mubr.msk.bf16.gmra.mxu1 %vm422_vm1, %v2045_v21  ;;  %v6950_v11 = vld [vmem:[%s7259_s25 + $0x78] sm:$0xff]   ;;  %v2667_v21 = vrot.slane %v2665_v10, 2  ;;  %v2660_v36 = vsel %vm2544_vm4, %v2650_v8, %v2659_v26 }
  0x8d   : > { %6645 = vmatprep.mubr.msk.bf16.mxu0 %vm422_vm1, %v2597_v22  ;;  %6611 = vmatprep.mubr.msk.bf16.mxu1 %vm422_vm1, %v2047_v25  ;;  %v6952_v22 = vld [vmem:[%s7259_s25 + $0x80] sm:$0xff]   ;;  %v2060_v25 = vrot.slane %v6945_v13, 1  ;;  %v2671_v27 = vshrl.u32 %v6950_v11, 16  ;;  %v2674_v28 = vshll.u32 %v6950_v11, 16  ;;  %v6959_v10 = vld [vmem:[%s7259_s25 + $0x18] sm:$0xff]   ;;  %v2712_v13 = vrot.slane %v2710_v14, 2 }
  0x8e   : > { %v2668_v29 = vor.u32 %v2667_v21, %v2664_v18  ;;  %v2680_v30 = vshrl.u32 %v6952_v22, 16  ;;  %v2683_v31 = vshll.u32 %v6952_v22, 16  ;;  %v6961_v18 = vld [vmem:[%s7259_s25 + $0x10] sm:$0xfc]   ;;  %v3193_v21 = vrot.slane %v6959_v10, 2  ;;  %v6978_v10 = vld [vmem:[%s7259_s25 + $0x58] sm:$0xff]  }
  0x8f   : > { %v2673_v37 = vrot.slane %v2671_v27, 1  ;;  %v2061_v39 = vsel %vm1521_vm3, %v2058_v12, %v2060_v25  ;;  %v2063_v43 = vsel %vm1521_vm3, %v2060_v25, %v2062_v32  ;;  %v3701_v22 = vrot.slane %v6961_v18, 2  ;;  %v6964_v27 = vld [vmem:[%s7259_s25 + $0x20] sm:$0xff]  }
  0x90   : > { %v2669_v40 = vsel %vm2544_vm4, %v2659_v26, %v2668_v29  ;;  %v6963_v26 = vld [vmem:[%s7259_s25 + $0x28] sm:$0xff]   ;;  %v3704_v34 = vrot.slane %v6964_v27, 2  ;;  %v3716_v18 = vrot.slane %v6976_v4, 2 }
  0x91   : > { %v3197_v35 = vrot.slane %v6963_v26, 2  ;;  %v6980_v26 = vld [vmem:[%s7259_s25 + $0x60] sm:$0xff]  }
  0x94   : > { %6646 = vmatmul.mubr.msk.bf16.gmra.mxu0 %vm422_vm1, %v2606_v38  ;;  %6612 = vmatmul.mubr.msk.bf16.gmra.mxu1 %vm422_vm1, %v2049_v41  ;;  %v2676_v38 = vrot.slane %v2674_v28, 2  ;;  %v2682_v41 = vrot.slane %v2680_v30, 1  ;;  %v3194_v28 = vsel %vm3189_vm5, %v3191_v7, %v3193_v21  ;;  %v6965_v30 = vld [vmem:[%s7259_s25 + $0x30] sm:$0xff]  }
  0x95   : > { %6649 = vmatprep.mubr.msk.bf16.mxu0 %vm422_vm1, %v2615_v42  ;;  %6615 = vmatprep.mubr.msk.bf16.mxu1 %vm422_vm1, %v2051_v45  ;;  %v2685_v42 = vrot.slane %v2683_v31, 2  ;;  %v2064_v45 = vrot.slane %v6949_v33, 1  ;;  %v4438_v31 = vsel %vm477_vm0, %v7471_v62, 0  ;;  %v6966_v33 = vld [vmem:[%s7259_s25 + $0x28] sm:$0xff]  }
  0x96   : > { %v2677_v49 = vor.u32 %v2676_v38, %v2673_v37  ;;  %v3706_v37 = vrot.slane %v6966_v33, 2  ;;  %v6967_v38 = vld [vmem:[%s7259_s25 + $0x38] sm:$0xff]  }
  0x97   : > { %v2686_v50 = vor.u32 %v2685_v42, %v2682_v41  ;;  %v2067_v0 = vsel %vm1521_vm3, %v2064_v45, %v2066_v52  ;;  %v4950_v41 = vsel %vm477_vm0, %v7485_v9, 0  ;;  %v6970_v42 = vld [vmem:[%s7259_s25 + $0x38] sm:$0xff]   ;;  %v3201_v9 = vrot.slane %v6967_v38, 2  ;;  %v6971_v52 = vld [vmem:[%s7259_s25 + $0x48] sm:$0xff]  }
  0x98   : > { %v2678_v54 = vsel %vm2544_vm4, %v2668_v29, %v2677_v49  ;;  %v3707_v44 = vsel %vm3189_vm5, %v3704_v34, %v3706_v37  ;;  %v3710_v47 = vrot.slane %v6970_v42, 2 }
  0x99   : > { %v2687_v59 = vsel %vm2544_vm4, %v2677_v49, %v2686_v50  ;;  %v2696_v12 = vsel %vm2544_vm4, %v2686_v50, %v2695_v3  ;;  %v6972_v50 = vld [vmem:[%s7259_s25 + $0x40] sm:$0xff]  }
  0x9c   : > { %6650 = vmatmul.mubr.msk.bf16.gmra.mxu0 %vm422_vm1, %v2624_v58  ;;  %6616 = vmatmul.mubr.msk.bf16.gmra.mxu1 %vm422_vm1, %v2053_v61  ;;  %v2065_v58 = vsel %vm1521_vm3, %v2062_v32, %v2064_v45  ;;  %v2703_v61 = vrot.slane %v2701_v57, 2  ;;  %v6969_v45 = vld [vmem:[%s7259_s25 + $0x40] sm:$0xff]  }
  0x9d   : > { %6653 = vmatprep.mubr.msk.bf16.mxu0 %vm422_vm1, %v2633_v63  ;;  %6619 = vmatprep.mubr.msk.bf16.mxu1 %vm422_vm1, %v2055_v2  ;;  %v6956_v63 = vld [vmem:[%s7259_s25 + $0x8] sm:$0xfc]   ;;  %v2707_v2 = vshrl.u32 %v6958_v51, 16  ;;  %v3203_v48 = vrot.slane %v6969_v45, 2  ;;  %v6984_v45 = vld [vmem:[%s7259_s25 + $0x70] sm:$0xff]  }
  0x9e   : > { %v2704_v5 = vor.u32 %v2703_v61, %v2700_v60  ;;  %v3190_v6 = vrot.slane %v6956_v63, 2  ;;  %v3205_v61 = vrot.slane %v6971_v52, 2  ;;  %v3714_v63 = vrot.slane %v6974_v53, 2 }
  0x9f   : > { %v2709_v8 = vrot.slane %v2707_v2, 1 }
  0xa0   : > { %v3192_v11 = vsel %vm3189_vm5, %v3190_v6, %v3191_v7  ;;  %v3206_v6 = vsel %vm3189_vm5, %v3203_v48, %v3205_v61 }
  0xa4   : > { %6654 = vmatmul.mubr.msk.bf16.gmra.mxu0 %vm422_vm1, %v2642_v17  ;;  %6620 = vmatmul.mubr.msk.bf16.gmra.mxu1 %vm422_vm1, %v2057_v19  ;;  %v2705_v17 = vsel %vm2544_vm4, %v2695_v3, %v2704_v5  ;;  %v6960_v19 = vld [vmem:[%s7259_s25 + $0x20] sm:$0xff]  }
  0xa5   : > { %6657 = vmatprep.mubr.msk.bf16.mxu0 %vm422_vm1, %v2651_v20  ;;  %6623 = vmatprep.mubr.msk.bf16.mxu1 %vm422_vm1, %v2059_v23  ;;  %v2713_v20 = vor.u32 %v2712_v13, %v2709_v8  ;;  %v3702_v23 = vrot.slane %v6962_v15, 2  ;;  %v3195_v24 = vrot.slane %v6960_v19, 2  ;;  %v6975_v8 = vld [vmem:[%s7259_s25 + $0x58] sm:$0xff]   ;;  %v3208_v13 = vsel %vm3189_vm5, %v3205_v61, %v3207_v1  ;;  %v6977_v15 = vld [vmem:[%s7259_s25 + $0x60] sm:$0xff]  }
  0xa6   : > { %v3209_v19 = vrot.slane %v6975_v8, 2  ;;  %v6988_v8 = vld [vmem:[%s7259_s25 + $0x80] sm:$0xff]  }
  0xa7   : > { %v2714_v25 = vsel %vm2544_vm4, %v2704_v5, %v2713_v20  ;;  %v3703_v29 = vsel %vm3189_vm5, %v3701_v22, %v3702_v23  ;;  %v3196_v32 = vsel %vm3189_vm5, %v3193_v21, %v3195_v24  ;;  %v3705_v62 = vsel %vm3189_vm5, %v3702_v23, %v3704_v34  ;;  %v6981_v34 = vld [vmem:[%s7259_s25 + $0x70] sm:$0xff]  }
  0xa8   : > { %v3718_v20 = vrot.slane %v6978_v10, 2  ;;  %v3211_v22 = vrot.slane %v6977_v15, 2 }
  0xaa   : > { %v3212_v33 = vsel %vm3189_vm5, %v3209_v19, %v3211_v22 }
  0xac   : > { %6658 = vmatmul.mubr.msk.bf16.gmra.mxu0 %vm422_vm1, %v2660_v36  ;;  %6624 = vmatmul.mubr.msk.bf16.gmra.mxu1 %vm422_vm1, %v2061_v39  ;;  %v3199_v36 = vrot.slane %v6965_v30, 2  ;;  %v6968_v39 = vld [vmem:[%s7259_s25 + $0x30] sm:$0xff]   ;;  %v6979_v30 = vld [vmem:[%s7259_s25 + $0x68] sm:$0xff]  }
  0xad   : > { %6661 = vmatprep.mubr.msk.bf16.mxu0 %vm422_vm1, %v2669_v40  ;;  %6627 = vmatprep.mubr.msk.bf16.mxu1 %vm422_vm1, %v2063_v43  ;;  %v3198_v40 = vsel %vm3189_vm5, %v3195_v24, %v3197_v35  ;;  %v3708_v46 = vrot.slane %v6968_v39, 2  ;;  %v3213_v38 = vrot.slane %v6979_v30, 2 }
  0xae   : > { %v3200_v43 = vsel %vm3189_vm5, %v3197_v35, %v3199_v36  ;;  %v3202_v57 = vsel %vm3189_vm5, %v3199_v36, %v3201_v9 }
  0xaf   : > { %v3709_v49 = vsel %vm3189_vm5, %v3706_v37, %v3708_v46  ;;  %v3711_v51 = vsel %vm3189_vm5, %v3708_v46, %v3710_v47  ;;  %v3720_v37 = vrot.slane %v6980_v26, 2  ;;  %v6994_v26 = vld [vmem:[%s7259_s25 + $0x10] sm:$0xfc]  }
  0xb4   : > { %6662 = vmatmul.mubr.msk.bf16.gmra.mxu0 %vm422_vm1, %v2678_v54  ;;  %6628 = vmatmul.mubr.msk.bf16.gmra.mxu1 %vm422_vm1, %v2065_v58  ;;  %v3204_v54 = vsel %vm3189_vm5, %v3201_v9, %v3203_v48  ;;  %v3214_v9 = vsel %vm3189_vm5, %v3211_v22, %v3213_v38  ;;  %v6983_v48 = vld [vmem:[%s7259_s25 + $0x78] sm:$0xff]  }
  0xb5   : > { %6665 = vmatprep.mubr.msk.bf16.mxu0 %vm422_vm1, %v2687_v59  ;;  %6631 = vmatprep.mubr.msk.bf16.mxu1 %vm422_vm1, %v2067_v0  ;;  %v3712_v59 = vrot.slane %v6972_v50, 2 }
  0xb7   : > { %v3713_v14 = vsel %vm3189_vm5, %v3710_v47, %v3712_v59  ;;  %v3715_v7 = vsel %vm3189_vm5, %v3712_v59, %v3714_v63  ;;  %v3217_v59 = vrot.slane %v6983_v48, 2 }
  0xbc   : > { %6666 = vmatmul.mubr.msk.bf16.gmra.mxu0 %vm422_vm1, %v2696_v12  ;;  %6632 = vmatmul.mubr.msk.bf16.gmra.mxu1 %vm422_vm1, %v2069_v16 }
  0xbd   : > { %6669 = vmatprep.mubr.msk.bf16.mxu0 %vm422_vm1, %v2705_v17  ;;  %6675 = vmatprep.mubr.msk.bf16.mxu1 %vm422_vm1, %v3192_v11 }
  0xc4   : > { %6670 = vmatmul.mubr.msk.bf16.gmra.mxu0 %vm422_vm1, %v2714_v25  ;;  %6676 = vmatmul.mubr.msk.bf16.vlgmr.msra.gmra.mxu1 %vm422_vm1, %v3194_v28  ;;  %v3717_v25 = vsel %vm3189_vm5, %v3714_v63, %v3716_v18  ;;  %v3210_v28 = vsel %vm3189_vm5, %v3207_v1, %v3209_v19  ;;  %v6995_v19 = vld [vmem:[%s7259_s25 + $0x18] sm:$0xff]  }
  0xc5   : > { %6713 = vmatprep.mubr.msk.bf16.mxu0 %vm422_vm1, %v3703_v29  ;;  %6750 = vmatpush3.bf16.msra.mxu1 %v4438_v31  ;;  %v3719_v29 = vsel %vm3189_vm5, %v3716_v18, %v3718_v20  ;;  %v6982_v31 = vld [vmem:[%s7259_s25 + $0x68] sm:$0xff]  }
  0xc6   : > { %6679 = vmatprep.mubr.msk.bf16.mxu1 %vm422_vm1, %v3196_v32  ;;  %v3722_v39 = vrot.slane %v6982_v31, 2  ;;  %v7719_v18 = vld [vmem:[%s7259_s25 + $0x88] sm:$0xff]   ;;  %v3728_v31 = vrot.slane %v6988_v8, 2  ;;  %v6991_v8 = vld [vmem:[%s7259_s25 + $0x98] ss:$0 sps:$4 sm:$0x33]  }
  0xc8   : > { %v3723_v47 = vsel %vm3189_vm5, %v3720_v37, %v3722_v39 }
  0xcc   : > { %6714 = vmatmul.mubr.msk.bf16.vlgmr.msra.gmra.mxu0 %vm422_vm1, %v3705_v62  ;;  %6680 = vmatmul.mubr.msk.bf16.gmra.mxu1 %vm422_vm1, %v3198_v40 }
  0xcd   : > { %6788 = vmatpush3.bf16.msra.mxu0 %v4950_v41  ;;  %6683 = vmatprep.mubr.msk.bf16.mxu1 %vm422_vm1, %v3200_v43  ;;  %v3215_v41 = vrot.slane %v6981_v34, 2 }
  0xce   : > { %6717 = vmatprep.mubr.msk.bf16.mxu0 %vm422_vm1, %v3707_v44  ;;  %v3721_v44 = vsel %vm3189_vm5, %v3718_v20, %v3720_v37  ;;  %v3730_v37 = vrot.slane %v7719_v18, 2 }
  0xd4   : > { %v7611_v56 = vpop.f32.mrf.mxu0  ;;  %6718 = vmatmul.mubr.msk.bf16.gmra.mxu0 %vm422_vm1, %v3709_v49  ;;  %v7614_v58 = vpop.f32.mrf.mxu1  ;;  %6684 = vmatmul.mubr.msk.bf16.gmra.mxu1 %vm422_vm1, %v3202_v57  ;;  %v6986_v49 = vld [vmem:[%s7259_s25 + $0x78] sm:$0xff]   ;;  %v3216_v57 = vsel %vm3189_vm5, %v3213_v38, %v3215_v41  ;;  %v4222_v38 = vshrl.u32 %v6995_v19, 16 }
  0xd5   : > { %6721 = vmatprep.mubr.msk.bf16.mxu0 %vm422_vm1, %v3711_v51  ;;  %6687 = vmatprep.mubr.msk.bf16.mxu1 %vm422_vm1, %v3204_v54  ;;  %v6985_v51 = vld [vmem:[%s7259_s25 + $0x80] sm:$0xff]   ;;  %v3724_v54 = vrot.slane %v6984_v45, 2  ;;  %v3726_v61 = vrot.slane %v6986_v49, 2  ;;  %v4214_v45 = vshrl.u32 %v6994_v26, 16 }
  0xd6   : > { %v7618_v60 = vpop.f32.mrf.mxu0  ;;  %v7621_v0 = vpop.f32.mrf.mxu1  ;;  %v3219_v1 = vrot.slane %v6985_v51, 2  ;;  %v6992_v51 = vld [vmem:[%s7259_s25 + $0x90] sm:$0xff]  }
  0xd7   : > { %v3727_v15 = vsel %vm3189_vm5, %v3724_v54, %v3726_v61 }
  0xd8   : > { %v7623_v2 = vpop.f32.mrf.mxu0  ;;  %v7625_v3 = vpop.f32.mrf.mxu1  ;;  %v3220_v22 = vsel %vm3189_vm5, %v3217_v59, %v3219_v1 }
  0xda   : > { %v7629_v5 = vpop.f32.mrf.mxu0  ;;  %v7635_v12 = vpop.f32.mrf.mxu1 }
  0xdc   : > { %v7639_v16 = vpop.f32.mrf.mxu0  ;;  %6722 = vmatmul.mubr.msk.bf16.gmra.mxu0 %vm422_vm1, %v3713_v14  ;;  %v7642_v17 = vpop.f32.mrf.mxu1  ;;  %6688 = vmatmul.mubr.msk.bf16.gmra.mxu1 %vm422_vm1, %v3206_v6  ;;  %v3725_v6 = vsel %vm3189_vm5, %v3722_v39, %v3724_v54  ;;  %v4225_v39 = vshll.u32 %v6995_v19, 16  ;;  %v6997_v54 = vld [vmem:[%s7259_s25 + $0x20] sm:$0xff]  }
  0xdd   : > { %6725 = vmatprep.mubr.msk.bf16.mxu0 %vm422_vm1, %v3715_v7  ;;  %6691 = vmatprep.mubr.msk.bf16.mxu1 %vm422_vm1, %v3208_v13  ;;  %v6987_v7 = vld [vmem:[%s7259_s25 + $0x88] sm:$0xff]   ;;  %v3218_v13 = vsel %vm3189_vm5, %v3215_v41, %v3217_v59 }
  0xde   : > { %v7646_v11 = vpop.f32.mrf.mxu0  ;;  %v7649_v21 = vpop.f32.mrf.mxu1  ;;  %v3221_v30 = vrot.slane %v6987_v7, 2  ;;  %v3731_v7 = vsel %vm3189_vm5, %v3728_v31, %v3730_v37 }
  0xe0   : > { %v7651_v23 = vpop.f32.mrf.mxu0  ;;  %v7653_v24 = vpop.f32.mrf.mxu1  ;;  %v3222_v49 = vsel %vm3189_vm5, %v3219_v1, %v3221_v30 }
  0xe2   : > { %v7657_v27 = vpop.f32.mrf.mxu0  ;;  %v7663_v32 = vpop.f32.mrf.mxu1 }
  0xe4   : > { %v7667_v35 = vpop.f32.mrf.mxu0  ;;  %6726 = vmatmul.mubr.msk.bf16.gmra.mxu0 %vm422_vm1, %v3717_v25  ;;  %v7670_v36 = vpop.f32.mrf.mxu1  ;;  %6692 = vmatmul.mubr.msk.bf16.gmra.mxu1 %vm422_vm1, %v3210_v28  ;;  %v7726_v25 = vld [vmem:[%s7259_s25 + $0x90] sm:$0xff]  }
  0xe5   : > { %6729 = vmatprep.mubr.msk.bf16.mxu0 %vm422_vm1, %v3719_v29  ;;  %6695 = vmatprep.mubr.msk.bf16.mxu1 %vm422_vm1, %v3212_v33 }
  0xe6   : > { %v7674_v62 = vpop.f32.mrf.mxu0  ;;  %v7677_v40 = vpop.f32.mrf.mxu1 }
  0xe8   : > { %v7679_v42 = vpop.f32.mrf.mxu0  ;;  %v7681_v43 = vpop.f32.mrf.mxu1 }
  0xea   : > { %v7685_v46 = vpop.f32.mrf.mxu0  ;;  %v7691_v50 = vpop.f32.mrf.mxu1 }
  0xec   : > { %v7695_v52 = vpop.f32.mrf.mxu0  ;;  %6730 = vmatmul.mubr.msk.bf16.gmra.mxu0 %vm422_vm1, %v3721_v44  ;;  %v7698_v53 = vpop.f32.mrf.mxu1  ;;  %6696 = vmatmul.mubr.msk.bf16.gmra.mxu1 %vm422_vm1, %v3214_v9  ;;  %v3223_v44 = vrot.slane %v7726_v25, 2  ;;  %v4217_v9 = vshll.u32 %v6994_v26, 16  ;;  %v6998_v25 = vld [vmem:[%s7259_s25 + $0x28] sm:$0xff]  }
  0xed   : > { %6733 = vmatprep.mubr.msk.bf16.mxu0 %vm422_vm1, %v3723_v47  ;;  %6699 = vmatprep.mubr.msk.bf16.mxu1 %vm422_vm1, %v3216_v57  ;;  %v3729_v57 = vsel %vm3189_vm5, %v3726_v61, %v3728_v31  ;;  %v3732_v31 = vrot.slane %v6992_v51, 2  ;;  %v4243_v51 = vshll.u32 %v6998_v25, 16 }
  0xee   : > { %v7702_v55 = vpop.f32.mrf.mxu0  ;;  %v7705_v63 = vpop.f32.mrf.mxu1  ;;  %v3224_v19 = vsel %vm3189_vm5, %v3221_v30, %v3223_v44  ;;  %v4219_v1 = vrot.slane %v4217_v9, 3 }
  0xf0   : > { %v7707_v14 = vpop.f32.mrf.mxu0  ;;  %v7709_v4 = vpop.f32.mrf.mxu1 }
  0xf2   : > { %v7714_v10 = vpop.f32.mrf.mxu0  ;;  %v7722_v20 = vpop.f32.mrf.mxu1 }
  0xf4   : > { %v7729_v28 = vpop.f32.mrf.mxu0  ;;  %6734 = vmatmul.mubr.msk.bf16.gmra.mxu0 %vm422_vm1, %v3725_v6  ;;  %v6525_v29 = vpop.f32.mrf.mxu1  ;;  %6700 = vmatmul.mubr.msk.bf16.gmra.mxu1 %vm422_vm1, %v3218_v13  ;;  %v7753_v13 = vld [vmem:[%s7259_s25 + $0x98] sm:$0xff]  }
  0xf5   : > { %6737 = vmatprep.mubr.msk.bf16.mxu0 %vm422_vm1, %v3727_v15  ;;  %v1283_v33 = vadd.f32 %v6525_v29, %v7611_v56  ;;  %6703 = vmatprep.mubr.msk.bf16.mxu1 %vm422_vm1, %v3220_v22  ;;  %v4227_v15 = vrot.slane %v4225_v39, 3  ;;  %v4216_v22 = vrot.slane %v4214_v45, 2  ;;  %v4234_v39 = vshll.u32 %v6997_v54, 16 }
  0xf6   : > { %v7735_v34 = vpop.f32.mrf.mxu0  ;;  %v1138_v41 = vpop.f32.mrf.mxu1  ;;  %v3734_v45 = vrot.slane %v7753_v13, 2 }
  0xf7   : > { %v1281_v47 = vadd.f32 %v1138_v41, %v7618_v60  ;;  %v4224_v60 = vrot.slane %v4222_v38, 2  ;;  %v4231_v38 = vshrl.u32 %v6997_v54, 16 }
  0xf8   : > { %v7741_v48 = vpop.f32.mrf.mxu0  ;;  %v6526_v56 = vpop.f32.mrf.mxu1 }
  0xf9   : > { %v1284_v59 = vadd.f32 %v6526_v56, %v7623_v2  ;;  %v4228_v9 = vor.u32 %v4227_v15, %v4224_v60  ;;  %v4233_v13 = vrot.slane %v4231_v38, 2  ;;  %v4236_v60 = vrot.slane %v4234_v39, 3  ;;  %v7003_v38 = vld [vmem:[%s7259_s25 + $0x38] sm:$0xff]  }
  0xfa   : > { %v7748_v6 = vpop.f32.mrf.mxu0  ;;  %v1141_v18 = vpop.f32.mrf.mxu1 }
  0xfb   : > { %v1282_v61 = vadd.f32 %v1141_v18, %v7629_v5  ;;  %v3225_v5 = vrot.slane %v6991_v8, 2  ;;  %v3733_v8 = vsel %vm3189_vm5, %v3730_v37, %v3732_v31  ;;  %v4245_v37 = vrot.slane %v4243_v51, 3 }
  0xfc   : > { %v6563_v26 = vpop.f32.mrf.mxu0  ;;  %6738 = vmatmul.mubr.msk.bf16.gmra.mxu0 %vm422_vm1, %v3729_v57  ;;  %v6529_v2 = vpop.f32.mrf.mxu1  ;;  %6704 = vmatmul.mubr.msk.bf16.gmra.mxu1 %vm422_vm1, %v3222_v49  ;;  %v4220_v49 = vor.u32 %v4219_v1, %v4216_v22  ;;  %v4240_v57 = vshrl.u32 %v6998_v25, 16  ;;  %v6999_v25 = vld [vmem:[%s7259_s25 + $0x10] sm:$0xf8]  }
  0xfd   : > { %v7759_v29 = vadd.f32 %v6563_v26, %v1283_v33  ;;  %6741 = vmatprep.mubr.msk.bf16.mxu0 %vm422_vm1, %v3731_v7  ;;  %v1287_v30 = vadd.f32 %v6529_v2, %v7639_v16  ;;  %6707 = vmatprep.mubr.msk.bf16.mxu1 %vm422_vm1, %v3224_v19  ;;  %v6996_v16 = vld [vmem:[%s7259_s25 + $0xa0] ss:$0 sps:$4 sm:$0x33]   ;;  %v3226_v1 = vsel %vm3189_vm5, %v3223_v44, %v3225_v5  ;;  %v7001_v26 = vld [vmem:[%s7259_s25 + $0x30] sm:$0xff]  }
  0xfe   : > { %v1650_v41 = vpop.f32.mrf.mxu0  ;;  %v1154_v33 = vpop.f32.mrf.mxu1  ;;  %v4252_v51 = vshll.u32 %v7001_v26, 16 }
  0xff   : > { %v7766_v56 = vadd.f32 %v1650_v41, %v1281_v47  ;;  %v1285_v54 = vadd.f32 %v1154_v33, %v7646_v11  ;;  %v7774_v47 = vld [vmem:[%s7259_s25 + $0x18] sm:$0xff]   ;;  %v3735_v11 = vsel %vm3189_vm5, %v3732_v31, %v3734_v45  ;;  %v4242_v33 = vrot.slane %v4240_v57, 2 }
 0x100   : > { %v6564_v7 = vpop.f32.mrf.mxu0  ;;  %v6530_v18 = vpop.f32.mrf.mxu1  ;;  %v4859_v31 = vrot.slane %v7774_v47, 3  ;;  %v4249_v57 = vshrl.u32 %v7001_v26, 16  ;;  %v7803_v26 = vld [vmem:[%s7259_s25 + $0x28] sm:$0xff]  }
 0x101   : > { %v7770_v19 = vadd.f32 %v6564_v7, %v1284_v59  ;;  %v1288_v15 = vadd.f32 %v6530_v18, %v7651_v23  ;;  %v4229_v59 = vsel %vm4212_vm6, %v4220_v49, %v4228_v9  ;;  %v3736_v23 = vrot.slane %v6996_v16, 2 }
 0x102   : > { %v1653_v22 = vpop.f32.mrf.mxu0  ;;  %v1157_v2 = vpop.f32.mrf.mxu1 }
 0x103   : > { %v7781_v41 = vadd.f32 %v1653_v22, %v1282_v61  ;;  %v1286_v39 = vadd.f32 %v1157_v2, %v7657_v27  ;;  %v4237_v61 = vor.u32 %v4236_v60, %v4233_v13  ;;  %v4858_v27 = vrot.slane %v6999_v25, 3  ;;  %v7002_v2 = vld [vmem:[%s7259_s25 + $0x20] sm:$0xff]  }
 0x104   : > { %v6567_v7 = vpop.f32.mrf.mxu0  ;;  %6742 = vmatmul.mubr.msk.bf16.gmra.mxu0 %vm422_vm1, %v3733_v8  ;;  %v6533_v18 = vpop.f32.mrf.mxu1  ;;  %6708 = vmatmul.mubr.msk.bf16.gmra.mxu1 %vm422_vm1, %v3226_v1  ;;  %v4246_v8 = vor.u32 %v4245_v37, %v4242_v33  ;;  %v4258_v22 = vshrl.u32 %v7003_v38, 16  ;;  %v4261_v13 = vshll.u32 %v7003_v38, 16  ;;  %v4251_v37 = vrot.slane %v4249_v57, 2 }
 0x105   : > { %v7787_v44 = vadd.f32 %v6567_v7, %v1287_v30  ;;  %6745 = vmatprep.mubr.msk.bf16.mxu0 %vm422_vm1, %v3735_v11  ;;  %v1291_v5 = vadd.f32 %v6533_v18, %v7667_v35  ;;  %6751 = vmatprep.mubr.msk.bf16.mxu1 %vm422_vm1, %v4229_v59  ;;  %v3737_v11 = vsel %vm3189_vm5, %v3734_v45, %v3736_v23  ;;  %v4254_v38 = vrot.slane %v4252_v51, 3  ;;  %v7007_v23 = vld [vmem:[%s7259_s25 + $0x48] sm:$0xff]  }
 0x106   : > { %v1666_v49 = vpop.f32.mrf.mxu0  ;;  %v1170_v30 = vpop.f32.mrf.mxu1  ;;  %v4238_v25 = vsel %vm4212_vm6, %v4228_v9, %v4237_v61  ;;  %v4860_v33 = vsel %vm4857_vm7, %v4858_v27, %v4859_v31  ;;  %v4263_v45 = vrot.slane %v4261_v13, 3  ;;  %v4861_v27 = vrot.slane %v7002_v2, 3 }
 0x107   : > { %v7794_v16 = vadd.f32 %v1666_v49, %v1285_v54  ;;  %v1289_v60 = vadd.f32 %v1170_v30, %v7674_v62  ;;  %v7005_v62 = vld [vmem:[%s7259_s25 + $0x40] sm:$0xff]   ;;  %v4260_v49 = vrot.slane %v4258_v22, 2 }
 0x108   : > { %v6568_v47 = vpop.f32.mrf.mxu0  ;;  %v6534_v1 = vpop.f32.mrf.mxu1  ;;  %v4267_v51 = vshrl.u32 %v7005_v62, 16  ;;  %v4270_v22 = vshll.u32 %v7005_v62, 16  ;;  %v7009_v62 = vld [vmem:[%s7259_s25 + $0x50] sm:$0xff]  }
 0x109   : > { %v7797_v35 = vadd.f32 %v6568_v47, %v1288_v15  ;;  %v1292_v54 = vadd.f32 %v6534_v1, %v7679_v42  ;;  %v4247_v15 = vsel %vm4212_vm6, %v4237_v61, %v4246_v8  ;;  %v4264_v1 = vor.u32 %v4263_v45, %v4260_v49 }
 0x10a   : > { %v1669_v59 = vpop.f32.mrf.mxu0  ;;  %v1173_v7 = vpop.f32.mrf.mxu1  ;;  %v4269_v49 = vrot.slane %v4267_v51, 2  ;;  %v4272_v45 = vrot.slane %v4270_v22, 3  ;;  %v4288_v51 = vshll.u32 %v7009_v62, 16 }
 0x10b   : > { %v7808_v18 = vadd.f32 %v1669_v59, %v1286_v39  ;;  %v1290_v9 = vadd.f32 %v1173_v7, %v7685_v46  ;;  %v4863_v39 = vrot.slane %v7803_v26, 3  ;;  %v4255_v46 = vor.u32 %v4254_v38, %v4251_v37  ;;  %v7006_v38 = vld [vmem:[%s7259_s25 + $0x30] sm:$0xff]  }
 0x10c   : > { %v6571_v30 = vpop.f32.mrf.mxu0  ;;  %6746 = vmatmul.mubr.msk.bf16.gmra.mxu0 %vm422_vm1, %v3737_v11  ;;  %v6537_v42 = vpop.f32.mrf.mxu1  ;;  %6752 = vmatmul.mubr.msk.bf16.vlgmr.msra.gmra.mxu1 %vm422_vm1, %v4238_v25  ;;  %v4276_v11 = vshrl.u32 %v7007_v23, 16  ;;  %v4279_v25 = vshll.u32 %v7007_v23, 16  ;;  %v7833_v23 = vld [vmem:[%s7259_s25 + $0x38] sm:$0xff]  }
 0x10d   : > { %v7814_v47 = vadd.f32 %v6571_v30, %v1291_v5  ;;  %6789 = vmatprep.mubr.msk.bf16.mxu0 %vm422_vm1, %v4860_v33  ;;  %v1295_v61 = vadd.f32 %v6537_v42, %v7695_v52  ;;  %6755 = vmatprep.mubr.msk.bf16.mxu1 %vm422_vm1, %v4247_v15  ;;  %v4862_v33 = vsel %vm4857_vm7, %v4859_v31, %v4861_v27 }
 0x10e   : > { %v1682_v57 = vpop.f32.mrf.mxu0  ;;  %v1186_v13 = vpop.f32.mrf.mxu1  ;;  %v4864_v37 = vsel %vm4857_vm7, %v4861_v27, %v4863_v39  ;;  %v4256_v15 = vsel %vm4212_vm6, %v4246_v8, %v4255_v46  ;;  %v4278_v42 = vrot.slane %v4276_v11, 2  ;;  %v4281_v31 = vrot.slane %v4279_v25, 3 }
 0x10f   : > { %v7821_v5 = vadd.f32 %v1682_v57, %v1289_v60  ;;  %v1293_v2 = vadd.f32 %v1186_v13, %v7702_v55  ;;  %v7011_v57 = vld [vmem:[%s7259_s25 + $0x58] sm:$0xff]   ;;  %v4865_v8 = vrot.slane %v7006_v38, 3  ;;  %v4867_v11 = vrot.slane %v7833_v23, 3  ;;  %v7856_v23 = vld [vmem:[%s7259_s25 + $0x48] sm:$0xff]  }
 0x110   : > { %v6572_v26 = vpop.f32.mrf.mxu0  ;;  %v6538_v59 = vpop.f32.mrf.mxu1 }
 0x111   : > { %v7824_v52 = vadd.f32 %v6572_v26, %v1292_v54  ;;  %v1296_v60 = vadd.f32 %v6538_v59, %v7707_v14  ;;  %v4265_v54 = vsel %vm4212_vm6, %v4255_v46, %v4264_v1  ;;  %v4282_v59 = vor.u32 %v4281_v31, %v4278_v42 }
 0x112   : > { %v1685_v7 = vpop.f32.mrf.mxu0  ;;  %v1189_v55 = vpop.f32.mrf.mxu1  ;;  %v4868_v31 = vsel %vm4857_vm7, %v4865_v8, %v4867_v11 }
 0x113   : > { %v7835_v30 = vadd.f32 %v1685_v7, %v1290_v9  ;;  %v1294_v27 = vadd.f32 %v1189_v55, %v7714_v10  ;;  %v4285_v9 = vshrl.u32 %v7009_v62, 16  ;;  %v4273_v10 = vor.u32 %v4272_v45, %v4269_v49  ;;  %v7010_v45 = vld [vmem:[%s7259_s25 + $0x40] sm:$0xff]  }
 0x114   : > { %v6575_v13 = vpop.f32.mrf.mxu0  ;;  %6790 = vmatmul.mubr.msk.bf16.vlgmr.msra.gmra.mxu0 %vm422_vm1, %v4862_v33  ;;  %v6541_v14 = vpop.f32.mrf.mxu1  ;;  %6756 = vmatmul.mubr.msk.bf16.gmra.mxu1 %vm422_vm1, %v4256_v15  ;;  %v4294_v33 = vshrl.u32 %v7011_v57, 16  ;;  %v4866_v15 = vsel %vm4857_vm7, %v4863_v39, %v4865_v8  ;;  %v4290_v49 = vrot.slane %v4288_v51, 3  ;;  %v4869_v8 = vrot.slane %v7010_v45, 3 }
 0x115   : > { %v7841_v26 = vadd.f32 %v6575_v13, %v1295_v61  ;;  %6793 = vmatprep.mubr.msk.bf16.mxu0 %vm422_vm1, %v4864_v37  ;;  %v1299_v46 = vadd.f32 %v6541_v14, %v7729_v28  ;;  %6759 = vmatprep.mubr.msk.bf16.mxu1 %vm422_vm1, %v4265_v54  ;;  %v4297_v37 = vshll.u32 %v7011_v57, 16  ;;  %v4287_v55 = vrot.slane %v4285_v9, 2  ;;  %v7013_v57 = vld [vmem:[%s7259_s25 + $0x60] sm:$0xff]  }
 0x116   : > { %v1698_v22 = vpop.f32.mrf.mxu0  ;;  %v1202_v25 = vpop.f32.mrf.mxu1  ;;  %v4274_v42 = vsel %vm4212_vm6, %v4264_v1, %v4273_v10  ;;  %v4296_v39 = vrot.slane %v4294_v33, 2  ;;  %v4306_v33 = vshll.u32 %v7013_v57, 16  ;;  %v4870_v45 = vsel %vm4857_vm7, %v4867_v11, %v4869_v8 }
 0x117   : > { %v7848_v61 = vadd.f32 %v1698_v22, %v1293_v2  ;;  %v1297_v38 = vadd.f32 %v1202_v25, %v7735_v34  ;;  %v7015_v34 = vld [vmem:[%s7259_s25 + $0x68] sm:$0xff]   ;;  %v4299_v9 = vrot.slane %v4297_v37, 3  ;;  %v4291_v1 = vor.u32 %v4290_v49, %v4287_v55 }
 0x118   : > { %v6576_v62 = vpop.f32.mrf.mxu0  ;;  %v6542_v28 = vpop.f32.mrf.mxu1  ;;  %v4312_v37 = vshrl.u32 %v7015_v34, 16 }
 0x119   : > { %v7851_v7 = vadd.f32 %v6576_v62, %v1296_v60  ;;  %v1300_v2 = vadd.f32 %v6542_v28, %v7741_v48  ;;  %v4283_v60 = vsel %vm4212_vm6, %v4273_v10, %v4282_v59  ;;  %v4315_v62 = vshll.u32 %v7015_v34, 16 }
 0x11a   : > { %v1701_v54 = vpop.f32.mrf.mxu0  ;;  %v1205_v13 = vpop.f32.mrf.mxu1  ;;  %v4292_v49 = vsel %vm4212_vm6, %v4282_v59, %v4291_v1 }
 0x11b   : > { %v7863_v14 = vadd.f32 %v1701_v54, %v1294_v27  ;;  %v1298_v51 = vadd.f32 %v1205_v13, %v7748_v6  ;;  %v4871_v27 = vrot.slane %v7856_v23, 3  ;;  %v4303_v6 = vshrl.u32 %v7013_v57, 16  ;;  %v7883_v57 = vld [vmem:[%s7259_s25 + $0x58] sm:$0xff]  }
 0x11c   : > { %v6579_v22 = vpop.f32.mrf.mxu0  ;;  %6794 = vmatmul.mubr.msk.bf16.gmra.mxu0 %vm422_vm1, %v4866_v15  ;;  %v6545_v48 = vpop.f32.mrf.mxu1  ;;  %6760 = vmatmul.mubr.msk.bf16.gmra.mxu1 %vm422_vm1, %v4274_v42  ;;  %v4300_v15 = vor.u32 %v4299_v9, %v4296_v39  ;;  %v7017_v39 = vld [vmem:[%s7259_s25 + $0x70] sm:$0xff]  }
 0x11d   : > { %v7868_v25 = vadd.f32 %v6579_v22, %v1299_v46  ;;  %6797 = vmatprep.mubr.msk.bf16.mxu0 %vm422_vm1, %v4868_v31  ;;  %6763 = vmatprep.mubr.msk.bf16.mxu1 %vm422_vm1, %v4283_v60  ;;  %v4872_v23 = vsel %vm4857_vm7, %v4869_v8, %v4871_v27  ;;  %v7014_v31 = vld [vmem:[%s7259_s25 + $0x50] sm:$0xff]   ;;  %v4305_v13 = vrot.slane %v4303_v6, 2  ;;  %v4308_v60 = vrot.slane %v4306_v33, 3 }
 0x11e   : > { %v1714_v10 = vpop.f32.mrf.mxu0  ;;  %v1218_v28 = vpop.f32.mrf.mxu1  ;;  %v4317_v22 = vrot.slane %v4315_v62, 3  ;;  %v1303_v9 = vadd.f32 %v6545_v48, %v7614_v58  ;;  %v4301_v59 = vsel %vm4212_vm6, %v4291_v1, %v4300_v15  ;;  %v4873_v58 = vrot.slane %v7014_v31, 3  ;;  %v7018_v31 = vld [vmem:[%s7259_s25 + $0x60] sm:$0xff]  }
 0x11f   : > { %v7874_v46 = vadd.f32 %v1714_v10, %v1297_v38  ;;  %v4314_v38 = vrot.slane %v4312_v37, 2  ;;  %v1301_v8 = vadd.f32 %v1218_v28, %v7621_v0  ;;  %v4309_v1 = vor.u32 %v4308_v60, %v4305_v13 }
 0x120   : > { %v6580_v54 = vpop.f32.mrf.mxu0  ;;  %v6546_v42 = vpop.f32.mrf.mxu1  ;;  %v4321_v33 = vshrl.u32 %v7017_v39, 16  ;;  %v4324_v0 = vshll.u32 %v7017_v39, 16  ;;  %v4874_v13 = vsel %vm4857_vm7, %v4871_v27, %v4873_v58 }
 0x121   : > { %8483 = vst [vmem:[#allocation3_spill] sm:$0xff] %v7874_v46  ;;  %v7876_v55 = vadd.f32 %v6580_v54, %v1300_v2  ;;  %v7019_v54 = vld [vmem:[%s7259_s25 + $0x78] sm:$0xff]   ;;  %v4318_v6 = vor.u32 %v4317_v22, %v4314_v38  ;;  %v1304_v37 = vadd.f32 %v6546_v42, %v7625_v3  ;;  %v7909_v38 = vld [vmem:[%s7259_s25 + $0x68] sm:$0xff]   ;;  %v7021_v3 = vld [vmem:[%s7259_s25 + $0x80] sm:$0xff]   ;;  %v4310_v22 = vsel %vm4212_vm6, %v4300_v15, %v4309_v1 }
 0x122   : > { %v1717_v34 = vpop.f32.mrf.mxu0  ;;  %v1221_v2 = vpop.f32.mrf.mxu1 }
 0x123   : > { %8484 = vst [vmem:[#allocation4_spill] sm:$0xff] %v7876_v55  ;;  %v7887_v10 = vadd.f32 %v1717_v34, %v1298_v51  ;;  %v4875_v51 = vrot.slane %v7883_v57, 3  ;;  %v1302_v57 = vadd.f32 %v1221_v2, %v7635_v12  ;;  %v4319_v39 = vsel %vm4212_vm6, %v4309_v1, %v4318_v6 }
 0x124   : > { %v6583_v11 = vpop.f32.mrf.mxu0  ;;  %6798 = vmatmul.mubr.msk.bf16.gmra.mxu0 %vm422_vm1, %v4870_v45  ;;  %v6549_v55 = vpop.f32.mrf.mxu1  ;;  %6764 = vmatmul.mubr.msk.bf16.gmra.mxu1 %vm422_vm1, %v4292_v49  ;;  %v4330_v49 = vshrl.u32 %v7019_v54, 16  ;;  %v4333_v45 = vshll.u32 %v7019_v54, 16  ;;  %v4326_v54 = vrot.slane %v4324_v0, 3  ;;  %v4342_v0 = vshll.u32 %v7021_v3, 16 }
 0x125   : > { %v7893_v46 = vadd.f32 %v6583_v11, %v1303_v9  ;;  %6801 = vmatprep.mubr.msk.bf16.mxu0 %vm422_vm1, %v4872_v23  ;;  %6767 = vmatprep.mubr.msk.bf16.mxu1 %vm422_vm1, %v4301_v59  ;;  %v4876_v60 = vsel %vm4857_vm7, %v4873_v58, %v4875_v51  ;;  %v4323_v59 = vrot.slane %v4321_v33, 2  ;;  %v7023_v11 = vld [vmem:[%s7259_s25 + $0x88] sm:$0xff]   ;;  %v1307_v12 = vadd.f32 %v6549_v55, %v7642_v17 }
 0x126   : > { %v1730_v48 = vpop.f32.mrf.mxu0  ;;  %v1234_v62 = vpop.f32.mrf.mxu1  ;;  %v4335_v27 = vrot.slane %v4333_v45, 3  ;;  %v4877_v58 = vrot.slane %v7018_v31, 3  ;;  %v4879_v17 = vrot.slane %v7909_v38, 3  ;;  %v4339_v55 = vshrl.u32 %v7021_v3, 16  ;;  %v7022_v38 = vld [vmem:[%s7259_s25 + $0x70] sm:$0xff]  }
 0x127   : > { %v7900_v28 = vadd.f32 %v1730_v48, %v1301_v8  ;;  %v4332_v48 = vrot.slane %v4330_v49, 2  ;;  %v4327_v33 = vor.u32 %v4326_v54, %v4323_v59  ;;  %v4348_v49 = vshrl.u32 %v7023_v11, 16  ;;  %v7025_v54 = vld [vmem:[%s7259_s25 + $0x90] sm:$0xff]  }
 0x128   : > { %v6584_v23 = vpop.f32.mrf.mxu0  ;;  %v6550_v34 = vpop.f32.mrf.mxu1  ;;  %v4351_v45 = vshll.u32 %v7023_v11, 16  ;;  %v4880_v3 = vsel %vm4857_vm7, %v4877_v58, %v4879_v17  ;;  %v4341_v59 = vrot.slane %v4339_v55, 2  ;;  %v4344_v11 = vrot.slane %v4342_v0, 3 }
 0x129   : > { %v7904_v9 = vadd.f32 %v6584_v23, %v1304_v37  ;;  %v1305_v23 = vadd.f32 %v1234_v62, %v7649_v21  ;;  %v1308_v21 = vadd.f32 %v6550_v34, %v7653_v24  ;;  %v4328_v34 = vsel %vm4212_vm6, %v4318_v6, %v4327_v33 }
 0x12a   : > { %v1733_v42 = vpop.f32.mrf.mxu0  ;;  %v1237_v2 = vpop.f32.mrf.mxu1 }
 0x12b   : > { %8485 = vst [vmem:[#allocation5_spill] sm:$0xff] %v7904_v9  ;;  %v7916_v8 = vadd.f32 %v1733_v42, %v1302_v57  ;;  %v4336_v57 = vor.u32 %v4335_v27, %v4332_v48  ;;  %v1306_v42 = vadd.f32 %v1237_v2, %v7663_v32  ;;  %v4353_v48 = vrot.slane %v4351_v45, 3  ;;  %v7938_v27 = vld [vmem:[%s7259_s25 + $0x78] sm:$0xff]  }
 0x12c   : > { %v6587_v37 = vpop.f32.mrf.mxu0  ;;  %6802 = vmatmul.mubr.msk.bf16.gmra.mxu0 %vm422_vm1, %v4874_v13  ;;  %v6553_v9 = vpop.f32.mrf.mxu1  ;;  %6768 = vmatmul.mubr.msk.bf16.gmra.mxu1 %vm422_vm1, %v4310_v22 }
 0x12d   : > { %v7920_v15 = vadd.f32 %v6587_v37, %v1307_v12  ;;  %6805 = vmatprep.mubr.msk.bf16.mxu0 %vm422_vm1, %v4876_v60  ;;  %6771 = vmatprep.mubr.msk.bf16.mxu1 %vm422_vm1, %v4319_v39  ;;  %v4878_v60 = vsel %vm4857_vm7, %v4875_v51, %v4877_v58  ;;  %v4350_v12 = vrot.slane %v4348_v49, 2  ;;  %v1311_v51 = vadd.f32 %v6553_v9, %v7670_v36 }
 0x12e   : > { %v1746_v1 = vpop.f32.mrf.mxu0  ;;  %v1250_v62 = vpop.f32.mrf.mxu1  ;;  %v4337_v2 = vsel %vm4212_vm6, %v4327_v33, %v4336_v57  ;;  %v4881_v58 = vrot.slane %v7022_v38, 3  ;;  %v4357_v36 = vshrl.u32 %v7025_v54, 16  ;;  %v4360_v9 = vshll.u32 %v7025_v54, 16 }
 0x12f   : > { %v7927_v31 = vadd.f32 %v1746_v1, %v1305_v23  ;;  %v7027_v23 = vld [vmem:[%s7259_s25 + $0x98] sm:$0xff]   ;;  %v1309_v55 = vadd.f32 %v1250_v62, %v7677_v40  ;;  %v4345_v33 = vor.u32 %v4344_v11, %v4341_v59  ;;  %v4354_v45 = vor.u32 %v4353_v48, %v4350_v12  ;;  %v7026_v12 = vld [vmem:[%s7259_s25 + $0x80] sm:$0xff]  }
 0x130   : > { %v6588_v13 = vpop.f32.mrf.mxu0  ;;  %v6554_v22 = vpop.f32.mrf.mxu1  ;;  %v4369_v38 = vshll.u32 %v7027_v23, 16  ;;  %v4359_v59 = vrot.slane %v4357_v36, 2  ;;  %v4362_v11 = vrot.slane %v4360_v9, 3 }
 0x131   : > { %v7932_v39 = vadd.f32 %v6588_v13, %v1308_v21  ;;  %v4883_v21 = vrot.slane %v7938_v27, 3  ;;  %v1312_v13 = vadd.f32 %v6554_v22, %v7681_v43  ;;  %v4346_v43 = vsel %vm4212_vm6, %v4336_v57, %v4345_v33 }
 0x132   : > { %v1749_v24 = vpop.f32.mrf.mxu0  ;;  %v1253_v37 = vpop.f32.mrf.mxu1  ;;  %v4355_v22 = vsel %vm4212_vm6, %v4345_v33, %v4354_v45 }
 0x133   : > { %v7941_v32 = vadd.f32 %v1749_v24, %v1306_v42  ;;  %v1310_v54 = vadd.f32 %v1253_v37, %v7691_v50  ;;  %v4884_v27 = vsel %vm4857_vm7, %v4881_v58, %v4883_v21 }
 0x134   : > { %v6591_v1 = vpop.f32.mrf.mxu0  ;;  %6806 = vmatmul.mubr.msk.bf16.gmra.mxu0 %vm422_vm1, %v4878_v60  ;;  %v6557_v6 = vpop.f32.mrf.mxu1  ;;  %6772 = vmatmul.mubr.msk.bf16.gmra.mxu1 %vm422_vm1, %v4328_v34  ;;  %v4366_v60 = vshrl.u32 %v7027_v23, 16 }
 0x135   : > { %v7947_v0 = vadd.f32 %v6591_v1, %v1311_v51  ;;  %6809 = vmatprep.mubr.msk.bf16.mxu0 %vm422_vm1, %v4880_v3  ;;  %6775 = vmatprep.mubr.msk.bf16.mxu1 %vm422_vm1, %v4337_v2  ;;  %v4882_v3 = vsel %vm4857_vm7, %v4879_v17, %v4881_v58  ;;  %v7965_v51 = vld [vmem:[%s7259_s25 + $0x88] sm:$0xff]   ;;  %v7029_v2 = vld [vmem:[%s7259_s25 + $0xa0] ss:$0 sps:$4 sm:$0x77]   ;;  %v1315_v17 = vadd.f32 %v6557_v6, %v7698_v53  ;;  %v4371_v1 = vrot.slane %v4369_v38, 3 }
 0x136   : > { %v1762_v49 = vpop.f32.mrf.mxu0  ;;  %v1266_v40 = vpop.f32.mrf.mxu1  ;;  %v4368_v37 = vrot.slane %v4366_v60, 2  ;;  %v4363_v58 = vor.u32 %v4362_v11, %v4359_v59  ;;  %v4887_v33 = vrot.slane %v7965_v51, 3  ;;  %v4378_v60 = vshll.u32 %v7029_v2, 16 }
 0x137   : > { %v7954_v62 = vadd.f32 %v1762_v49, %v1309_v55  ;;  %v1313_v36 = vadd.f32 %v1266_v40, %v7705_v63  ;;  %v4885_v49 = vrot.slane %v7026_v12, 3 }
 0x138   : > { %v6592_v42 = vpop.f32.mrf.mxu0  ;;  %v6558_v24 = vpop.f32.mrf.mxu1  ;;  %v4364_v12 = vsel %vm4212_vm6, %v4354_v45, %v4363_v58  ;;  %v4380_v51 = vrot.slane %v4378_v60, 3 }
 0x139   : > { %v7958_v34 = vadd.f32 %v6592_v42, %v1312_v13  ;;  %v4375_v13 = vshrl.u32 %v7029_v2, 16  ;;  %v1316_v63 = vadd.f32 %v6558_v24, %v7709_v4  ;;  %v4372_v42 = vor.u32 %v4371_v1, %v4368_v37  ;;  %v7031_v2 = vld [vmem:[%s7259_s25 + $0x98] sm:$0xff]  }
 0x13a   : > { %v1765_v48 = vpop.f32.mrf.mxu0  ;;  %v1269_v23 = vpop.f32.mrf.mxu1 }
 0x13b   : > { %v7969_v50 = vadd.f32 %v1765_v48, %v1310_v54  ;;  %v4886_v48 = vsel %vm4857_vm7, %v4883_v21, %v4885_v49 }
 0x13c   : > { %v6595_v55 = vpop.f32.mrf.mxu0  ;;  %6810 = vmatmul.mubr.msk.bf16.gmra.mxu0 %vm422_vm1, %v4882_v3  ;;  %v6601_v9 = vpop.f32.mrf.mxu1  ;;  %6776 = vmatmul.mubr.msk.bf16.gmra.mxu1 %vm422_vm1, %v4346_v43  ;;  %v7030_v43 = vld [vmem:[%s7259_s25 + $0x90] sm:$0xff]  }
 0x13d   : > { %v7973_v57 = vadd.f32 %v6595_v55, %v1315_v17  ;;  %6813 = vmatprep.mubr.msk.bf16.mxu0 %vm422_vm1, %v4884_v27  ;;  %v2306_v53 = vadd.f32 %v6601_v9, %v7759_v29  ;;  %6779 = vmatprep.mubr.msk.bf16.mxu1 %vm422_vm1, %v4355_v22  ;;  %v1314_v29 = vadd.f32 %v1269_v23, %v7722_v20  ;;  %v4377_v27 = vrot.slane %v4375_v13, 2 }
 0x13e   : > { %v1778_v6 = vpop.f32.mrf.mxu0  ;;  %v2161_v38 = vpop.f32.mrf.mxu1  ;;  %v4888_v22 = vsel %vm4857_vm7, %v4885_v49, %v4887_v33  ;;  %v4373_v20 = vsel %vm4212_vm6, %v4363_v58, %v4372_v42  ;;  %v4891_v9 = vrot.slane %v7031_v2, 3 }
 0x13f   : > { %v7981_v40 = vadd.f32 %v1778_v6, %v1313_v36  ;;  %v2304_v3 = vadd.f32 %v2161_v38, %v7766_v56  ;;  %v4381_v36 = vor.u32 %v4380_v51, %v4377_v27 }
 0x140   : > { %v6596_v54 = vpop.f32.mrf.mxu0  ;;  %v6602_v11 = vpop.f32.mrf.mxu1 }
 0x141   : > { %v7985_v59 = vadd.f32 %v6596_v54, %v1316_v63  ;;  %v2307_v4 = vadd.f32 %v6602_v11, %v7770_v19  ;;  %v4889_v19 = vrot.slane %v7030_v43, 3  ;;  %v7032_v63 = vld [vmem:[%s7259_s25 + $0xa0] ss:$0 sps:$4 sm:$0x77]   ;;  %v4382_v54 = vsel %vm4212_vm6, %v4372_v42, %v4381_v36 }
 0x142   : > { %v1781_v24 = vpop.f32.mrf.mxu0  ;;  %v2164_v17 = vpop.f32.mrf.mxu1 }
 0x143   : > { %v7993_v56 = vadd.f32 %v1781_v24, %v1314_v29  ;;  %v2305_v23 = vadd.f32 %v2164_v17, %v7781_v41  ;;  %v4890_v60 = vsel %vm4857_vm7, %v4887_v33, %v4889_v19  ;;  %v4892_v29 = vsel %vm4857_vm7, %v4889_v19, %v4891_v9 }
 0x144   : > { %v6639_v37 = vpop.f32.mrf.mxu0  ;;  %6814 = vmatmul.mubr.msk.bf16.gmra.mxu0 %vm422_vm1, %v4886_v48  ;;  %v6605_v45 = vpop.f32.mrf.mxu1  ;;  %6780 = vmatmul.mubr.msk.bf16.gmra.mxu1 %vm422_vm1, %v4364_v12 }
 0x145   : > { %v7998_v21 = vadd.f32 %v6639_v37, %v2306_v53  ;;  %6817 = vmatprep.mubr.msk.bf16.mxu0 %vm422_vm1, %v4888_v22  ;;  %v2310_v1 = vadd.f32 %v6605_v45, %v7787_v44  ;;  %6783 = vmatprep.mubr.msk.bf16.mxu1 %vm422_vm1, %v4373_v20 }
 0x146   : > { %v2806_v55 = vpop.f32.mrf.mxu0  ;;  %v2177_v41 = vpop.f32.mrf.mxu1 }
 0x147   : > { %v8004_v58 = vadd.f32 %v2806_v55, %v2304_v3  ;;  %v2308_v49 = vadd.f32 %v2177_v41, %v7794_v16 }
 0x148   : > { %v6640_v53 = vpop.f32.mrf.mxu0  ;;  %v6606_v6 = vpop.f32.mrf.mxu1 }
 0x149   : > { %v8007_v13 = vadd.f32 %v6640_v53, %v2307_v4  ;;  %v2311_v38 = vadd.f32 %v6606_v6, %v7797_v35  ;;  %v4893_v35 = vrot.slane %v7032_v63, 3 }
 0x14a   : > { %v2809_v44 = vpop.f32.mrf.mxu0  ;;  %v2180_v11 = vpop.f32.mrf.mxu1 }
 0x14b   : > { %v8014_v12 = vadd.f32 %v2809_v44, %v2305_v23  ;;  %v2309_v3 = vadd.f32 %v2180_v11, %v7808_v18  ;;  %v4894_v2 = vsel %vm4857_vm7, %v4891_v9, %v4893_v35 }
 0x14c   : > { %v6643_v16 = vpop.f32.mrf.mxu0  ;;  %6818 = vmatmul.mubr.msk.bf16.gmra.mxu0 %vm422_vm1, %v4890_v60  ;;  %v6609_v48 = vpop.f32.mrf.mxu1  ;;  %6784 = vmatmul.mubr.msk.bf16.gmra.mxu1 %vm422_vm1, %v4382_v54 }
 0x14d   : > { %v8018_v43 = vadd.f32 %v6643_v16, %v2310_v1  ;;  %6821 = vmatprep.mubr.msk.bf16.mxu0 %vm422_vm1, %v4892_v29  ;;  %v2314_v33 = vadd.f32 %v6609_v48, %v7814_v47  ;;  %v8486_v16 = vld [vmem:[#allocation3_spill] sm:$0xff] }
 0x14e   : > { %v2822_v42 = vpop.f32.mrf.mxu0  ;;  %v2193_v4 = vpop.f32.mrf.mxu1 }
 0x14f   : > { %v8023_v24 = vadd.f32 %v2822_v42, %v2308_v49  ;;  %v2312_v22 = vadd.f32 %v2193_v4, %v7821_v5  ;;  %v8487_v42 = vld [vmem:[#allocation4_spill] sm:$0xff] }
 0x150   : > { %v6644_v18 = vpop.f32.mrf.mxu0  ;;  %v6610_v27 = vpop.f32.mrf.mxu1 }
 0x151   : > { %v8026_v51 = vadd.f32 %v6644_v18, %v2311_v38  ;;  %v2315_v17 = vadd.f32 %v6610_v27, %v7824_v52 }
 0x152   : > { %v2825_v20 = vpop.f32.mrf.mxu0  ;;  %v2196_v23 = vpop.f32.mrf.mxu1 }
 0x153   : > { %v8030_v37 = vadd.f32 %v2825_v20, %v2309_v3  ;;  %v2313_v47 = vadd.f32 %v2196_v23, %v7835_v30 }
 0x154   : > { %v6647_v45 = vpop.f32.mrf.mxu0  ;;  %6822 = vmatmul.mubr.msk.bf16.gmra.mxu0 %vm422_vm1, %v4894_v2  ;;  %v6613_v19 = vpop.f32.mrf.mxu1 }
 0x155   : > { %v8034_v1 = vadd.f32 %v6647_v45, %v2314_v33  ;;  %v2318_v5 = vadd.f32 %v6613_v19, %v7841_v26 }
 0x156   : > { %v2838_v55 = vpop.f32.mrf.mxu0  ;;  %v2209_v36 = vpop.f32.mrf.mxu1 }
 0x157   : > { %v8037_v41 = vadd.f32 %v2838_v55, %v2312_v22  ;;  %v2316_v52 = vadd.f32 %v2209_v36, %v7848_v61 }
 0x158   : > { %v6648_v9 = vpop.f32.mrf.mxu0  ;;  %v6614_v49 = vpop.f32.mrf.mxu1 }
 0x159   : > { %v8040_v53 = vadd.f32 %v6648_v9, %v2315_v17  ;;  %v2319_v30 = vadd.f32 %v6614_v49, %v7851_v7 }
 0x15a   : > { %v2841_v6 = vpop.f32.mrf.mxu0  ;;  %v2212_v60 = vpop.f32.mrf.mxu1 }
 0x15b   : > { %v8043_v63 = vadd.f32 %v2841_v6, %v2313_v47  ;;  %v2317_v38 = vadd.f32 %v2212_v60, %v7863_v14 }
 0x15c   : > { %v6651_v44 = vpop.f32.mrf.mxu0  ;;  %v6617_v26 = vpop.f32.mrf.mxu1 }
 0x15d   : > { %v8046_v54 = vadd.f32 %v6651_v44, %v2318_v5  ;;  %v2322_v29 = vadd.f32 %v6617_v26, %v7868_v25 }
 0x15e   : > { %v2854_v11 = vpop.f32.mrf.mxu0  ;;  %v2225_v61 = vpop.f32.mrf.mxu1 }
 0x15f   : > { %v8049_v3 = vadd.f32 %v2854_v11, %v2316_v52  ;;  %v2320_v48 = vadd.f32 %v2225_v61, %v8486_v16  ;;  %v8488_v52 = vld [vmem:[#allocation5_spill] sm:$0xff] }
 0x160   : > { %v6652_v35 = vpop.f32.mrf.mxu0  ;;  %v6618_v7 = vpop.f32.mrf.mxu1 }
 0x161   : > { %v8052_v33 = vadd.f32 %v6652_v35, %v2319_v30  ;;  %v2323_v4 = vadd.f32 %v6618_v7, %v8487_v42 }
 0x162   : > { %v2857_v22 = vpop.f32.mrf.mxu0  ;;  %v2228_v14 = vpop.f32.mrf.mxu1 }
 0x163   : > { %v8055_v18 = vadd.f32 %v2857_v22, %v2317_v38  ;;  %v2321_v27 = vadd.f32 %v2228_v14, %v7887_v10 }
 0x164   : > { %v6655_v2 = vpop.f32.mrf.mxu0  ;;  %v6621_v25 = vpop.f32.mrf.mxu1 }
 0x165   : > { %v8058_v17 = vadd.f32 %v6655_v2, %v2322_v29  ;;  %v2326_v20 = vadd.f32 %v6621_v25, %v7893_v46 }
 0x166   : > { %v2870_v23 = vpop.f32.mrf.mxu0  ;;  %v2241_v47 = vpop.f32.mrf.mxu1 }
 0x167   : > { %v8061_v45 = vadd.f32 %v2870_v23, %v2320_v48  ;;  %v2324_v19 = vadd.f32 %v2241_v47, %v7900_v28 }
 0x168   : > { %v6656_v5 = vpop.f32.mrf.mxu0  ;;  %v6622_v55 = vpop.f32.mrf.mxu1 }
 0x169   : > { %v8064_v36 = vadd.f32 %v6656_v5, %v2323_v4  ;;  %v2327_v9 = vadd.f32 %v6622_v55, %v8488_v52 }
 0x16a   : > { %v2873_v49 = vpop.f32.mrf.mxu0  ;;  %v2244_v10 = vpop.f32.mrf.mxu1 }
 0x16b   : > { %v8067_v30 = vadd.f32 %v2873_v49, %v2321_v27  ;;  %v2325_v6 = vadd.f32 %v2244_v10, %v7916_v8 }
 0x16c   : > { %v6659_v60 = vpop.f32.mrf.mxu0  ;;  %v6625_v46 = vpop.f32.mrf.mxu1 }
 0x16d   : > { %v8070_v38 = vadd.f32 %v6659_v60, %v2326_v20  ;;  %v2330_v44 = vadd.f32 %v6625_v46, %v7920_v15 }
 0x16e   : > { %v2886_v26 = vpop.f32.mrf.mxu0  ;;  %v2257_v28 = vpop.f32.mrf.mxu1 }
 0x16f   : > { %v8073_v29 = vadd.f32 %v2886_v26, %v2324_v19  ;;  %v2328_v11 = vadd.f32 %v2257_v28, %v7927_v31 }
 0x170   : > { %v6660_v61 = vpop.f32.mrf.mxu0  ;;  %v6626_v16 = vpop.f32.mrf.mxu1 }
 0x171   : > { %v8076_v48 = vadd.f32 %v6660_v61, %v2327_v9  ;;  %v2331_v35 = vadd.f32 %v6626_v16, %v7932_v39 }
 0x172   : > { %v2889_v7 = vpop.f32.mrf.mxu0  ;;  %v2260_v8 = vpop.f32.mrf.mxu1 }
 0x173   : > { %v8079_v42 = vadd.f32 %v2889_v7, %v2325_v6  ;;  %v2329_v4 = vadd.f32 %v2260_v8, %v7941_v32 }
 0x174   : > { %v6663_v22 = vpop.f32.mrf.mxu0  ;;  %v6629_v15 = vpop.f32.mrf.mxu1 }
 0x175   : > { %v8082_v14 = vadd.f32 %v6663_v22, %v2330_v44  ;;  %v2334_v27 = vadd.f32 %v6629_v15, %v7947_v0 }
 0x176   : > { %v2902_v2 = vpop.f32.mrf.mxu0  ;;  %v2273_v31 = vpop.f32.mrf.mxu1 }
 0x177   : > { %v8085_v25 = vadd.f32 %v2902_v2, %v2328_v11  ;;  %v2332_v20 = vadd.f32 %v2273_v31, %v7954_v62 }
 0x178   : > { %v6664_v23 = vpop.f32.mrf.mxu0  ;;  %v6630_v39 = vpop.f32.mrf.mxu1 }
 0x179   : > { %v8088_v47 = vadd.f32 %v6664_v23, %v2331_v35  ;;  %v2335_v19 = vadd.f32 %v6630_v39, %v7958_v34 }
 0x17a   : > { %v2905_v5 = vpop.f32.mrf.mxu0  ;;  %v2276_v32 = vpop.f32.mrf.mxu1 }
 0x17b   : > { %v8091_v55 = vadd.f32 %v2905_v5, %v2329_v4  ;;  %v2333_v52 = vadd.f32 %v2276_v32, %v7969_v50 }
 0x17c   : > { %v6667_v9 = vpop.f32.mrf.mxu0  ;;  %v6633_v0 = vpop.f32.mrf.mxu1 }
 0x17d   : > { %v8094_v49 = vadd.f32 %v6667_v9, %v2334_v27  ;;  %v2338_v10 = vadd.f32 %v6633_v0, %v7973_v57 }
 0x17e   : > { %v2918_v6 = vpop.f32.mrf.mxu0  ;;  %v2289_v62 = vpop.f32.mrf.mxu1 }
 0x17f   : > { %v8097_v60 = vadd.f32 %v2918_v6, %v2332_v20  ;;  %v2336_v46 = vadd.f32 %v2289_v62, %v7981_v40 }
 0x180   : > { %v6668_v44 = vpop.f32.mrf.mxu0  ;;  %v6634_v34 = vpop.f32.mrf.mxu1 }
 0x181   : > { %v8100_v26 = vadd.f32 %v6668_v44, %v2335_v19  ;;  %v2339_v28 = vadd.f32 %v6634_v34, %v7985_v59 }
 0x182   : > { %v2921_v11 = vpop.f32.mrf.mxu0  ;;  %v2292_v50 = vpop.f32.mrf.mxu1 }
 0x183   : > { %v8103_v61 = vadd.f32 %v2921_v11, %v2333_v52  ;;  %v2337_v16 = vadd.f32 %v2292_v50, %v7993_v56 }
 0x184   : > { %v6671_v35 = vpop.f32.mrf.mxu0  ;;  %v6677_v7 = vpop.f32.mrf.mxu1 }
 0x185   : > { %v8106_v57 = vadd.f32 %v6671_v35, %v2338_v10  ;;  %v3463_v8 = vadd.f32 %v6677_v7, %v7998_v21 }
 0x186   : > { %v2934_v4 = vpop.f32.mrf.mxu0  ;;  %v3318_v22 = vpop.f32.mrf.mxu1 }
 0x187   : > { %v8109_v40 = vadd.f32 %v2934_v4, %v2336_v46  ;;  %v3461_v15 = vadd.f32 %v3318_v22, %v8004_v58 }
 0x188   : > { %v6672_v27 = vpop.f32.mrf.mxu0  ;;  %v6678_v2 = vpop.f32.mrf.mxu1 }
 0x189   : > { %v8112_v59 = vadd.f32 %v6672_v27, %v2339_v28  ;;  %v3464_v31 = vadd.f32 %v6678_v2, %v8007_v13 }
 0x18a   : > { %v2937_v20 = vpop.f32.mrf.mxu0  ;;  %v3321_v23 = vpop.f32.mrf.mxu1 }
 0x18b   : > { %v8115_v56 = vadd.f32 %v2937_v20, %v2337_v16  ;;  %v3462_v39 = vadd.f32 %v3321_v23, %v8014_v12 }
 0x18c   : > { %v6715_v19 = vpop.f32.mrf.mxu0  ;;  %v6681_v21 = vpop.f32.mrf.mxu1 }
 0x18d   : > { %v8118_v5 = vadd.f32 %v6715_v19, %v3463_v8  ;;  %v3467_v32 = vadd.f32 %v6681_v21, %v8018_v43 }
 0x18e   : > { %v3829_v52 = vpop.f32.mrf.mxu0  ;;  %v3334_v58 = vpop.f32.mrf.mxu1 }
 0x18f   : > { %v8121_v9 = vadd.f32 %v3829_v52, %v3461_v15  ;;  %v3465_v0 = vadd.f32 %v3334_v58, %v8023_v24 }
 0x190   : > { %v6716_v10 = vpop.f32.mrf.mxu0  ;;  %v6682_v13 = vpop.f32.mrf.mxu1 }
 0x191   : > { %v8124_v6 = vadd.f32 %v6716_v10, %v3464_v31  ;;  %v3468_v62 = vadd.f32 %v6682_v13, %v8026_v51 }
 0x192   : > { %v3832_v46 = vpop.f32.mrf.mxu0  ;;  %v3337_v12 = vpop.f32.mrf.mxu1 }
 0x193   : > { %v8127_v44 = vadd.f32 %v3832_v46, %v3462_v39  ;;  %v3466_v34 = vadd.f32 %v3337_v12, %v8030_v37 }
 0x194   : > { %v6719_v28 = vpop.f32.mrf.mxu0  ;;  %v6685_v43 = vpop.f32.mrf.mxu1 }
 0x195   : > { %v8130_v11 = vadd.f32 %v6719_v28, %v3467_v32  ;;  %v3471_v50 = vadd.f32 %v6685_v43, %v8034_v1 }
 0x196   : > { %v3845_v16 = vpop.f32.mrf.mxu0  ;;  %v3350_v24 = vpop.f32.mrf.mxu1 }
 0x197   : > { %v8133_v35 = vadd.f32 %v3845_v16, %v3465_v0  ;;  %v3469_v7 = vadd.f32 %v3350_v24, %v8037_v41 }
 0x198   : > { %v6720_v8 = vpop.f32.mrf.mxu0  ;;  %v6686_v51 = vpop.f32.mrf.mxu1 }
 0x199   : > { %v8136_v4 = vadd.f32 %v6720_v8, %v3468_v62  ;;  %v3472_v22 = vadd.f32 %v6686_v51, %v8040_v53 }
 0x19a   : > { %v3848_v15 = vpop.f32.mrf.mxu0  ;;  %v3353_v37 = vpop.f32.mrf.mxu1 }
 0x19b   : > { %v8139_v27 = vadd.f32 %v3848_v15, %v3466_v34  ;;  %v3470_v2 = vadd.f32 %v3353_v37, %v8043_v63 }
 0x19c   : > { %v6723_v31 = vpop.f32.mrf.mxu0  ;;  %v6689_v1 = vpop.f32.mrf.mxu1 }
 0x19d   : > { %v8142_v20 = vadd.f32 %v6723_v31, %v3471_v50  ;;  %v3475_v23 = vadd.f32 %v6689_v1, %v8046_v54 }
 0x19e   : > { %v3861_v39 = vpop.f32.mrf.mxu0  ;;  %v3366_v41 = vpop.f32.mrf.mxu1 }
 0x19f   : > { %v8145_v19 = vadd.f32 %v3861_v39, %v3469_v7  ;;  %v3473_v21 = vadd.f32 %v3366_v41, %v8049_v3 }
 0x1a0   : > { %v6724_v32 = vpop.f32.mrf.mxu0  ;;  %v6690_v53 = vpop.f32.mrf.mxu1 }
 0x1a1   : > { %v8148_v52 = vadd.f32 %v6724_v32, %v3472_v22  ;;  %v3476_v58 = vadd.f32 %v6690_v53, %v8052_v33 }
 0x1a2   : > { %v3864_v0 = vpop.f32.mrf.mxu0  ;;  %v3369_v63 = vpop.f32.mrf.mxu1 }
 0x1a3   : > { %v8151_v10 = vadd.f32 %v3864_v0, %v3470_v2  ;;  %v3474_v13 = vadd.f32 %v3369_v63, %v8055_v18 }
 0x1a4   : > { %v6727_v62 = vpop.f32.mrf.mxu0  ;;  %v6693_v54 = vpop.f32.mrf.mxu1 }
 0x1a5   : > { %v8154_v46 = vadd.f32 %v6727_v62, %v3475_v23  ;;  %v3479_v12 = vadd.f32 %v6693_v54, %v8058_v17 }
 0x1a6   : > { %v3877_v34 = vpop.f32.mrf.mxu0  ;;  %v3382_v3 = vpop.f32.mrf.mxu1 }
 0x1a7   : > { %v8157_v28 = vadd.f32 %v3877_v34, %v3473_v21  ;;  %v3477_v43 = vadd.f32 %v3382_v3, %v8061_v45 }
 0x1a8   : > { %v6728_v50 = vpop.f32.mrf.mxu0  ;;  %v6694_v33 = vpop.f32.mrf.mxu1 }
 0x1a9   : > { %v8160_v16 = vadd.f32 %v6728_v50, %v3476_v58  ;;  %v3480_v24 = vadd.f32 %v6694_v33, %v8064_v36 }
 0x1aa   : > { %v3880_v7 = vpop.f32.mrf.mxu0  ;;  %v3385_v18 = vpop.f32.mrf.mxu1 }
 0x1ab   : > { %v8163_v8 = vadd.f32 %v3880_v7, %v3474_v13  ;;  %v3478_v51 = vadd.f32 %v3385_v18, %v8067_v30 }
 0x1ac   : > { %v6731_v22 = vpop.f32.mrf.mxu0  ;;  %v6697_v17 = vpop.f32.mrf.mxu1 }
 0x1ad   : > { %v8166_v15 = vadd.f32 %v6731_v22, %v3479_v12  ;;  %v3483_v37 = vadd.f32 %v6697_v17, %v8070_v38 }
 0x1ae   : > { %v3893_v2 = vpop.f32.mrf.mxu0  ;;  %v3398_v45 = vpop.f32.mrf.mxu1 }
 0x1af   : > { %v8169_v31 = vadd.f32 %v3893_v2, %v3477_v43  ;;  %v3481_v1 = vadd.f32 %v3398_v45, %v8073_v29 }
 0x1b0   : > { %v6732_v23 = vpop.f32.mrf.mxu0  ;;  %v6698_v36 = vpop.f32.mrf.mxu1 }
 0x1b1   : > { %v8172_v39 = vadd.f32 %v6732_v23, %v3480_v24  ;;  %v3484_v41 = vadd.f32 %v6698_v36, %v8076_v48 }
 0x1b2   : > { %v3896_v21 = vpop.f32.mrf.mxu0  ;;  %v3401_v30 = vpop.f32.mrf.mxu1 }
 0x1b3   : > { %v8175_v32 = vadd.f32 %v3896_v21, %v3478_v51  ;;  %v3482_v53 = vadd.f32 %v3401_v30, %v8079_v42 }
 0x1b4   : > { %v6735_v58 = vpop.f32.mrf.mxu0  ;;  %v6701_v38 = vpop.f32.mrf.mxu1 }
 0x1b5   : > { %v8178_v0 = vadd.f32 %v6735_v58, %v3483_v37  ;;  %v3487_v63 = vadd.f32 %v6701_v38, %v8082_v14 }
 0x1b6   : > { %v3909_v13 = vpop.f32.mrf.mxu0  ;;  %v3414_v29 = vpop.f32.mrf.mxu1 }
 0x1b7   : > { %v8181_v62 = vadd.f32 %v3909_v13, %v3481_v1  ;;  %v3485_v54 = vadd.f32 %v3414_v29, %v8085_v25 }
 0x1b8   : > { %v6736_v12 = vpop.f32.mrf.mxu0  ;;  %v6702_v48 = vpop.f32.mrf.mxu1 }
 0x1b9   : > { %v8184_v34 = vadd.f32 %v6736_v12, %v3484_v41  ;;  %v3488_v3 = vadd.f32 %v6702_v48, %v8088_v47 }
 0x1ba   : > { %v3912_v43 = vpop.f32.mrf.mxu0  ;;  %v3417_v42 = vpop.f32.mrf.mxu1 }
 0x1bb   : > { %v8187_v50 = vadd.f32 %v3912_v43, %v3482_v53  ;;  %v3486_v33 = vadd.f32 %v3417_v42, %v8091_v55 }
 0x1bc   : > { %v6739_v24 = vpop.f32.mrf.mxu0  ;;  %v6705_v14 = vpop.f32.mrf.mxu1 }
 0x1bd   : > { %v8190_v7 = vadd.f32 %v6739_v24, %v3487_v63  ;;  %v3491_v18 = vadd.f32 %v6705_v14, %v8094_v49 }
 0x1be   : > { %v3925_v51 = vpop.f32.mrf.mxu0  ;;  %v3430_v25 = vpop.f32.mrf.mxu1 }
 0x1bf   : > { %v8193_v22 = vadd.f32 %v3925_v51, %v3485_v54  ;;  %v3489_v17 = vadd.f32 %v3430_v25, %v8097_v60 }
 0x1c0   : > { %v6740_v37 = vpop.f32.mrf.mxu0  ;;  %v6706_v47 = vpop.f32.mrf.mxu1 }
 0x1c1   : > { %v8196_v2 = vadd.f32 %v6740_v37, %v3488_v3  ;;  %v3492_v45 = vadd.f32 %v6706_v47, %v8100_v26 }
 0x1c2   : > { %v3928_v1 = vpop.f32.mrf.mxu0  ;;  %v3433_v55 = vpop.f32.mrf.mxu1 }
 0x1c3   : > { %v8199_v23 = vadd.f32 %v3928_v1, %v3486_v33  ;;  %v3490_v36 = vadd.f32 %v3433_v55, %v8103_v61 }
 0x1c4   : > { %v6743_v41 = vpop.f32.mrf.mxu0  ;;  %v6709_v49 = vpop.f32.mrf.mxu1 }
 0x1c5   : > { %v8202_v21 = vadd.f32 %v6743_v41, %v3491_v18  ;;  %v3495_v30 = vadd.f32 %v6709_v49, %v8106_v57 }
 0x1c6   : > { %v3941_v53 = vpop.f32.mrf.mxu0  ;;  %v3446_v60 = vpop.f32.mrf.mxu1 }
 0x1c7   : > { %v8205_v58 = vadd.f32 %v3941_v53, %v3489_v17  ;;  %v3493_v38 = vadd.f32 %v3446_v60, %v8109_v40 }
 0x1c8   : > { %v6744_v63 = vpop.f32.mrf.mxu0  ;;  %v6710_v26 = vpop.f32.mrf.mxu1 }
 0x1c9   : > { %v8208_v13 = vadd.f32 %v6744_v63, %v3492_v45  ;;  %v3496_v29 = vadd.f32 %v6710_v26, %v8112_v59 }
 0x1ca   : > { %v3944_v54 = vpop.f32.mrf.mxu0  ;;  %v3449_v61 = vpop.f32.mrf.mxu1 }
 0x1cb   : > { %v8211_v12 = vadd.f32 %v3944_v54, %v3490_v36  ;;  %v3494_v48 = vadd.f32 %v3449_v61, %v8115_v56  ;;  %v8226_v56 = vld [vmem:[%s8481_s2] ss:$0 sm:$0xff] }
 0x1cc   : > { %v6747_v3 = vpop.f32.mrf.mxu0  ;;  %v6753_v43 = vpop.f32.mrf.mxu1 }
 0x1cd   : > { %v8214_v57 = vadd.f32 %v6747_v3, %v3495_v30  ;;  %v4619_v59 = vadd.f32 %v6753_v43, %v8118_v5 }
 0x1ce   : > { %v3957_v42 = vpop.f32.mrf.mxu0  ;;  %v4474_v40 = vpop.f32.mrf.mxu1 }
 0x1cf   : > { %v8216_v33 = vadd.f32 %v3957_v42, %v3493_v38  ;;  %v4617_v47 = vadd.f32 %v4474_v40, %v8121_v9 }
 0x1d0   : > { %v6748_v24 = vpop.f32.mrf.mxu0  ;;  %v6754_v18 = vpop.f32.mrf.mxu1 }
 0x1d1   : > { %v8218_v14 = vadd.f32 %v6748_v24, %v3496_v29  ;;  %v4620_v36 = vadd.f32 %v6754_v18, %v8124_v6 }
 0x1d2   : > { %v3960_v51 = vpop.f32.mrf.mxu0  ;;  %v4477_v17 = vpop.f32.mrf.mxu1 }
 0x1d3   : > { %v8221_v25 = vadd.f32 %v3960_v51, %v3494_v48  ;;  %v4618_v53 = vadd.f32 %v4477_v17, %v8127_v44 }
 0x1d4   : > { %v6791_v37 = vpop.f32.mrf.mxu0  ;;  %v6757_v45 = vpop.f32.mrf.mxu1 }
 0x1d5   : > { %v5131_v1 = vadd.f32 %v6791_v37, %v4619_v59  ;;  %v4623_v3 = vadd.f32 %v6757_v45, %v8130_v11 }
 0x1d6   : > { %v4986_v55 = vpop.f32.mrf.mxu0  ;;  %v4490_v5 = vpop.f32.mrf.mxu1 }
 0x1d7   : > { %v8231_v41 = vadd.f32 %v8226_v56, %v5131_v1  ;;  %v5129_v49 = vadd.f32 %v4986_v55, %v4617_v47  ;;  %v4621_v44 = vadd.f32 %v4490_v5, %v8133_v35 }
 0x1d8   : > { %v6792_v30 = vpop.f32.mrf.mxu0  ;;  %v6758_v63 = vpop.f32.mrf.mxu1 }
 0x1d9   : > { %v5282_v60 = vsub.f32 0.0, %v8231_v41  ;;  %v8236_v38 = vadd.f32 %v8226_v56, %v5129_v49  ;;  %v5132_v9 = vadd.f32 %v6792_v30, %v4620_v36  ;;  %v4624_v51 = vadd.f32 %v6758_v63, %v8136_v4 }
 0x1da   : > { %v4989_v26 = vpop.f32.mrf.mxu0  ;;  %v4493_v61 = vpop.f32.mrf.mxu1 }
 0x1db   : > { %v5320_v29 = vmul.f32 1.442695, %v5282_v60  ;;  %v5280_v54 = vsub.f32 0.0, %v8236_v38  ;;  %v8240_v6 = vadd.f32 %v8226_v56, %v5132_v9  ;;  %v5130_v48 = vadd.f32 %v4989_v26, %v4618_v53 }
 0x1dc   : > { %v6795_v43 = vpop.f32.mrf.mxu0  ;;  %v6761_v18 = vpop.f32.mrf.mxu1  ;;  %v4622_v35 = vadd.f32 %v4493_v61, %v8139_v27 }
 0x1dd   : > { %7033 = vpow2.f32 %v5320_v29  ;;  %v5316_v42 = vmul.f32 1.442695, %v5280_v54  ;;  %v5283_v40 = vsub.f32 0.0, %v8240_v6  ;;  %v8246_v24 = vadd.f32 %v8226_v56, %v5130_v48 }
 0x1de   : > { %v5135_v59 = vadd.f32 %v6795_v43, %v4623_v3  ;;  %v5002_v17 = vpop.f32.mrf.mxu0  ;;  %v4506_v11 = vpop.f32.mrf.mxu1  ;;  %v4627_v30 = vadd.f32 %v6761_v18, %v8142_v20 }
 0x1df   : > { %7035 = vpow2.f32 %v5316_v42  ;;  %v5322_v37 = vmul.f32 1.442695, %v5283_v40  ;;  %v5281_v47 = vsub.f32 0.0, %v8246_v24  ;;  %v5133_v45 = vadd.f32 %v5002_v17, %v4621_v44 }
 0x1e0   : > { %v8252_v1 = vadd.f32 %v8226_v56, %v5135_v59  ;;  %v6796_v55 = vpop.f32.mrf.mxu0  ;;  %v6762_v4 = vpop.f32.mrf.mxu1  ;;  %v4625_v43 = vadd.f32 %v4506_v11, %v8145_v19 }
 0x1e1   : > { %7037 = vpow2.f32 %v5322_v37  ;;  %v5318_v36 = vmul.f32 1.442695, %v5281_v47  ;;  %v8255_v5 = vadd.f32 %v8226_v56, %v5133_v45  ;;  %v5136_v49 = vadd.f32 %v6796_v55, %v4624_v51 }
 0x1e2   : > { %v5286_v53 = vsub.f32 0.0, %v8252_v1  ;;  %v5005_v60 = vpop.f32.mrf.mxu0  ;;  %v4509_v9 = vpop.f32.mrf.mxu1  ;;  %v4628_v42 = vadd.f32 %v6762_v4, %v8148_v52 }
 0x1e3   : > { %7039 = vpow2.f32 %v5318_v36  ;;  %v5284_v63 = vsub.f32 0.0, %v8255_v5  ;;  %v8261_v27 = vadd.f32 %v8226_v56, %v5136_v49  ;;  %v5134_v26 = vadd.f32 %v5005_v60, %v4622_v35 }
 0x1e4   : > { %v5328_v29 = vmul.f32 1.442695, %v5286_v53  ;;  %v6799_v54 = vpop.f32.mrf.mxu0  ;;  %v6765_v20 = vpop.f32.mrf.mxu1  ;;  %v4626_v52 = vadd.f32 %v4509_v9, %v8151_v10 }
 0x1e5   : > { %v5324_v61 = vmul.f32 1.442695, %v5284_v63  ;;  %v5287_v48 = vsub.f32 0.0, %v8261_v27  ;;  %v8265_v3 = vadd.f32 %v8226_v56, %v5134_v26  ;;  %v5139_v44 = vadd.f32 %v6799_v54, %v4627_v30 }
 0x1e6   : > { %7041 = vpow2.f32 %v5328_v29  ;;  %v5018_v40 = vpop.f32.mrf.mxu0  ;;  %v4522_v17 = vpop.f32.mrf.mxu1  ;;  %v4631_v11 = vadd.f32 %v6765_v20, %v8154_v46 }
 0x1e7   : > { %7043 = vpow2.f32 %v5324_v61  ;;  %v5330_v18 = vmul.f32 1.442695, %v5287_v48  ;;  %v5285_v51 = vsub.f32 0.0, %v8265_v3  ;;  %v8271_v59 = vadd.f32 %v8226_v56, %v5139_v44 }
 0x1e8   : > { %v5137_v37 = vadd.f32 %v5018_v40, %v4625_v43  ;;  %v6800_v47 = vpop.f32.mrf.mxu0  ;;  %v6766_v55 = vpop.f32.mrf.mxu1  ;;  %v4629_v29 = vadd.f32 %v4522_v17, %v8157_v28 }
 0x1e9   : > { %7045 = vpow2.f32 %v5330_v18  ;;  %v5326_v45 = vmul.f32 1.442695, %v5285_v51  ;;  %v5290_v35 = vsub.f32 0.0, %v8271_v59  ;;  %v5140_v36 = vadd.f32 %v6800_v47, %v4628_v42 }
 0x1ea   : > { %v7034_v19 = vpop.eup %7033  ;;  %v8277_v4 = vadd.f32 %v8226_v56, %v5137_v37  ;;  %v5021_v49 = vpop.f32.mrf.mxu0  ;;  %v4632_v10 = vadd.f32 %v6766_v55, %v8160_v16 }
 0x1eb   : > { %v5390_v30 = vadd.f32 1.0, %v7034_v19  ;;  %7047 = vpow2.f32 %v5326_v45  ;;  %v5336_v53 = vmul.f32 1.442695, %v5290_v35  ;;  %v8280_v60 = vadd.f32 %v8226_v56, %v5140_v36  ;;  %v4525_v63 = vpop.f32.mrf.mxu1 }
 0x1ec   : > { %v7036_v26 = vpop.eup %7035  ;;  %v5288_v54 = vsub.f32 0.0, %v8277_v4  ;;  %v5138_v9 = vadd.f32 %v5021_v49, %v4626_v52  ;;  %v6803_v46 = vpop.f32.mrf.mxu0  ;;  %v4630_v40 = vadd.f32 %v4525_v63, %v8163_v8 }
 0x1ed   : > { %7049 = vrcp.f32 %v5390_v30  ;;  %v5388_v61 = vadd.f32 1.0, %v7036_v26  ;;  %v5291_v48 = vsub.f32 0.0, %v8280_v60  ;;  %v6769_v20 = vpop.f32.mrf.mxu1  ;;  %v5143_v44 = vadd.f32 %v6803_v46, %v4631_v11 }
 0x1ee   : > { %v7038_v43 = vpop.eup %7037  ;;  %7051 = vpow2.f32 %v5336_v53  ;;  %v5332_v42 = vmul.f32 1.442695, %v5288_v54  ;;  %v8288_v18 = vadd.f32 %v8226_v56, %v5138_v9  ;;  %v5034_v28 = vpop.f32.mrf.mxu0  ;;  %v4635_v35 = vadd.f32 %v6769_v20, %v8166_v15 }
 0x1ef   : > { %7053 = vrcp.f32 %v5388_v61  ;;  %v5391_v51 = vadd.f32 1.0, %v7038_v43  ;;  %v5338_v16 = vmul.f32 1.442695, %v5291_v48  ;;  %v8291_v17 = vadd.f32 %v8226_v56, %v5143_v44  ;;  %v4538_v37 = vpop.f32.mrf.mxu1 }
 0x1f0   : > { %v7040_v47 = vpop.eup %7039  ;;  %7055 = vpow2.f32 %v5332_v42  ;;  %v5289_v45 = vsub.f32 0.0, %v8288_v18  ;;  %v5141_v55 = vadd.f32 %v5034_v28, %v4629_v29  ;;  %v6804_v36 = vpop.f32.mrf.mxu0  ;;  %v4633_v30 = vadd.f32 %v4538_v37, %v8169_v31 }
 0x1f1   : > { %7057 = vrcp.f32 %v5391_v51  ;;  %v5389_v8 = vadd.f32 1.0, %v7040_v47  ;;  %v5294_v19 = vsub.f32 0.0, %v8291_v17  ;;  %v6770_v52 = vpop.f32.mrf.mxu1  ;;  %v5144_v11 = vadd.f32 %v6804_v36, %v4632_v10 }
 0x1f2   : > { %7059 = vpow2.f32 %v5338_v16  ;;  %v5334_v49 = vmul.f32 1.442695, %v5289_v45  ;;  %v8298_v53 = vadd.f32 %v8226_v56, %v5141_v55  ;;  %v5037_v63 = vpop.f32.mrf.mxu0  ;;  %v4636_v48 = vadd.f32 %v6770_v52, %v8172_v39 }
 0x1f3   : > { %v7042_v26 = vpop.eup %7041  ;;  %7061 = vrcp.f32 %v5389_v8  ;;  %v5344_v54 = vmul.f32 1.442695, %v5294_v19  ;;  %v8301_v15 = vadd.f32 %v8226_v56, %v5144_v11  ;;  %v4541_v29 = vpop.f32.mrf.mxu1  ;;  %v5142_v9 = vadd.f32 %v5037_v63, %v4630_v40 }
 0x1f4   : > { %v7044_v46 = vpop.eup %7043  ;;  %v5394_v61 = vadd.f32 1.0, %v7042_v26  ;;  %7063 = vpow2.f32 %v5334_v49  ;;  %v5292_v10 = vsub.f32 0.0, %v8298_v53  ;;  %v6807_v31 = vpop.f32.mrf.mxu0  ;;  %v4634_v40 = vadd.f32 %v4541_v29, %v8175_v32 }
 0x1f5   : > { %v5392_v20 = vadd.f32 1.0, %v7044_v46  ;;  %7065 = vpow2.f32 %v5344_v54  ;;  %v5295_v44 = vsub.f32 0.0, %v8301_v15  ;;  %v8307_v43 = vadd.f32 %v8226_v56, %v5142_v9  ;;  %v6773_v42 = vpop.f32.mrf.mxu1 }
 0x1f6   : > { %v7046_v28 = vpop.eup %7045  ;;  %7067 = vrcp.f32 %v5394_v61  ;;  %v5340_v51 = vmul.f32 1.442695, %v5292_v10  ;;  %v5147_v16 = vadd.f32 %v6807_v31, %v4635_v35  ;;  %v5050_v37 = vpop.f32.mrf.mxu0  ;;  %v4639_v8 = vadd.f32 %v6773_v42, %v8178_v0 }
 0x1f7   : > { %7069 = vrcp.f32 %v5392_v20  ;;  %v5395_v47 = vadd.f32 1.0, %v7046_v28  ;;  %v5346_v45 = vmul.f32 1.442695, %v5295_v44  ;;  %v5293_v39 = vsub.f32 0.0, %v8307_v43  ;;  %v4554_v55 = vpop.f32.mrf.mxu1 }
 0x1f8   : > { %v7048_v36 = vpop.eup %7047  ;;  %7071 = vpow2.f32 %v5340_v51  ;;  %v8313_v19 = vadd.f32 %v8226_v56, %v5147_v16  ;;  %v5145_v52 = vadd.f32 %v5050_v37, %v4633_v30  ;;  %v6808_v11 = vpop.f32.mrf.mxu0  ;;  %v4637_v29 = vadd.f32 %v4554_v55, %v8181_v62 }
 0x1f9   : > { %7073 = vrcp.f32 %v5395_v47  ;;  %v5393_v49 = vadd.f32 1.0, %v7048_v36  ;;  %v5342_v32 = vmul.f32 1.442695, %v5293_v39  ;;  %v6774_v35 = vpop.f32.mrf.mxu1  ;;  %v5148_v63 = vadd.f32 %v6808_v11, %v4636_v48 }
 0x1fa   : > { %v7050_v26 = vpop.eup %7049  ;;  %7075 = vpow2.f32 %v5346_v45  ;;  %v5298_v54 = vsub.f32 0.0, %v8313_v19  ;;  %v8318_v9 = vadd.f32 %v8226_v56, %v5145_v52  ;;  %v5053_v0 = vpop.f32.mrf.mxu0  ;;  %v8321_v30 = vadd.f32 %v6774_v35, %v8184_v34 }
 0x1fb   : > { %v7052_v46 = vpop.eup %7051  ;;  %7077 = vrcp.f32 %v5393_v49  ;;  %v8324_v61 = vadd.f32 %v8226_v56, %v5148_v63  ;;  %v4557_v10 = vpop.f32.mrf.mxu1  ;;  %v5146_v48 = vadd.f32 %v5053_v0, %v4634_v40  ;;  %v5462_v51 = vmul.f32 %v7050_v26, %v8231_v41 }
 0x1fc   : > { %v7054_v31 = vpop.eup %7053  ;;  %v5398_v20 = vadd.f32 1.0, %v7052_v46  ;;  %7079 = vpow2.f32 %v5342_v32  ;;  %v5352_v44 = vmul.f32 1.442695, %v5298_v54  ;;  %v5296_v62 = vsub.f32 0.0, %v8318_v9  ;;  %v6811_v42 = vpop.f32.mrf.mxu0 }
 0x1fd   : > { %v7056_v28 = vpop.eup %7055  ;;  %v5460_v16 = vmul.f32 %v7054_v31, %v8236_v38  ;;  %v5299_v34 = vsub.f32 0.0, %v8324_v61  ;;  %v8332_v37 = vadd.f32 %v8226_v56, %v5146_v48  ;;  %v6777_v47 = vpop.f32.mrf.mxu1  ;;  %v4638_v55 = vadd.f32 %v4557_v10, %v8187_v50 }
 0x1fe   : > { %v7058_v40 = vpop.eup %7057  ;;  %7081 = vrcp.f32 %v5398_v20  ;;  %v5396_v45 = vadd.f32 1.0, %v7056_v28  ;;  %v5348_v39 = vmul.f32 1.442695, %v5296_v62  ;;  %v5066_v36 = vpop.f32.mrf.mxu0  ;;  %v4643_v63 = vadd.f32 %v6777_v47, %v8190_v7 }
 0x1ff   : > { %v7060_v52 = vpop.eup %7059  ;;  %v5463_v11 = vmul.f32 %v7058_v40, %v8240_v6  ;;  %7083 = vpow2.f32 %v5352_v44  ;;  %v5354_v41 = vmul.f32 1.442695, %v5299_v34  ;;  %v5297_v38 = vsub.f32 0.0, %v8332_v37  ;;  %v4570_v49 = vpop.f32.mrf.mxu1 }
 0x200   : > { %v7062_v32 = vpop.eup %7061  ;;  %7085 = vrcp.f32 %v5396_v45  ;;  %v5399_v35 = vadd.f32 1.0, %v7060_v52  ;;  %v5151_v50 = vadd.f32 %v6811_v42, %v4639_v8  ;;  %v6812_v26 = vpop.f32.mrf.mxu0  ;;  %v5149_v44 = vadd.f32 %v5066_v36, %v4637_v29 }
 0x201   : > { %v7064_v54 = vpop.eup %7063  ;;  %v6213_v6 = vpack.c.bf16 %v5463_v11, %v5462_v51  ;;  %v5461_v0 = vmul.f32 %v7062_v32, %v8246_v24  ;;  %7087 = vpow2.f32 %v5348_v39  ;;  %v5350_v46 = vmul.f32 1.442695, %v5297_v38  ;;  %v6778_v10 = vpop.f32.mrf.mxu1 }
 0x202   : > { %v7066_v48 = vpop.eup %7065  ;;  %7089 = vrcp.f32 %v5399_v35  ;;  %v5397_v31 = vadd.f32 1.0, %v7064_v54  ;;  %v8345_v20 = vadd.f32 %v8226_v56, %v5151_v50  ;;  %v5069_v62 = vpop.f32.mrf.mxu0  ;;  %v4641_v28 = vadd.f32 %v4570_v49, %v8193_v22 }
 0x203   : > { %v7068_v7 = vpop.eup %7067  ;;  %6295 = vst [vmem:[%s8340_s19 + $0x8] sm:$0xff] %v6213_v6   ;;  %v6208_v8 = vpack.c.bf16 %v5461_v0, %v5460_v16  ;;  %v5402_v42 = vadd.f32 1.0, %v7066_v48  ;;  %7091 = vpow2.f32 %v5354_v41  ;;  %v4573_v24 = vpop.f32.mrf.mxu1  ;;  %v8351_v47 = vadd.f32 %v8226_v56, %v5149_v44 }
 0x204   : > { %v7070_v51 = vpop.eup %7069  ;;  %7093 = vrcp.f32 %v5397_v31  ;;  %v5302_v34 = vsub.f32 0.0, %v8345_v20  ;;  %v4644_v40 = vadd.f32 %v6778_v10, %v8196_v2  ;;  %v6815_v29 = vpop.f32.mrf.mxu0  ;;  %v5466_v39 = vmul.f32 %v7068_v7, %v8252_v1 }
 0x205   : > { %v7072_v45 = vpop.eup %7071  ;;  %6209 = vst [vmem:[%s8340_s19] sm:$0xff] %v6208_v8   ;;  %v5464_v16 = vmul.f32 %v7070_v51, %v8255_v5  ;;  %7095 = vrcp.f32 %v5402_v42  ;;  %v5152_v22 = vadd.f32 %v6812_v26, %v8321_v30  ;;  %v6781_v36 = vpop.f32.mrf.mxu1  ;;  %v5300_v38 = vsub.f32 0.0, %v8351_v47 }
 0x206   : > { %v7074_v52 = vpop.eup %7073  ;;  %v5400_v11 = vadd.f32 1.0, %v7072_v45  ;;  %7097 = vpow2.f32 %v5350_v46  ;;  %v5360_v41 = vmul.f32 1.442695, %v5302_v34  ;;  %v5082_v49 = vpop.f32.mrf.mxu0  ;;  %v4642_v1 = vadd.f32 %v4573_v24, %v8199_v23 }
 0x207   : > { %v7076_v32 = vpop.eup %7075  ;;  %v5467_v2 = vmul.f32 %v7074_v52, %v8261_v27  ;;  %v8361_v35 = vadd.f32 %v8226_v56, %v5152_v22  ;;  %v5150_v5 = vadd.f32 %v5069_v62, %v4638_v55  ;;  %v4586_v50 = vpop.f32.mrf.mxu1  ;;  %v5356_v26 = vmul.f32 1.442695, %v5300_v38 }
 0x208   : > { %v7078_v54 = vpop.eup %7077  ;;  %7099 = vrcp.f32 %v5400_v11  ;;  %v5403_v30 = vadd.f32 1.0, %v7076_v32  ;;  %v5155_v6 = vadd.f32 %v6815_v29, %v4643_v63  ;;  %v6816_v0 = vpop.f32.mrf.mxu0  ;;  %v4645_v29 = vadd.f32 %v4586_v50, %v8205_v58 }
 0x209   : > { %v7080_v46 = vpop.eup %7079  ;;  %v6223_v10 = vpack.c.bf16 %v5467_v2, %v5466_v39  ;;  %v5465_v48 = vmul.f32 %v7078_v54, %v8265_v3  ;;  %7101 = vpow2.f32 %v5360_v41  ;;  %v5303_v27 = vsub.f32 0.0, %v8361_v35  ;;  %v6782_v31 = vpop.f32.mrf.mxu1 }
 0x20a   : > { %7103 = vrcp.f32 %v5403_v30  ;;  %v5401_v44 = vadd.f32 1.0, %v7080_v46  ;;  %v8367_v23 = vadd.f32 %v8226_v56, %v5150_v5  ;;  %v8370_v55 = vadd.f32 %v8226_v56, %v5155_v6  ;;  %v5085_v62 = vpop.f32.mrf.mxu0 }
 0x20b   : > { %v7082_v63 = vpop.eup %7081  ;;  %6297 = vst [vmem:[%s8340_s19 + $0x18] sm:$0xff] %v6223_v10   ;;  %v6218_v7 = vpack.c.bf16 %v5465_v48, %v5464_v16  ;;  %7105 = vpow2.f32 %v5356_v26  ;;  %v5362_v8 = vmul.f32 1.442695, %v5303_v27  ;;  %v4647_v3 = vadd.f32 %v6781_v36, %v8202_v21  ;;  %v4589_v42 = vpop.f32.mrf.mxu1 }
 0x20c   : > { %v7084_v24 = vpop.eup %7083  ;;  %7107 = vrcp.f32 %v5401_v44  ;;  %v5301_v51 = vsub.f32 0.0, %v8367_v23  ;;  %v5306_v34 = vsub.f32 0.0, %v8370_v55  ;;  %v6819_v45 = vpop.f32.mrf.mxu0  ;;  %v5470_v22 = vmul.f32 %v7082_v63, %v8271_v59 }
 0x20d   : > { %v7086_v39 = vpop.eup %7085  ;;  %6296 = vst [vmem:[%s8340_s19 + $0x10] sm:$0xff] %v6218_v7   ;;  %v5406_v52 = vadd.f32 1.0, %v7084_v24  ;;  %7109 = vpow2.f32 %v5362_v8  ;;  %v5153_v16 = vadd.f32 %v5082_v49, %v4641_v28  ;;  %v6785_v11 = vpop.f32.mrf.mxu1  ;;  %v4648_v38 = vadd.f32 %v6782_v31, %v8208_v13 }
 0x20e   : > { %v7088_v41 = vpop.eup %7087  ;;  %v5358_v21 = vmul.f32 1.442695, %v5301_v51  ;;  %v5368_v36 = vmul.f32 1.442695, %v5306_v34  ;;  %v5156_v32 = vadd.f32 %v6816_v0, %v4644_v40  ;;  %v5098_v2 = vpop.f32.mrf.mxu0  ;;  %v5468_v54 = vmul.f32 %v7086_v39, %v8277_v4 }
 0x20f   : > { %v7090_v5 = vpop.eup %7089  ;;  %7111 = vrcp.f32 %v5406_v52  ;;  %v5404_v58 = vadd.f32 1.0, %v7088_v41  ;;  %v8382_v50 = vadd.f32 %v8226_v56, %v5153_v16  ;;  %v5154_v49 = vadd.f32 %v5085_v62, %v4642_v1  ;;  %v4602_v0 = vpop.f32.mrf.mxu1 }
 0x210   : > { %v7092_v59 = vpop.eup %7091  ;;  %v5471_v30 = vmul.f32 %v7090_v5, %v8280_v60  ;;  %7113 = vpow2.f32 %v5358_v21  ;;  %v8386_v28 = vadd.f32 %v8226_v56, %v5156_v32  ;;  %v6820_v26 = vpop.f32.mrf.mxu0  ;;  %v4646_v6 = vadd.f32 %v4589_v42, %v8211_v12 }
 0x211   : > { %v7094_v13 = vpop.eup %7093  ;;  %7115 = vrcp.f32 %v5404_v58  ;;  %v5407_v40 = vadd.f32 1.0, %v7092_v59  ;;  %v5304_v4 = vsub.f32 0.0, %v8382_v50  ;;  %v8393_v44 = vadd.f32 %v8226_v56, %v5154_v49  ;;  %v6786_v39 = vpop.f32.mrf.mxu1 }
 0x212   : > { %v7096_v46 = vpop.eup %7095  ;;  %v6233_v10 = vpack.c.bf16 %v5471_v30, %v5470_v22  ;;  %v5469_v48 = vmul.f32 %v7094_v13, %v8288_v18  ;;  %7117 = vpow2.f32 %v5368_v36  ;;  %v5307_v60 = vsub.f32 0.0, %v8386_v28  ;;  %v5101_v27 = vpop.f32.mrf.mxu0 }
 0x213   : > { %v7098_v31 = vpop.eup %7097  ;;  %7119 = vrcp.f32 %v5407_v40  ;;  %v5364_v1 = vmul.f32 1.442695, %v5304_v4  ;;  %v4651_v62 = vadd.f32 %v6785_v11, %v8214_v57  ;;  %v5159_v8 = vadd.f32 %v6819_v45, %v4647_v3  ;;  %v4605_v13 = vpop.f32.mrf.mxu1 }
 0x214   : > { %6299 = vst [vmem:[%s8340_s19 + $0x28] sm:$0xff] %v6233_v10   ;;  %v6228_v12 = vpack.c.bf16 %v5469_v48, %v5468_v54  ;;  %v5405_v63 = vadd.f32 1.0, %v7098_v31  ;;  %v5370_v7 = vmul.f32 1.442695, %v5307_v60  ;;  %v6823_v42 = vpop.f32.mrf.mxu0  ;;  %v5474_v24 = vmul.f32 %v7096_v46, %v8291_v17 }
 0x215   : > { %v7100_v18 = vpop.eup %7099  ;;  %7121 = vpow2.f32 %v5364_v1  ;;  %v5305_v51 = vsub.f32 0.0, %v8393_v44  ;;  %v5157_v34 = vadd.f32 %v5098_v2, %v4645_v29  ;;  %v8402_v57 = vadd.f32 %v8226_v56, %v5159_v8 }
 0x216   : > { %v7102_v22 = vpop.eup %7101  ;;  %6298 = vst [vmem:[%s8340_s19 + $0x20] sm:$0xff] %v6228_v12   ;;  %v5472_v52 = vmul.f32 %v7100_v18, %v8298_v53  ;;  %7123 = vrcp.f32 %v5405_v63  ;;  %v4649_v16 = vadd.f32 %v4602_v0, %v8216_v33  ;;  %v5114_v41 = vpop.f32.mrf.mxu0  ;;  %v4652_v53 = vadd.f32 %v6786_v39, %v8218_v14 }
 0x217   : > { %v7104_v3 = vpop.eup %7103  ;;  %v5410_v45 = vadd.f32 1.0, %v7102_v22  ;;  %7125 = vpow2.f32 %v5370_v7  ;;  %v5366_v11 = vmul.f32 1.442695, %v5305_v51  ;;  %v8406_v17 = vadd.f32 %v8226_v56, %v5157_v34 }
 0x218   : > { %v7106_v29 = vpop.eup %7105  ;;  %v5475_v21 = vmul.f32 %v7104_v3, %v8301_v15  ;;  %v5310_v36 = vsub.f32 0.0, %v8402_v57  ;;  %v5160_v32 = vadd.f32 %v6820_v26, %v4648_v38  ;;  %v5158_v54 = vadd.f32 %v5101_v27, %v4646_v6  ;;  %v6824_v38 = vpop.f32.mrf.mxu0 }
 0x219   : > { %v7108_v2 = vpop.eup %7107  ;;  %7127 = vrcp.f32 %v5410_v45  ;;  %v5408_v33 = vadd.f32 1.0, %v7106_v29  ;;  %v5308_v5 = vsub.f32 0.0, %v8406_v17  ;;  %v5163_v0 = vadd.f32 %v6823_v42, %v4651_v62 }
 0x21a   : > { %v7110_v58 = vpop.eup %7109  ;;  %v6243_v59 = vpack.c.bf16 %v5475_v21, %v5474_v24  ;;  %v5473_v30 = vmul.f32 %v7108_v2, %v8307_v43  ;;  %7129 = vpow2.f32 %v5366_v11  ;;  %v5376_v49 = vmul.f32 1.442695, %v5310_v36  ;;  %v5117_v42 = vpop.f32.mrf.mxu0 }
 0x21b   : > { %7131 = vrcp.f32 %v5408_v33  ;;  %v5411_v15 = vadd.f32 1.0, %v7110_v58  ;;  %v5372_v40 = vmul.f32 1.442695, %v5308_v5  ;;  %v8414_v14 = vadd.f32 %v8226_v56, %v5160_v32 }
 0x21c   : > { %v7112_v26 = vpop.eup %7111  ;;  %6301 = vst [vmem:[%s8340_s19 + $0x38] sm:$0xff] %v6243_v59   ;;  %v6238_v4 = vpack.c.bf16 %v5473_v30, %v5472_v52  ;;  %7133 = vpow2.f32 %v5376_v49  ;;  %v8418_v6 = vadd.f32 %v8226_v56, %v5158_v54  ;;  %v4650_v10 = vadd.f32 %v4605_v13, %v8221_v25 }
 0x21d   : > { %v7114_v43 = vpop.eup %7113  ;;  %7135 = vrcp.f32 %v5411_v15  ;;  %v5311_v46 = vsub.f32 0.0, %v8414_v14  ;;  %v5161_v48 = vadd.f32 %v5114_v41, %v4649_v16  ;;  %v8425_v1 = vadd.f32 %v8226_v56, %v5163_v0 }
 0x21e   : > { %v7116_v60 = vpop.eup %7115  ;;  %6300 = vst [vmem:[%s8340_s19 + $0x30] sm:$0xff] %v6238_v4   ;;  %v5409_v27 = vadd.f32 1.0, %v7114_v43  ;;  %7137 = vpow2.f32 %v5372_v40  ;;  %v5309_v31 = vsub.f32 0.0, %v8418_v6  ;;  %v5478_v63 = vmul.f32 %v7112_v26, %v8313_v19 }
 0x21f   : > { %v7118_v12 = vpop.eup %7117  ;;  %v5378_v62 = vmul.f32 1.442695, %v5311_v46  ;;  %v8429_v7 = vadd.f32 %v8226_v56, %v5161_v48  ;;  %v5164_v8 = vadd.f32 %v6824_v38, %v4652_v53  ;;  %v5314_v51 = vsub.f32 0.0, %v8425_v1 }
 0x220   : > { %v7120_v25 = vpop.eup %7119  ;;  %7139 = vrcp.f32 %v5409_v27  ;;  %v5414_v18 = vadd.f32 1.0, %v7118_v12  ;;  %v5374_v24 = vmul.f32 1.442695, %v5309_v31  ;;  %v5476_v52 = vmul.f32 %v7116_v60, %v8318_v9 }
 0x221   : > { %v5479_v34 = vmul.f32 %v7120_v25, %v8324_v61  ;;  %7141 = vpow2.f32 %v5378_v62  ;;  %v5312_v39 = vsub.f32 0.0, %v8429_v7  ;;  %v8435_v22 = vadd.f32 %v8226_v56, %v5164_v8 }
 0x222   : > { %v7122_v19 = vpop.eup %7121  ;;  %7143 = vrcp.f32 %v5414_v18  ;;  %v5384_v16 = vmul.f32 1.442695, %v5314_v51  ;;  %v5162_v3 = vadd.f32 %v5117_v42, %v4650_v10 }
 0x223   : > { %v7124_v45 = vpop.eup %7123  ;;  %v6253_v11 = vpack.c.bf16 %v5479_v34, %v5478_v63  ;;  %v5412_v41 = vadd.f32 1.0, %v7122_v19  ;;  %7145 = vpow2.f32 %v5374_v24  ;;  %v5380_v29 = vmul.f32 1.442695, %v5312_v39 }
 0x224   : > { %v7126_v21 = vpop.eup %7125  ;;  %v5477_v61 = vmul.f32 %v7124_v45, %v8332_v37  ;;  %7147 = vpow2.f32 %v5384_v16  ;;  %v5315_v36 = vsub.f32 0.0, %v8435_v22  ;;  %v8441_v53 = vadd.f32 %v8226_v56, %v5162_v3 }
 0x225   : > { %6303 = vst [vmem:[%s8340_s19 + $0x48] sm:$0xff] %v6253_v11   ;;  %7149 = vrcp.f32 %v5412_v41  ;;  %v5415_v9 = vadd.f32 1.0, %v7126_v21 }
 0x226   : > { %v7128_v32 = vpop.eup %7127  ;;  %v6248_v2 = vpack.c.bf16 %v5477_v61, %v5476_v52  ;;  %7151 = vpow2.f32 %v5380_v29  ;;  %v5386_v33 = vmul.f32 1.442695, %v5315_v36  ;;  %v5313_v5 = vsub.f32 0.0, %v8441_v53 }
 0x227   : > { %v7130_v54 = vpop.eup %7129  ;;  %7153 = vrcp.f32 %v5415_v9  ;;  %v5482_v13 = vmul.f32 %v7128_v32, %v8345_v20 }
 0x228   : > { %v7132_v58 = vpop.eup %7131  ;;  %6302 = vst [vmem:[%s8340_s19 + $0x40] sm:$0xff] %v6248_v2   ;;  %v5413_v37 = vadd.f32 1.0, %v7130_v54  ;;  %7155 = vpow2.f32 %v5386_v33  ;;  %v5382_v59 = vmul.f32 1.442695, %v5313_v5 }
 0x229   : > { %v7134_v30 = vpop.eup %7133  ;;  %v5480_v43 = vmul.f32 %v7132_v58, %v8351_v47 }
 0x22a   : > { %v7136_v56 = vpop.eup %7135  ;;  %7157 = vrcp.f32 %v5413_v37  ;;  %v5418_v40 = vadd.f32 1.0, %v7134_v30 }
 0x22b   : > { %v7138_v49 = vpop.eup %7137  ;;  %v5483_v15 = vmul.f32 %v7136_v56, %v8361_v35  ;;  %7159 = vpow2.f32 %v5382_v59 }
 0x22c   : > { %v5416_v38 = vadd.f32 1.0, %v7138_v49  ;;  %7161 = vrcp.f32 %v5418_v40 }
 0x22d   : > { %v7140_v26 = vpop.eup %7139  ;;  %v6263_v4 = vpack.c.bf16 %v5483_v15, %v5482_v13 }
 0x22e   : > { %v7142_v0 = vpop.eup %7141  ;;  %v5481_v46 = vmul.f32 %v7140_v26, %v8367_v23  ;;  %7163 = vrcp.f32 %v5416_v38 }
 0x22f   : > { %v7144_v10 = vpop.eup %7143  ;;  %6305 = vst [vmem:[%s8340_s19 + $0x58] sm:$0xff] %v6263_v4   ;;  %v5419_v48 = vadd.f32 1.0, %v7142_v0 }
 0x230   : > { %v7146_v60 = vpop.eup %7145  ;;  %v6258_v27 = vpack.c.bf16 %v5481_v46, %v5480_v43  ;;  %v5486_v23 = vmul.f32 %v7144_v10, %v8370_v55 }
 0x231   : > { %v7148_v20 = vpop.eup %7147  ;;  %7165 = vrcp.f32 %v5419_v48  ;;  %v5417_v35 = vadd.f32 1.0, %v7146_v60 }
 0x232   : > { %v7150_v31 = vpop.eup %7149  ;;  %6304 = vst [vmem:[%s8340_s19 + $0x50] sm:$0xff] %v6258_v27   ;;  %v5422_v12 = vadd.f32 1.0, %v7148_v20 }
 0x233   : > { %v7152_v63 = vpop.eup %7151  ;;  %7167 = vrcp.f32 %v5417_v35  ;;  %v5484_v34 = vmul.f32 %v7150_v31, %v8382_v50 }
 0x234   : > { %v7154_v62 = vpop.eup %7153  ;;  %v5420_v42 = vadd.f32 1.0, %v7152_v63  ;;  %7169 = vrcp.f32 %v5422_v12 }
 0x235   : > { %v7156_v47 = vpop.eup %7155  ;;  %v5487_v8 = vmul.f32 %v7154_v62, %v8386_v28 }
 0x236   : > { %v5423_v25 = vadd.f32 1.0, %v7156_v47 }
 0x237   : > { %v7158_v18 = vpop.eup %7157  ;;  %v6273_v24 = vpack.c.bf16 %v5487_v8, %v5486_v23 }
 0x238   : > { %v7160_v51 = vpop.eup %7159  ;;  %v5485_v39 = vmul.f32 %v7158_v18, %v8393_v44  ;;  %7171 = vrcp.f32 %v5423_v25 }
 0x239   : > { %6307 = vst [vmem:[%s8340_s19 + $0x68] sm:$0xff] %v6273_v24   ;;  %7173 = vrcp.f32 %v5420_v42  ;;  %v5421_v19 = vadd.f32 1.0, %v7160_v51  ;;  %v7162_v55 = vpop.eup %7161 }
 0x23a   : > { %v6268_v52 = vpack.c.bf16 %v5485_v39, %v5484_v34  ;;  %v5490_v3 = vmul.f32 %v7162_v55, %v8402_v57 }
 0x23b   : > { %7175 = vrcp.f32 %v5421_v19  ;;  %v7164_v28 = vpop.eup %7163 }
 0x23c   : > { %6306 = vst [vmem:[%s8340_s19 + $0x60] sm:$0xff] %v6268_v52   ;;  %v5488_v50 = vmul.f32 %v7164_v28, %v8406_v17 }
 0x23e   : > { %v7166_v16 = vpop.eup %7165 }
 0x23f   : > { %v5491_v45 = vmul.f32 %v7166_v16, %v8414_v14 }
 0x240   : > { %v7168_v11 = vpop.eup %7167 }
 0x241   : > { %v6283_v44 = vpack.c.bf16 %v5491_v45, %v5490_v3  ;;  %v5489_v41 = vmul.f32 %v7168_v11, %v8418_v6  ;;  %v7170_v29 = vpop.eup %7169 }
 0x242   : > { %v5494_v9 = vmul.f32 %v7170_v29, %v8425_v1 }
 0x243   : > { %6309 = vst [vmem:[%s8340_s19 + $0x78] sm:$0xff] %v6283_v44   ;;  %v6278_v21 = vpack.c.bf16 %v5489_v41, %v5488_v50 }
 0x245   : > { %v7172_v61 = vpop.eup %7171  ;;  %6308 = vst [vmem:[%s8340_s19 + $0x70] sm:$0xff] %v6278_v21  }
 0x246   : > { %v7174_v36 = vpop.eup %7173  ;;  %v5495_v57 = vmul.f32 %v7172_v61, %v8435_v22 }
 0x247   : > { %v5492_v2 = vmul.f32 %v7174_v36, %v8429_v7 }
 0x248   : > { %v7176_v32 = vpop.eup %7175  ;;  %v6293_v14 = vpack.c.bf16 %v5495_v57, %v5494_v9 }
 0x249   : > { %v5493_v17 = vmul.f32 %v7176_v32, %v8441_v53 }
 0x24a   : > { %6311 = vst [vmem:[%s8340_s19 + $0x88] sm:$0xff] %v6293_v14  }
 0x24b   : > { %v6288_v33 = vpack.c.bf16 %v5493_v17, %v5492_v2 }
 0x24d   : > { %6310 = vst [vmem:[%s8340_s19 + $0x80] sm:$0xff] %v6288_v33  }
 0x24e PF: > { %s13_s14 = sadd.s32 1, %s7199_s14   ;;  %s8489_s12 = smov %s7195_s13 }
 0x24f   : > { %p10_p5 = scmp.ge.s32.totalorder %s13_s14, 4   ;;  %s8490_s13 = smov %s8492_s15 }
 0x251   :  { %12 = sbr.rel (!%p10_p5) target bundleno = 2 (0x2), region = 76 }

</bundles_post_ra>
